<compile_context>
chip_gen: v7x
topology: tpu7x:2x2x1
jax: 0.10.0
libtpu: 0.0.40
codegen_flags: <defaults>
</compile_context>

<pallas_src>
import jax
import jax.numpy as jnp
from jax.experimental import pallas as pl
from jax.experimental.pallas import tpu as pltpu

HIDDEN_SIZE = 100
HIDDEN_PADDED = 128               # lane-aligned hidden width (zero padded)
INPUT_SIZE = 32 * 32 * 3          # 3072
OUTPUT_SIZE = 3                   # len(selected_classes)
TILE_B = 256                      # batch tile: multiple of 128, fits VMEM on v5e/v6e/v7x
MATMUL_DTYPE = jnp.bfloat16       # MXU operand dtype (f32 accumulation)


def mlp_kernel(x_ref, w1_ref, b1_ref, w2_ref, b2_ref, o_ref):
    # fc1: [TILE_B, F] @ [F, 128] -> f32, bias add + ReLU in f32.
    x = x_ref[...].astype(MATMUL_DTYPE)
    h = jnp.dot(x, w1_ref[...], preferred_element_type=jnp.float32) + b1_ref[...]
    h = jnp.maximum(h, 0.0)
    # fc2: [TILE_B, 128] @ [128, O] -> f32, bias add in f32.
    logits = (jnp.dot(h.astype(MATMUL_DTYPE), w2_ref[...],
                      preferred_element_type=jnp.float32)
              + b2_ref[...])
    # Numerically stable softmax over the class axis (un-padded, O=3).
    m = jnp.max(logits, axis=1, keepdims=True)
    e = jnp.exp(logits - m)
    s = jnp.sum(e, axis=1, keepdims=True)
    o_ref[...] = e * pl.reciprocal(s, approx=True)


def prepare_params(w1, b1, w2, b2):
    """One-time prep: PyTorch [out,in] layout -> kernel [in,out] layout,
    hidden dim zero-padded to 128, matmul operands cast to bf16."""
    pad_h = HIDDEN_PADDED - HIDDEN_SIZE
    w1p = jnp.pad(jnp.transpose(w1), ((0, 0), (0, pad_h))).astype(MATMUL_DTYPE)  # [F, 128]
    b1p = jnp.pad(b1, (0, pad_h)).reshape(1, -1).astype(jnp.float32)             # [1, 128]
    w2p = jnp.pad(jnp.transpose(w2), ((0, pad_h), (0, 0))).astype(MATMUL_DTYPE)  # [128, O]
    b2p = b2.reshape(1, -1).astype(jnp.float32)                                  # [1, O]
    return w1p, b1p, w2p, b2p


def two_layer_nn_forward(x, params, tile_b=TILE_B):
    """x: [B, INPUT_SIZE] f32; params: output of prepare_params."""
    w1p, b1p, w2p, b2p = params
    B = x.shape[0]
    n_tiles = pl.cdiv(B, tile_b)
    Bp = n_tiles * tile_b
    if Bp != B:
        x = jnp.pad(x, ((0, Bp - B), (0, 0)))   # zero rows, sliced off below

    out = pl.pallas_call(
        mlp_kernel,
        out_shape=jax.ShapeDtypeStruct((Bp, OUTPUT_SIZE), jnp.float32),
        grid_spec=pltpu.PrefetchScalarGridSpec(
            num_scalar_prefetch=0,
            grid=(n_tiles,),
            in_specs=[
                # x: one batch tile per grid step (double-buffered by Pallas).
                pl.BlockSpec((tile_b, INPUT_SIZE), lambda i: (i, 0)),
                # Weights / biases: constant block index -> resident in VMEM.
                pl.BlockSpec((INPUT_SIZE, HIDDEN_PADDED), lambda i: (0, 0)),
                pl.BlockSpec((1, HIDDEN_PADDED), lambda i: (0, 0)),
                pl.BlockSpec((HIDDEN_PADDED, OUTPUT_SIZE), lambda i: (0, 0)),
                pl.BlockSpec((1, OUTPUT_SIZE), lambda i: (0, 0)),
            ],
            out_specs=pl.BlockSpec((tile_b, OUTPUT_SIZE), lambda i: (i, 0)),
        ),
        compiler_params=pltpu.CompilerParams(
            dimension_semantics=("parallel",),
        ),
        cost_estimate=pl.CostEstimate(
            flops=2 * Bp * (INPUT_SIZE * HIDDEN_PADDED
                            + HIDDEN_PADDED * OUTPUT_SIZE),
            transcendentals=Bp * OUTPUT_SIZE,
            bytes_accessed=(Bp * INPUT_SIZE * 4                 # x (f32)
                            + INPUT_SIZE * HIDDEN_PADDED * 2    # W1 (bf16)
                            + HIDDEN_PADDED * OUTPUT_SIZE * 2   # W2 (bf16)
                            + Bp * OUTPUT_SIZE * 4),            # out (f32)
        ),
    )(x, w1p, b1p, w2p, b2p)
    return out[:B]


def init_params(key):
    """Deterministic init mimicking nn.Linear default (uniform +-1/sqrt(fan_in)),
    in PyTorch [out_features, in_features] layout."""
    k1, k2, k3, k4 = jax.random.split(key, 4)
    bound1 = 1.0 / jnp.sqrt(INPUT_SIZE)
    bound2 = 1.0 / jnp.sqrt(HIDDEN_SIZE)
    w1 = jax.random.uniform(k1, (HIDDEN_SIZE, INPUT_SIZE), jnp.float32,
                            -bound1, bound1)
    b1 = jax.random.uniform(k2, (HIDDEN_SIZE,), jnp.float32, -bound1, bound1)
    w2 = jax.random.uniform(k3, (OUTPUT_SIZE, HIDDEN_SIZE), jnp.float32,
                            -bound2, bound2)
    b2 = jax.random.uniform(k4, (OUTPUT_SIZE,), jnp.float32, -bound2, bound2)
    return w1, b1, w2, b2


def reference_forward(x, w1, b1, w2, b2):
    """Pure-JAX reference with the same bf16-operand / f32-accumulate matmuls."""
    h = jnp.dot(x.astype(MATMUL_DTYPE), jnp.transpose(w1).astype(MATMUL_DTYPE),
                preferred_element_type=jnp.float32) + b1
    h = jnp.maximum(h, 0.0)
    logits = jnp.dot(h.astype(MATMUL_DTYPE), jnp.transpose(w2).astype(MATMUL_DTYPE),
                     preferred_element_type=jnp.float32) + b2
    return jax.nn.softmax(logits, axis=1)


if __name__ == "__main__":
    key = jax.random.PRNGKey(0)
    k_x, k_p = jax.random.split(key)

    B = 8  # small demo batch (padded to one 256-row tile inside the wrapper)
    x = jax.random.normal(k_x, (B, INPUT_SIZE), jnp.float32)
    w1, b1, w2, b2 = init_params(k_p)

    # One-time parameter prep (hoisted out of the forward path).
    params = jax.tree_util.tree_map(jax.block_until_ready,
                                    prepare_params(w1, b1, w2, b2))

    fwd = jax.jit(two_layer_nn_forward)
    out = jax.block_until_ready(fwd(x, params))

    ref = reference_forward(x, w1, b1, w2, b2)
    assert out.shape == (B, OUTPUT_SIZE)
    # Tolerance covers the approx EUP reciprocal in the softmax epilogue.
    assert jnp.allclose(out, ref, atol=5e-3, rtol=0.0), "mismatch vs reference"
    assert jnp.allclose(jnp.sum(out, axis=1), 1.0, atol=5e-3), \
        "softmax rows must sum to ~1"

    print("KERNEL_OK")
</pallas_src>

<mosaic_0001>
module attributes {stable_mosaic.version = 11 : i64} {
  func.func @mlp_kernel(%arg0: i32, %arg1: memref<256x3072xf32, #tpu.memory_space<vmem>>, %arg2: memref<3072x128xbf16, #tpu.memory_space<vmem>>, %arg3: memref<1x128xf32, #tpu.memory_space<vmem>>, %arg4: memref<128x3xbf16, #tpu.memory_space<vmem>>, %arg5: memref<1x3xf32, #tpu.memory_space<vmem>>, %arg6: memref<256x3xf32, #tpu.memory_space<vmem>>) attributes {dimension_semantics = [#tpu.dimension_semantics<parallel>], iteration_bounds = array<i64: 1>, scalar_prefetch = 0 : i64, scratch_operands = 0 : i64, tpu.core_type = #tpu.core_type<tc>, window_params = [{transform_indices = @transform_0, window_bounds = array<i64: 256, 3072>}, {pipeline_mode = #tpu.pipeline_mode<synchronous>, transform_indices = @transform_1, window_bounds = array<i64: 3072, 128>}, {pipeline_mode = #tpu.pipeline_mode<synchronous>, transform_indices = @transform_2, window_bounds = array<i64: 1, 128>}, {pipeline_mode = #tpu.pipeline_mode<synchronous>, transform_indices = @transform_3, window_bounds = array<i64: 128, 3>}, {pipeline_mode = #tpu.pipeline_mode<synchronous>, transform_indices = @transform_4, window_bounds = array<i64: 1, 3>}, {transform_indices = @transform_5, window_bounds = array<i64: 256, 3>}]} {
    %c0 = arith.constant 0 : index
    %c0_0 = arith.constant 0 : index
    %0 = vector.load %arg1[%c0, %c0_0] : memref<256x3072xf32, #tpu.memory_space<vmem>>, vector<256x3072xf32>
    %1 = arith.truncf %0 : vector<256x3072xf32> to vector<256x3072xbf16>
    %c0_1 = arith.constant 0 : index
    %c0_2 = arith.constant 0 : index
    %2 = vector.load %arg2[%c0_1, %c0_2] : memref<3072x128xbf16, #tpu.memory_space<vmem>>, vector<3072x128xbf16>
    %cst = arith.constant dense<0.000000e+00> : vector<256x128xf32>
    %3 = tpu.matmul %1, %2, %cst {dimension_numbers = #tpu.dot_dimension_numbers<[1], [0], [0], [1], [0, 0, 1, 1], [], []>} : vector<256x3072xbf16>, vector<3072x128xbf16>, vector<256x128xf32> -> vector<256x128xf32>
    %c0_3 = arith.constant 0 : index
    %c0_4 = arith.constant 0 : index
    %4 = vector.load %arg3[%c0_3, %c0_4] : memref<1x128xf32, #tpu.memory_space<vmem>>, vector<1x128xf32>
    %5 = vector.broadcast %4 : vector<1x128xf32> to vector<256x128xf32>
    %6 = arith.addf %3, %5 : vector<256x128xf32>
    %cst_5 = arith.constant 0.000000e+00 : f32
    %7 = vector.broadcast %cst_5 : f32 to vector<256x128xf32>
    %8 = arith.maximumf %6, %7 : vector<256x128xf32>
    %9 = arith.truncf %8 : vector<256x128xf32> to vector<256x128xbf16>
    %c0_6 = arith.constant 0 : index
    %c0_7 = arith.constant 0 : index
    %10 = vector.load %arg4[%c0_6, %c0_7] : memref<128x3xbf16, #tpu.memory_space<vmem>>, vector<128x3xbf16>
    %cst_8 = arith.constant dense<0.000000e+00> : vector<256x3xf32>
    %11 = tpu.matmul %9, %10, %cst_8 {dimension_numbers = #tpu.dot_dimension_numbers<[1], [0], [0], [1], [0, 0, 1, 1], [], []>} : vector<256x128xbf16>, vector<128x3xbf16>, vector<256x3xf32> -> vector<256x3xf32>
    %c0_9 = arith.constant 0 : index
    %c0_10 = arith.constant 0 : index
    %12 = vector.load %arg5[%c0_9, %c0_10] : memref<1x3xf32, #tpu.memory_space<vmem>>, vector<1x3xf32>
    %13 = vector.broadcast %12 : vector<1x3xf32> to vector<256x3xf32>
    %14 = arith.addf %11, %13 : vector<256x3xf32>
    %cst_11 = arith.constant dense<0xFF800000> : vector<256xf32>
    %15 = vector.multi_reduction <maximumf>, %14, %cst_11 [1] : vector<256x3xf32> to vector<256xf32>
    %16 = vector.shape_cast %15 : vector<256xf32> to vector<256x1xf32>
    %17 = vector.broadcast %16 : vector<256x1xf32> to vector<256x3xf32>
    %18 = arith.subf %14, %17 : vector<256x3xf32>
    %19 = math.exp %18 : vector<256x3xf32>
    %cst_12 = arith.constant dense<0.000000e+00> : vector<256xf32>
    %20 = vector.multi_reduction <add>, %19, %cst_12 [1] : vector<256x3xf32> to vector<256xf32>
    %21 = vector.shape_cast %20 : vector<256xf32> to vector<256x1xf32>
    %22 = tpu.reciprocal %21 {approx = true} : vector<256x1xf32> -> vector<256x1xf32>
    %23 = vector.broadcast %22 : vector<256x1xf32> to vector<256x3xf32>
    %24 = arith.mulf %19, %23 : vector<256x3xf32>
    %c0_13 = arith.constant 0 : index
    %c0_14 = arith.constant 0 : index
    %25 = vector.load %arg6[%c0_13, %c0_14] : memref<256x3xf32, #tpu.memory_space<vmem>>, vector<256x3xf32>
    tpu.vector_store %arg6[%c0_13, %c0_14], %24 {strides = array<i32>} : memref<256x3xf32, #tpu.memory_space<vmem>>, vector<256x3xf32>,
    return
  }
  func.func @transform_0(%arg0: i32) -> (i32, i32) {
    %c0_i32 = arith.constant 0 : i32
    %c0_i32_0 = arith.constant 0 : i32
    return %arg0, %c0_i32 : i32, i32
  }
  func.func @transform_1(%arg0: i32) -> (i32, i32) {
    %c0_i32 = arith.constant 0 : i32
    %c0_i32_0 = arith.constant 0 : i32
    %c0_i32_1 = arith.constant 0 : i32
    return %c0_i32, %c0_i32_0 : i32, i32
  }
  func.func @transform_2(%arg0: i32) -> (i32, i32) {
    %c0_i32 = arith.constant 0 : i32
    %c0_i32_0 = arith.constant 0 : i32
    %c0_i32_1 = arith.constant 0 : i32
    return %c0_i32, %c0_i32_0 : i32, i32
  }
  func.func @transform_3(%arg0: i32) -> (i32, i32) {
    %c0_i32 = arith.constant 0 : i32
    %c0_i32_0 = arith.constant 0 : i32
    %c0_i32_1 = arith.constant 0 : i32
    return %c0_i32, %c0_i32_0 : i32, i32
  }
  func.func @transform_4(%arg0: i32) -> (i32, i32) {
    %c0_i32 = arith.constant 0 : i32
    %c0_i32_0 = arith.constant 0 : i32
    %c0_i32_1 = arith.constant 0 : i32
    return %c0_i32, %c0_i32_0 : i32, i32
  }
  func.func @transform_5(%arg0: i32) -> (i32, i32) {
    %c0_i32 = arith.constant 0 : i32
    %c0_i32_0 = arith.constant 0 : i32
    return %arg0, %c0_i32 : i32, i32
  }
}

</mosaic_0001>

<bundles_post_ra>
// kernel: two_layer_nn_forward.1
= control target key start
LH: loop header
LB: loop body
LE: loop exit
PB: predicated region body
PF: predicated region fallthrough
CT: control target
= control target key end

     0   :  { %vm4928_vm0 = vcmask 23552   ;;  %s11797_s1 = inlined_call_operand.vmem [shape: bf16[3072,128], index: 1, kind: input, shape index: {}]   ;;  %s11798_s0 = inlined_call_operand.vmem [shape: f32[256,3072], index: 0, kind: input, shape index: {}]   ;;  %s11799_s2 = inlined_call_operand.vmem [shape: f32[1,128], index: 2, kind: input, shape index: {}]   ;;  %s11800_s3 = inlined_call_operand.vmem [shape: bf16[128,3], index: 3, kind: input, shape index: {}]   ;;  %s11801_s4 = inlined_call_operand.vmem [shape: f32[1,3], index: 4, kind: input, shape index: {}]   ;;  %s11802_s5 = inlined_call_operand.vmem [shape: f32[256,3], index: 5, kind: output, shape index: {}]  }
   0x1   :  { %v6951_v0 = vld [vmem:[%s11797_s1 + $0x40] sm:$0xff]   ;;  %v6953_v2 = vld [vmem:[%s11797_s1 + $0x48] sm:$0xff]   ;;  %v6955_v4 = vld [vmem:[%s11797_s1 + $0x50] sm:$0xff]  }
   0x2   :  { %v6952_v1 = vld [vmem:[%s11797_s1] sm:$0xff]   ;;  %5519 = vmatprep.subr.bf16.mxu0 %v6951_v0  ;;  %6935 = vmatprep.subr.bf16.mxu1 %v6951_v0  ;;  %v6954_v3 = vld [vmem:[%s11797_s1 + $0x8] sm:$0xff]   ;;  %v6956_v5 = vld [vmem:[%s11797_s1 + $0x10] sm:$0xff]  }
   0x3   :  { %5520 = vmatpush3.bf16.msra.mxu0 %v6952_v1  ;;  %6943 = vmatpush3.bf16.msra.mxu1 %v6952_v1  ;;  %v6957_v6 = vld [vmem:[%s11797_s1 + $0x58] sm:$0xff]   ;;  %v6959_v8 = vld [vmem:[%s11797_s1 + $0x60] sm:$0xff]   ;;  %v6961_v10 = vld [vmem:[%s11797_s1 + $0x68] sm:$0xff]  }
   0x4   :  { %5521 = vmatprep.subr.bf16.mxu0 %v6953_v2  ;;  %6936 = vmatprep.subr.bf16.mxu1 %v6953_v2  ;;  %v6958_v7 = vld [vmem:[%s11797_s1 + $0x18] sm:$0xff]   ;;  %v6960_v9 = vld [vmem:[%s11797_s1 + $0x20] sm:$0xff]   ;;  %v22_v11 = vld [vmem:[%s11798_s0 + $0x8] sm:$0xff] }
   0x5   :  { %v46_v12 = vld [vmem:[%s11798_s0 + $0xc8] sm:$0xff]  ;;  %v6963_v18 = vld [vmem:[%s11797_s1 + $0x70] sm:$0xff]   ;;  %v6965_v20 = vld [vmem:[%s11797_s1 + $0x78] sm:$0xff]  }
   0x6   :  { %v598_v13 = vld [vmem:[%s11798_s0 + $0x1208] sm:$0xff]  ;;  %v790_v14 = vpack.c.bf16 %v46_v12, %v22_v11  ;;  %v6964_v19 = vld [vmem:[%s11797_s1 + $0x30] sm:$0xff]   ;;  %v6966_v21 = vld [vmem:[%s11797_s1 + $0x38] sm:$0xff]  }
   0x7   :  { %5522 = vmatpush3.bf16.msra.mxu0 %v6954_v3  ;;  %6944 = vmatpush3.bf16.msra.mxu1 %v6954_v3  ;;  %v622_v15 = vld [vmem:[%s11798_s0 + $0x12c8] sm:$0xff]  ;;  %v21_v22 = vld [vmem:[%s11798_s0] sm:$0xff]  ;;  %v6971_v42 = vld [vmem:[%s11797_s1 + $0xd0] sm:$0xff]  }
   0x8   :  { %5523 = vmatprep.subr.bf16.mxu0 %v6955_v4  ;;  %6937 = vmatprep.subr.bf16.mxu1 %v6955_v4  ;;  %v1078_v16 = vpack.c.bf16 %v622_v15, %v598_v13  ;;  %v6962_v17 = vld [vmem:[%s11797_s1 + $0x28] sm:$0xff]   ;;  %v45_v23 = vld [vmem:[%s11798_s0 + $0xc0] sm:$0xff]  ;;  %v6972_v49 = vld [vmem:[%s11797_s1 + $0x90] sm:$0xff]  }
   0x9   :  { %2748 = vmatprep.mubr.bf16.mxu0 %v790_v14  ;;  %v597_v24 = vld [vmem:[%s11798_s0 + $0x1200] sm:$0xff]  ;;  %v70_v27 = vld [vmem:[%s11798_s0 + $0x188] sm:$0xff]  ;;  %v789_v31 = vpack.c.bf16 %v45_v23, %v21_v22  ;;  %v6973_v51 = vld [vmem:[%s11797_s1 + $0xd8] sm:$0xff]  }
   0xa   :  { %2844 = vmatprep.mubr.bf16.mxu1 %v1078_v16  ;;  %v621_v25 = vld [vmem:[%s11798_s0 + $0x12c0] sm:$0xff]  ;;  %v94_v28 = vld [vmem:[%s11798_s0 + $0x248] sm:$0xff]  ;;  %v6974_v53 = vld [vmem:[%s11797_s1 + $0x98] sm:$0xff]  }
   0xb   :  { %5524 = vmatpush3.bf16.msra.mxu0 %v6956_v5  ;;  %6945 = vmatpush3.bf16.msra.mxu1 %v6956_v5  ;;  %v6967_v26 = vld [vmem:[%s11797_s1 + $0xc0] sm:$0xff]   ;;  %v646_v29 = vld [vmem:[%s11798_s0 + $0x1388] sm:$0xff]  ;;  %v1077_v32 = vpack.c.bf16 %v621_v25, %v597_v24  ;;  %v814_v34 = vpack.c.bf16 %v94_v28, %v70_v27  ;;  %v24_v13 = vld [vmem:[%s11798_s0 + $0x18] sm:$0xff] }
   0xc   :  { %5525 = vmatprep.subr.bf16.mxu0 %v6957_v6  ;;  %6938 = vmatprep.subr.bf16.mxu1 %v6957_v6  ;;  %v670_v30 = vld [vmem:[%s11798_s0 + $0x1448] sm:$0xff]  ;;  %v6968_v33 = vld [vmem:[%s11797_s1 + $0x80] sm:$0xff]   ;;  %v48_v14 = vld [vmem:[%s11798_s0 + $0xd8] sm:$0xff] }
   0xd   :  { %v6969_v35 = vld [vmem:[%s11797_s1 + $0xc8] sm:$0xff]   ;;  %v1102_v36 = vpack.c.bf16 %v670_v30, %v646_v29  ;;  %v69_v38 = vld [vmem:[%s11798_s0 + $0x180] sm:$0xff]  ;;  %v23_v24 = vld [vmem:[%s11798_s0 + $0x10] sm:$0xff] }
   0xe   :  { %v6970_v37 = vld [vmem:[%s11797_s1 + $0x88] sm:$0xff]   ;;  %v93_v39 = vld [vmem:[%s11798_s0 + $0x240] sm:$0xff]  ;;  %v47_v25 = vld [vmem:[%s11798_s0 + $0xd0] sm:$0xff] }
   0xf   :  { %5526 = vmatpush3.bf16.msra.mxu0 %v6958_v7  ;;  %6946 = vmatpush3.bf16.msra.mxu1 %v6958_v7  ;;  %v645_v40 = vld [vmem:[%s11798_s0 + $0x1380] sm:$0xff]  ;;  %v118_v43 = vld [vmem:[%s11798_s0 + $0x308] sm:$0xff]  ;;  %v813_v47 = vpack.c.bf16 %v93_v39, %v69_v38 }
  0x10   :  { %5527 = vmatprep.subr.bf16.mxu0 %v6959_v8  ;;  %6939 = vmatprep.subr.bf16.mxu1 %v6959_v8  ;;  %v669_v41 = vld [vmem:[%s11798_s0 + $0x1440] sm:$0xff]  ;;  %v142_v44 = vld [vmem:[%s11798_s0 + $0x3c8] sm:$0xff] }
  0x11   :  { %v694_v45 = vld [vmem:[%s11798_s0 + $0x1508] sm:$0xff]  ;;  %v1101_v48 = vpack.c.bf16 %v669_v41, %v645_v40  ;;  %v838_v50 = vpack.c.bf16 %v142_v44, %v118_v43  ;;  %v117_v54 = vld [vmem:[%s11798_s0 + $0x300] sm:$0xff]  ;;  %v71_v41 = vld [vmem:[%s11798_s0 + $0x190] sm:$0xff] }
  0x12   :  { %v718_v46 = vld [vmem:[%s11798_s0 + $0x15c8] sm:$0xff]  ;;  %v141_v55 = vld [vmem:[%s11798_s0 + $0x3c0] sm:$0xff]  ;;  %v95_v43 = vld [vmem:[%s11798_s0 + $0x250] sm:$0xff] }
  0x13   :  { %5528 = vmatpush3.bf16.msra.mxu0 %v6960_v9  ;;  %6947 = vmatpush3.bf16.msra.mxu1 %v6960_v9  ;;  %v1126_v52 = vpack.c.bf16 %v718_v46, %v694_v45  ;;  %v693_v56 = vld [vmem:[%s11798_s0 + $0x1500] sm:$0xff]  ;;  %v166_v59 = vld [vmem:[%s11798_s0 + $0x488] sm:$0xff]  ;;  %v837_v63 = vpack.c.bf16 %v141_v55, %v117_v54 }
  0x14   :  { %5529 = vmatprep.subr.bf16.mxu0 %v6961_v10  ;;  %6940 = vmatprep.subr.bf16.mxu1 %v6961_v10  ;;  %v717_v57 = vld [vmem:[%s11798_s0 + $0x15c0] sm:$0xff]  ;;  %v190_v60 = vld [vmem:[%s11798_s0 + $0x548] sm:$0xff]  ;;  %v6979_v10 = vld [vmem:[%s11797_s1 + $0xf0] sm:$0xff]  }
  0x15   :  { %v6975_v58 = vld [vmem:[%s11797_s1 + $0xe0] sm:$0xff]   ;;  %v742_v61 = vld [vmem:[%s11798_s0 + $0x1688] sm:$0xff]  ;;  %v1125_v0 = vpack.c.bf16 %v717_v57, %v693_v56  ;;  %v862_v2 = vpack.c.bf16 %v190_v60, %v166_v59  ;;  %v6990_v56 = vld [vmem:[%s11797_s1 + $0x190] sm:$0xff]  }
  0x16   :  { %v766_v62 = vld [vmem:[%s11798_s0 + $0x1748] sm:$0xff]  ;;  %v6976_v1 = vld [vmem:[%s11797_s1 + $0xa0] sm:$0xff]   ;;  %v6994_v57 = vld [vmem:[%s11797_s1 + $0x110] sm:$0xff]  }
  0x17   :  { %5530 = vmatpush3.bf16.msra.mxu0 %v6962_v17  ;;  %6948 = vmatpush3.bf16.msra.mxu1 %v6962_v17  ;;  %v6977_v3 = vld [vmem:[%s11797_s1 + $0xe8] sm:$0xff]   ;;  %v1150_v4 = vpack.c.bf16 %v766_v62, %v742_v61  ;;  %v165_v6 = vld [vmem:[%s11798_s0 + $0x480] sm:$0xff]  ;;  %v6980_v17 = vld [vmem:[%s11797_s1 + $0xb0] sm:$0xff]  }
  0x18   :  { %5531 = vmatprep.subr.bf16.mxu0 %v6963_v18  ;;  %6941 = vmatprep.subr.bf16.mxu1 %v6963_v18  ;;  %v6978_v5 = vld [vmem:[%s11797_s1 + $0xa8] sm:$0xff]   ;;  %v189_v7 = vld [vmem:[%s11798_s0 + $0x540] sm:$0xff]  ;;  %v119_v60 = vld [vmem:[%s11798_s0 + $0x310] sm:$0xff] }
  0x19   :  { %v741_v8 = vld [vmem:[%s11798_s0 + $0x1680] sm:$0xff]  ;;  %v214_v11 = vld [vmem:[%s11798_s0 + $0x608] sm:$0xff]  ;;  %v861_v15 = vpack.c.bf16 %v189_v7, %v165_v6  ;;  %v143_v61 = vld [vmem:[%s11798_s0 + $0x3d0] sm:$0xff] }
  0x1a   :  { %v765_v9 = vld [vmem:[%s11798_s0 + $0x1740] sm:$0xff]  ;;  %v238_v12 = vld [vmem:[%s11798_s0 + $0x6c8] sm:$0xff]  ;;  %v6995_v62 = vld [vmem:[%s11797_s1 + $0x158] sm:$0xff]   ;;  %v839_v7 = vpack.c.bf16 %v143_v61, %v119_v60 }
  0x1b   :  { %5532 = vmatpush3.bf16.msra.mxu0 %v6964_v19  ;;  %6949 = vmatpush3.bf16.msra.mxu1 %v6964_v19  ;;  %v1149_v16 = vpack.c.bf16 %v765_v9, %v741_v8  ;;  %v886_v18 = vpack.c.bf16 %v238_v12, %v214_v11  ;;  %v6981_v19 = vld [vmem:[%s11797_s1 + $0xf8] sm:$0xff]   ;;  %v213_v22 = vld [vmem:[%s11798_s0 + $0x600] sm:$0xff]  ;;  %v262_v28 = vld [vmem:[%s11798_s0 + $0x788] sm:$0xff] }
  0x1c   :  { %5533 = vmatprep.subr.bf16.mxu0 %v6965_v20  ;;  %6942 = vmatprep.subr.bf16.mxu1 %v6965_v20  ;;  %v792_v20 = vpack.c.bf16 %v48_v14, %v24_v13  ;;  %v237_v23 = vld [vmem:[%s11798_s0 + $0x6c0] sm:$0xff]  ;;  %v286_v29 = vld [vmem:[%s11798_s0 + $0x848] sm:$0xff]  ;;  %v311_v60 = vld [vmem:[%s11798_s0 + $0x910] sm:$0xff] }
  0x1d   :  { %v6983_v27 = vld [vmem:[%s11797_s1 + $0x1c0] sm:$0xff]   ;;  %v6985_v38 = vld [vmem:[%s11797_s1 + $0x1c8] sm:$0xff]   ;;  %v7011_v61 = vld [vmem:[%s11797_s1 + $0x1f0] sm:$0xff]  }
  0x1e   :  { %v6988_v30 = vld [vmem:[%s11797_s1 + $0x100] sm:$0xff]   ;;  %v310_v44 = vld [vmem:[%s11798_s0 + $0x908] sm:$0xff] }
  0x1f   :  { %5534 = vmatpush3.bf16.msra.mxu0 %v6966_v21  ;;  %6950 = vmatpush3.bf16.msra.mxu1 %v6966_v21  ;;  %v6982_v21 = vld [vmem:[%s11797_s1 + $0xb8] sm:$0xff]   ;;  %v261_v39 = vld [vmem:[%s11798_s0 + $0x780] sm:$0xff]  ;;  %v6992_v45 = vld [vmem:[%s11797_s1 + $0x108] sm:$0xff]  }
  0x20   :  { %5631 = vmatprep.subr.bf16.mxu1 %v6967_v26  ;;  %v6987_v26 = vld [vmem:[%s11797_s1 + $0x140] sm:$0xff]   ;;  %v334_v46 = vld [vmem:[%s11798_s0 + $0x9c8] sm:$0xff] }
  0x21   :  { %5743 = vmatprep.subr.bf16.mxu0 %v6987_v26  ;;  %v285_v40 = vld [vmem:[%s11798_s0 + $0x840] sm:$0xff]  ;;  %v934_v54 = vpack.c.bf16 %v334_v46, %v310_v44  ;;  %v7001_v14 = vld [vmem:[%s11797_s1 + $0x168] sm:$0xff]   ;;  %v263_v46 = vld [vmem:[%s11798_s0 + $0x790] sm:$0xff] }
  0x22   :  { %2749 = vmatmul.mubr.bf16.vlgmr.msra.gmra.mrb[0].mxu0 %v789_v31  ;;  %2845 = vmatmul.mubr.bf16.vlgmr.msra.gmra.mrb[0].mxu1 %v1077_v32  ;;  %v72_v31 = vld [vmem:[%s11798_s0 + $0x198] sm:$0xff]  ;;  %v333_v59 = vld [vmem:[%s11798_s0 + $0x9c0] sm:$0xff] }
  0x23   :  { %5632 = vmatpush3.bf16.msra.mxu1 %v6968_v33  ;;  %2756 = vmatprep.mubr.bf16.mxu0 %v814_v34  ;;  %v96_v32 = vld [vmem:[%s11798_s0 + $0x258] sm:$0xff]  ;;  %v885_v33 = vpack.c.bf16 %v237_v23, %v213_v22  ;;  %v791_v34 = vpack.c.bf16 %v47_v25, %v23_v24  ;;  %v6999_v11 = vld [vmem:[%s11797_s1 + $0x120] sm:$0xff]   ;;  %v7003_v22 = vld [vmem:[%s11797_s1 + $0x170] sm:$0xff]  }
  0x24   :  { %5633 = vmatprep.subr.bf16.mxu1 %v6969_v35  ;;  %2852 = vmatprep.mubr.bf16.mxu1 %v1102_v36  ;;  %v6984_v35 = vld [vmem:[%s11797_s1 + $0x180] sm:$0xff]   ;;  %v910_v36 = vpack.c.bf16 %v286_v29, %v262_v28 }
  0x25   :  { %5744 = vmatpush3.bf16.msra.mxu0 %v6988_v30  ;;  %v357_v12 = vld [vmem:[%s11798_s0 + $0xa80] sm:$0xff]  ;;  %v215_v30 = vld [vmem:[%s11798_s0 + $0x610] sm:$0xff] }
  0x26   :  { %v381_v13 = vld [vmem:[%s11798_s0 + $0xb40] sm:$0xff] }
  0x27   :  { %5634 = vmatpush3.bf16.msra.mxu1 %v6970_v37  ;;  %v816_v37 = vpack.c.bf16 %v96_v32, %v72_v31  ;;  %v957_v23 = vpack.c.bf16 %v381_v13, %v357_v12  ;;  %v405_v28 = vld [vmem:[%s11798_s0 + $0xc00] sm:$0xff]  ;;  %v239_v31 = vld [vmem:[%s11798_s0 + $0x6d0] sm:$0xff]  ;;  %v7005_v32 = vld [vmem:[%s11797_s1 + $0x178] sm:$0xff]  }
  0x28   :  { %5635 = vmatprep.subr.bf16.mxu1 %v6971_v42  ;;  %v6991_v42 = vld [vmem:[%s11797_s1 + $0x148] sm:$0xff]   ;;  %v429_v29 = vld [vmem:[%s11798_s0 + $0xcc0] sm:$0xff]  ;;  %v359_v12 = vld [vmem:[%s11798_s0 + $0xa90] sm:$0xff] }
  0x29   :  { %5745 = vmatprep.subr.bf16.mxu0 %v6991_v42  ;;  %v453_v44 = vld [vmem:[%s11798_s0 + $0xd80] sm:$0xff]  ;;  %v383_v13 = vld [vmem:[%s11798_s0 + $0xb50] sm:$0xff] }
  0x2a   :  { %2757 = vmatmul.mubr.bf16.gmra.mrb[4].mxu0 %v813_v47  ;;  %2853 = vmatmul.mubr.bf16.gmra.mrb[4].mxu1 %v1101_v48  ;;  %v120_v47 = vld [vmem:[%s11798_s0 + $0x318] sm:$0xff]  ;;  %v6986_v48 = vld [vmem:[%s11797_s1 + $0x188] sm:$0xff]  }
  0x2b   :  { %5636 = vmatpush3.bf16.msra.mxu1 %v6972_v49  ;;  %2764 = vmatprep.mubr.bf16.mxu0 %v838_v50  ;;  %v144_v49 = vld [vmem:[%s11798_s0 + $0x3d8] sm:$0xff]  ;;  %v6989_v50 = vld [vmem:[%s11797_s1 + $0x1d0] sm:$0xff]  }
  0x2c   :  { %5637 = vmatprep.subr.bf16.mxu1 %v6973_v51  ;;  %2860 = vmatprep.mubr.bf16.mxu1 %v1126_v52  ;;  %v6993_v51 = vld [vmem:[%s11797_s1 + $0x150] sm:$0xff]   ;;  %v909_v52 = vpack.c.bf16 %v285_v40, %v261_v39  ;;  %v840_v55 = vpack.c.bf16 %v144_v49, %v120_v47  ;;  %v7008_v39 = vld [vmem:[%s11797_s1 + $0x1a0] sm:$0xff]   ;;  %v981_v40 = vpack.c.bf16 %v429_v29, %v405_v28  ;;  %v7009_v49 = vld [vmem:[%s11797_s1 + $0x1e8] sm:$0xff]  }
  0x2d   :  { %5746 = vmatpush3.bf16.msra.mxu0 %v6992_v45  ;;  %v477_v45 = vld [vmem:[%s11798_s0 + $0xe40] sm:$0xff]  ;;  %v287_v47 = vld [vmem:[%s11798_s0 + $0x850] sm:$0xff]  ;;  %v456_v28 = vld [vmem:[%s11798_s0 + $0xd98] sm:$0xff] }
  0x2e   :  { %5747 = vmatprep.subr.bf16.mxu0 %v6993_v51  ;;  %v526_v51 = vld [vmem:[%s11798_s0 + $0xfc8] sm:$0xff]  ;;  %v480_v29 = vld [vmem:[%s11798_s0 + $0xe58] sm:$0xff] }
  0x2f   :  { %5638 = vmatpush3.bf16.msra.mxu1 %v6974_v53  ;;  %v815_v53 = vpack.c.bf16 %v95_v43, %v71_v41  ;;  %v887_v41 = vpack.c.bf16 %v239_v31, %v215_v30  ;;  %v74_v30 = vld [vmem:[%s11798_s0 + $0x1a8] sm:$0xff] }
  0x30   :  { %5639 = vmatprep.subr.bf16.mxu1 %v6975_v58  ;;  %v309_v58 = vld [vmem:[%s11798_s0 + $0x900] sm:$0xff]  ;;  %v98_v31 = vld [vmem:[%s11798_s0 + $0x268] sm:$0xff] }
  0x31   :  { %5748 = vmatpush3.bf16.msra.mxu0 %v6994_v57  ;;  %v933_v6 = vpack.c.bf16 %v333_v59, %v309_v58  ;;  %v501_v58 = vld [vmem:[%s11798_s0 + $0xf00] sm:$0xff] }
  0x32   :  { %2765 = vmatmul.mubr.bf16.gmra.mrb[8].mxu0 %v837_v63  ;;  %2861 = vmatmul.mubr.bf16.gmra.mrb[8].mxu1 %v1125_v0  ;;  %v358_v63 = vld [vmem:[%s11798_s0 + $0xa88] sm:$0xff]  ;;  %v525_v59 = vld [vmem:[%s11798_s0 + $0xfc0] sm:$0xff] }
  0x33   :  { %5640 = vmatpush3.bf16.msra.mxu1 %v6976_v1  ;;  %2772 = vmatprep.mubr.bf16.mxu0 %v862_v2  ;;  %v382_v0 = vld [vmem:[%s11798_s0 + $0xb48] sm:$0xff]  ;;  %v168_v1 = vld [vmem:[%s11798_s0 + $0x498] sm:$0xff] }
  0x34   :  { %5641 = vmatprep.subr.bf16.mxu1 %v6977_v3  ;;  %2868 = vmatprep.mubr.bf16.mxu1 %v1150_v4  ;;  %v192_v2 = vld [vmem:[%s11798_s0 + $0x558] sm:$0xff]  ;;  %v6997_v4 = vld [vmem:[%s11797_s1 + $0x160] sm:$0xff]   ;;  %v958_v8 = vpack.c.bf16 %v382_v0, %v358_v63  ;;  %v550_v63 = vld [vmem:[%s11798_s0 + $0x1088] sm:$0xff] }
  0x35   :  { %v6996_v3 = vld [vmem:[%s11797_s1 + $0x118] sm:$0xff]   ;;  %5749 = vmatprep.subr.bf16.mxu0 %v6995_v62  ;;  %v864_v9 = vpack.c.bf16 %v192_v2, %v168_v1  ;;  %v335_v62 = vld [vmem:[%s11798_s0 + $0x9d0] sm:$0xff]  ;;  %v574_v1 = vld [vmem:[%s11798_s0 + $0x1148] sm:$0xff] }
  0x36   :  { %5750 = vmatpush3.bf16.msra.mxu0 %v6996_v3  ;;  %v7012_v0 = vld [vmem:[%s11797_s1 + $0x1b0] sm:$0xff]   ;;  %v360_v2 = vld [vmem:[%s11798_s0 + $0xa98] sm:$0xff] }
  0x37   :  { %5642 = vmatpush3.bf16.msra.mxu1 %v6978_v5  ;;  %v6998_v5 = vld [vmem:[%s11797_s1 + $0x1d8] sm:$0xff]   ;;  %5751 = vmatprep.subr.bf16.mxu0 %v6997_v4  ;;  %v1029_v4 = vpack.c.bf16 %v525_v59, %v501_v58  ;;  %v7024_v58 = vld [vmem:[%s11797_s1 + $0x210] sm:$0xff]   ;;  %v170_v59 = vld [vmem:[%s11798_s0 + $0x4a8] sm:$0xff] }
  0x38   :  { %5643 = vmatprep.subr.bf16.mxu1 %v6979_v10  ;;  %v7000_v10 = vld [vmem:[%s11797_s1 + $0x198] sm:$0xff]  }
  0x39   :  { %v384_v3 = vld [vmem:[%s11798_s0 + $0xb58] sm:$0xff] }
  0x3a   :  { %2773 = vmatmul.mubr.bf16.gmra.mrb[12].mxu0 %v861_v15  ;;  %2869 = vmatmul.mubr.bf16.gmra.mrb[12].mxu1 %v1149_v16  ;;  %v167_v15 = vld [vmem:[%s11798_s0 + $0x490] sm:$0xff] }
  0x3b   :  { %5644 = vmatpush3.bf16.msra.mxu1 %v6980_v17  ;;  %2780 = vmatprep.mubr.bf16.mxu0 %v886_v18  ;;  %v191_v16 = vld [vmem:[%s11798_s0 + $0x550] sm:$0xff]  ;;  %v406_v17 = vld [vmem:[%s11798_s0 + $0xc08] sm:$0xff] }
  0x3c   :  { %5645 = vmatprep.subr.bf16.mxu1 %v6981_v19  ;;  %2909 = vmatprep.mubr.bf16.mxu1 %v792_v20  ;;  %v430_v18 = vld [vmem:[%s11798_s0 + $0xcc8] sm:$0xff]  ;;  %v216_v19 = vld [vmem:[%s11798_s0 + $0x618] sm:$0xff]  ;;  %v863_v24 = vpack.c.bf16 %v191_v16, %v167_v15 }
  0x3d   :  { %v240_v20 = vld [vmem:[%s11798_s0 + $0x6d8] sm:$0xff]  ;;  %5752 = vmatpush3.bf16.msra.mxu0 %v6999_v11  ;;  %v982_v25 = vpack.c.bf16 %v430_v18, %v406_v17  ;;  %v26_v16 = vld [vmem:[%s11798_s0 + $0x28] sm:$0xff] }
  0x3e   :  { %5753 = vmatprep.subr.bf16.mxu0 %v7001_v14  ;;  %v888_v26 = vpack.c.bf16 %v240_v20, %v216_v19  ;;  %v7014_v11 = vld [vmem:[%s11797_s1 + $0x1b8] sm:$0xff]   ;;  %v50_v17 = vld [vmem:[%s11798_s0 + $0xe8] sm:$0xff]  ;;  %v959_v19 = vpack.c.bf16 %v383_v13, %v359_v12  ;;  %v7015_v20 = vld [vmem:[%s11797_s1 + $0x240] sm:$0xff]  }
  0x3f   :  { %5646 = vmatpush3.bf16.msra.mxu1 %v6982_v21  ;;  %v7002_v21 = vld [vmem:[%s11797_s1 + $0x128] sm:$0xff]   ;;  %v408_v14 = vld [vmem:[%s11798_s0 + $0xc18] sm:$0xff]  ;;  %v7029_v13 = vld [vmem:[%s11797_s1 + $0x260] sm:$0xff]  }
  0x40   :  { %5855 = vmatprep.subr.bf16.mxu1 %v6983_v27  ;;  %v7004_v27 = vld [vmem:[%s11797_s1 + $0x130] sm:$0xff]   ;;  %v432_v15 = vld [vmem:[%s11798_s0 + $0xcd8] sm:$0xff] }
  0x41   :  { %5754 = vmatpush3.bf16.msra.mxu0 %v7002_v21  ;;  %v984_v21 = vpack.c.bf16 %v432_v15, %v408_v14 }
  0x42   :  { %2781 = vmatmul.mubr.bf16.gmra.mrb[16].mxu0 %v885_v33  ;;  %2910 = vmatmul.mubr.bf16.vlgmr.msra.gmra.mrb[16].mxu1 %v791_v34  ;;  %v454_v33 = vld [vmem:[%s11798_s0 + $0xd88] sm:$0xff] }
  0x43   :  { %5856 = vmatpush3.bf16.msra.mxu1 %v6984_v35  ;;  %2788 = vmatprep.mubr.bf16.mxu0 %v910_v36  ;;  %v478_v34 = vld [vmem:[%s11798_s0 + $0xe48] sm:$0xff]  ;;  %v264_v35 = vld [vmem:[%s11798_s0 + $0x798] sm:$0xff] }
  0x44   :  { %2917 = vmatprep.mubr.bf16.mxu1 %v816_v37  ;;  %5857 = vmatprep.subr.bf16.mxu1 %v6985_v38  ;;  %v288_v36 = vld [vmem:[%s11798_s0 + $0x858] sm:$0xff]  ;;  %v7007_v37 = vld [vmem:[%s11797_s1 + $0x1e0] sm:$0xff]   ;;  %v1006_v42 = vpack.c.bf16 %v478_v34, %v454_v33  ;;  %v1008_v34 = vpack.c.bf16 %v480_v29, %v456_v28 }
  0x45   :  { %5755 = vmatprep.subr.bf16.mxu0 %v7003_v22  ;;  %v7006_v38 = vld [vmem:[%s11797_s1 + $0x138] sm:$0xff]   ;;  %v912_v43 = vpack.c.bf16 %v288_v36, %v264_v35  ;;  %v794_v22 = vpack.c.bf16 %v50_v17, %v26_v16  ;;  %v818_v35 = vpack.c.bf16 %v98_v31, %v74_v30  ;;  %v7016_v36 = vld [vmem:[%s11797_s1 + $0x200] sm:$0xff]   ;;  %v599_v17 = vld [vmem:[%s11798_s0 + $0x1210] sm:$0xff] }
  0x46   :  { %5756 = vmatpush3.bf16.msra.mxu0 %v7004_v27  ;;  %v7017_v27 = vld [vmem:[%s11797_s1 + $0x2c0] sm:$0xff]   ;;  %v7035_v31 = vld [vmem:[%s11797_s1 + $0x270] sm:$0xff]  }
  0x47   :  { %5858 = vmatpush3.bf16.msra.mxu1 %v6986_v48  ;;  %5757 = vmatprep.subr.bf16.mxu0 %v7005_v32  ;;  %v502_v48 = vld [vmem:[%s11798_s0 + $0xf08] sm:$0xff]  ;;  %v7031_v16 = vld [vmem:[%s11797_s1 + $0x220] sm:$0xff]  }
  0x48   :  { %5859 = vmatprep.subr.bf16.mxu1 %v6989_v50  ;;  %v7010_v50 = vld [vmem:[%s11797_s1 + $0x1a8] sm:$0xff]  }
  0x4a   :  { %2789 = vmatmul.mubr.bf16.gmra.mrb[20].mxu0 %v909_v52  ;;  %2918 = vmatmul.mubr.bf16.gmra.mrb[20].mxu1 %v815_v53  ;;  %v312_v52 = vld [vmem:[%s11798_s0 + $0x918] sm:$0xff] }
  0x4b   :  { %2796 = vmatprep.mubr.bf16.mxu0 %v934_v54  ;;  %2925 = vmatprep.mubr.bf16.mxu1 %v840_v55  ;;  %v336_v53 = vld [vmem:[%s11798_s0 + $0x9d8] sm:$0xff]  ;;  %v1005_v54 = vpack.c.bf16 %v477_v45, %v453_v44  ;;  %v911_v55 = vpack.c.bf16 %v287_v47, %v263_v46  ;;  %v122_v44 = vld [vmem:[%s11798_s0 + $0x328] sm:$0xff] }
  0x4c   :  { %5860 = vmatpush3.bf16.msra.mxu1 %v6990_v56  ;;  %5758 = vmatpush3.bf16.msra.mxu0 %v7006_v38  ;;  %v1030_v56 = vpack.c.bf16 %v526_v51, %v502_v48  ;;  %v936_v57 = vpack.c.bf16 %v336_v53, %v312_v52  ;;  %v479_v38 = vld [vmem:[%s11798_s0 + $0xe50] sm:$0xff]  ;;  %v146_v45 = vld [vmem:[%s11798_s0 + $0x3e8] sm:$0xff] }
  0x4d   :  { %5861 = vmatprep.subr.bf16.mxu1 %v6998_v5  ;;  %v935_v5 = vpack.c.bf16 %v335_v62, %v311_v60  ;;  %5967 = vmatprep.subr.bf16.mxu0 %v7015_v20  ;;  %v7020_v46 = vld [vmem:[%s11797_s1 + $0x208] sm:$0xff]   ;;  %v7023_v51 = vld [vmem:[%s11797_s1 + $0x250] sm:$0xff]   ;;  %v241_v20 = vld [vmem:[%s11798_s0 + $0x6e0] sm:$0xff] }
  0x4e   :  { %v503_v52 = vld [vmem:[%s11798_s0 + $0xf10] sm:$0xff]  ;;  %v194_v60 = vld [vmem:[%s11798_s0 + $0x568] sm:$0xff] }
  0x4f   :  { %v527_v53 = vld [vmem:[%s11798_s0 + $0xfd0] sm:$0xff] }
  0x50   :  { %5862 = vmatpush3.bf16.msra.mxu1 %v7000_v10  ;;  %v573_v10 = vld [vmem:[%s11798_s0 + $0x1140] sm:$0xff] }
  0x51   :  { %5863 = vmatprep.subr.bf16.mxu1 %v7007_v37  ;;  %v455_v37 = vld [vmem:[%s11798_s0 + $0xd90] sm:$0xff] }
  0x52   :  { %2797 = vmatmul.mubr.bf16.gmra.mrb[24].mxu0 %v933_v6  ;;  %2926 = vmatmul.mubr.bf16.gmra.mrb[24].mxu1 %v839_v7  ;;  %v1054_v6 = vpack.c.bf16 %v574_v1, %v550_v63  ;;  %v960_v7 = vpack.c.bf16 %v384_v3, %v360_v2  ;;  %v1007_v47 = vpack.c.bf16 %v479_v38, %v455_v37  ;;  %v551_v1 = vld [vmem:[%s11798_s0 + $0x1090] sm:$0xff]  ;;  %v169_v3 = vld [vmem:[%s11798_s0 + $0x4a0] sm:$0xff]  ;;  %v696_v38 = vld [vmem:[%s11798_s0 + $0x1518] sm:$0xff] }
  0x53   :  { %2804 = vmatprep.mubr.bf16.mxu0 %v958_v8  ;;  %2933 = vmatprep.mubr.bf16.mxu1 %v864_v9  ;;  %v549_v8 = vld [vmem:[%s11798_s0 + $0x1080] sm:$0xff]  ;;  %v7013_v9 = vld [vmem:[%s11797_s1 + $0x1f8] sm:$0xff]   ;;  %v575_v2 = vld [vmem:[%s11798_s0 + $0x1150] sm:$0xff] }
  0x54   :  { %5864 = vmatpush3.bf16.msra.mxu1 %v7008_v39  ;;  %v1053_v18 = vpack.c.bf16 %v573_v10, %v549_v8  ;;  %v73_v39 = vld [vmem:[%s11798_s0 + $0x1a0] sm:$0xff]  ;;  %v624_v8 = vld [vmem:[%s11798_s0 + $0x12d8] sm:$0xff]  ;;  %v242_v10 = vld [vmem:[%s11798_s0 + $0x6e8] sm:$0xff] }
  0x55   :  { %5865 = vmatprep.subr.bf16.mxu1 %v7009_v49  ;;  %v289_v37 = vld [vmem:[%s11798_s0 + $0x860] sm:$0xff] }
  0x58   :  { %5866 = vmatpush3.bf16.msra.mxu1 %v7010_v50  ;;  %v842_v50 = vpack.c.bf16 %v146_v45, %v122_v44 }
  0x59   :  { %5867 = vmatprep.subr.bf16.mxu1 %v7011_v61  ;;  %v1031_v61 = vpack.c.bf16 %v527_v53, %v503_v52  ;;  %v768_v52 = vld [vmem:[%s11798_s0 + $0x1758] sm:$0xff]  ;;  %v362_v53 = vld [vmem:[%s11798_s0 + $0xaa8] sm:$0xff] }
  0x5a   :  { %2805 = vmatmul.mubr.bf16.gmra.mrb[28].mxu0 %v957_v23  ;;  %2934 = vmatmul.mubr.bf16.gmra.mrb[28].mxu1 %v863_v24  ;;  %v407_v23 = vld [vmem:[%s11798_s0 + $0xc10] sm:$0xff] }
  0x5b   :  { %2812 = vmatprep.mubr.bf16.mxu0 %v982_v25  ;;  %2941 = vmatprep.mubr.bf16.mxu1 %v888_v26  ;;  %v431_v24 = vld [vmem:[%s11798_s0 + $0xcd0] sm:$0xff]  ;;  %v25_v25 = vld [vmem:[%s11798_s0 + $0x20] sm:$0xff] }
  0x5c   :  { %5868 = vmatpush3.bf16.msra.mxu1 %v7012_v0  ;;  %v49_v26 = vld [vmem:[%s11798_s0 + $0xe0] sm:$0xff]  ;;  %v983_v32 = vpack.c.bf16 %v431_v24, %v407_v23  ;;  %v866_v0 = vpack.c.bf16 %v194_v60, %v170_v59  ;;  %v7033_v23 = vld [vmem:[%s11797_s1 + $0x268] sm:$0xff]   ;;  %v743_v59 = vld [vmem:[%s11798_s0 + $0x1690] sm:$0xff] }
  0x5d   :  { %5869 = vmatprep.subr.bf16.mxu1 %v7013_v9  ;;  %v793_v33 = vpack.c.bf16 %v49_v26, %v25_v25  ;;  %v218_v9 = vld [vmem:[%s11798_s0 + $0x628] sm:$0xff]  ;;  %v767_v60 = vld [vmem:[%s11798_s0 + $0x1750] sm:$0xff] }
  0x5e   :  { %v890_v15 = vpack.c.bf16 %v242_v10, %v218_v9  ;;  %v266_v24 = vld [vmem:[%s11798_s0 + $0x7a8] sm:$0xff]  ;;  %v27_v9 = vld [vmem:[%s11798_s0 + $0x30] sm:$0xff] }
  0x5f   :  { %v290_v25 = vld [vmem:[%s11798_s0 + $0x868] sm:$0xff]  ;;  %v51_v10 = vld [vmem:[%s11798_s0 + $0xf0] sm:$0xff] }
  0x60   :  { %5870 = vmatpush3.bf16.msra.mxu1 %v7014_v11  ;;  %v1055_v11 = vpack.c.bf16 %v575_v2, %v551_v1  ;;  %v7034_v26 = vld [vmem:[%s11797_s1 + $0x228] sm:$0xff]   ;;  %v914_v30 = vpack.c.bf16 %v290_v25, %v266_v24  ;;  %v28_v1 = vld [vmem:[%s11798_s0 + $0x38] sm:$0xff]  ;;  %v99_v24 = vld [vmem:[%s11798_s0 + $0x270] sm:$0xff] }
  0x61   :  { %6079 = vmatprep.subr.bf16.mxu1 %v7017_v27  ;;  %v52_v2 = vld [vmem:[%s11798_s0 + $0xf8] sm:$0xff]  ;;  %v506_v25 = vld [vmem:[%s11798_s0 + $0xf28] sm:$0xff] }
  0x62   :  { %2813 = vmatmul.mubr.bf16.gmra.mrb[32].mxu0 %v981_v40  ;;  %2942 = vmatmul.mubr.bf16.gmra.mrb[32].mxu1 %v887_v41  ;;  %v97_v40 = vld [vmem:[%s11798_s0 + $0x260] sm:$0xff]  ;;  %v7019_v41 = vld [vmem:[%s11797_s1 + $0x248] sm:$0xff]  }
  0x63   :  { %2820 = vmatprep.mubr.bf16.mxu0 %v1006_v42  ;;  %2949 = vmatprep.mubr.bf16.mxu1 %v912_v43  ;;  %v504_v42 = vld [vmem:[%s11798_s0 + $0xf18] sm:$0xff]  ;;  %v817_v48 = vpack.c.bf16 %v97_v40, %v73_v39  ;;  %v314_v40 = vld [vmem:[%s11798_s0 + $0x928] sm:$0xff] }
  0x64   :  { %v528_v43 = vld [vmem:[%s11798_s0 + $0xfd8] sm:$0xff] }
  0x65   :  { %v1032_v49 = vpack.c.bf16 %v528_v43, %v504_v42  ;;  %v720_v39 = vld [vmem:[%s11798_s0 + $0x15d8] sm:$0xff] }
  0x66   :  { %v7038_v42 = vld [vmem:[%s11797_s1 + $0x238] sm:$0xff]   ;;  %v1128_v45 = vpack.c.bf16 %v720_v39, %v696_v38  ;;  %v529_v38 = vld [vmem:[%s11798_s0 + $0xfe0] sm:$0xff]  ;;  %v123_v39 = vld [vmem:[%s11798_s0 + $0x330] sm:$0xff] }
  0x6a   :  { %2821 = vmatmul.mubr.bf16.gmra.mrb[36].mxu0 %v1005_v54  ;;  %2950 = vmatmul.mubr.bf16.gmra.mrb[36].mxu1 %v911_v55  ;;  %v121_v54 = vld [vmem:[%s11798_s0 + $0x320] sm:$0xff] }
  0x6b   :  { %2828 = vmatprep.mubr.bf16.mxu0 %v1030_v56  ;;  %2957 = vmatprep.mubr.bf16.mxu1 %v936_v57  ;;  %v145_v55 = vld [vmem:[%s11798_s0 + $0x3e0] sm:$0xff]  ;;  %v552_v56 = vld [vmem:[%s11798_s0 + $0x1098] sm:$0xff] }
  0x6c   :  { %v576_v57 = vld [vmem:[%s11798_s0 + $0x1158] sm:$0xff]  ;;  %v841_v62 = vpack.c.bf16 %v145_v55, %v121_v54  ;;  %v386_v54 = vld [vmem:[%s11798_s0 + $0xb68] sm:$0xff] }
  0x6d   :  { %v1056_v63 = vpack.c.bf16 %v576_v57, %v552_v56 }
  0x72   :  { %2829 = vmatmul.mubr.bf16.gmra.mrb[40].mxu0 %v1029_v4  ;;  %2958 = vmatmul.mubr.bf16.gmra.mrb[40].mxu1 %v935_v5  ;;  %v7027_v4 = vld [vmem:[%s11797_s1 + $0x258] sm:$0xff]   ;;  %v193_v5 = vld [vmem:[%s11798_s0 + $0x560] sm:$0xff] }
  0x73   :  { %2836 = vmatprep.mubr.bf16.mxu0 %v1054_v6  ;;  %2965 = vmatprep.mubr.bf16.mxu1 %v960_v7  ;;  %v600_v6 = vld [vmem:[%s11798_s0 + $0x1218] sm:$0xff]  ;;  %v865_v12 = vpack.c.bf16 %v193_v5, %v169_v3  ;;  %v1151_v3 = vpack.c.bf16 %v767_v60, %v743_v59  ;;  %v626_v59 = vld [vmem:[%s11798_s0 + $0x12e8] sm:$0xff] }
  0x74   :  { %v7028_v7 = vld [vmem:[%s11797_s1 + $0x218] sm:$0xff]   ;;  %v1080_v14 = vpack.c.bf16 %v624_v8, %v600_v6  ;;  %v796_v6 = vpack.c.bf16 %v52_v2, %v28_v1  ;;  %v433_v8 = vld [vmem:[%s11798_s0 + $0xce0] sm:$0xff] }
  0x75   :  { %v220_v60 = vld [vmem:[%s11798_s0 + $0x638] sm:$0xff] }
  0x7a   :  { %2837 = vmatmul.mubr.bf16.gmra.mrb[44].mxu0 %v1053_v18  ;;  %2966 = vmatmul.mubr.bf16.gmra.mrb[44].mxu1 %v959_v19  ;;  %v623_v18 = vld [vmem:[%s11798_s0 + $0x12d0] sm:$0xff]  ;;  %v217_v19 = vld [vmem:[%s11798_s0 + $0x620] sm:$0xff] }
  0x7b   :  { %2973 = vmatprep.mubr.bf16.mxu1 %v984_v21  ;;  %3070 = vmatprep.mubr.bf16.mxu0 %v794_v22  ;;  %v648_v21 = vld [vmem:[%s11798_s0 + $0x1398] sm:$0xff]  ;;  %v1079_v27 = vpack.c.bf16 %v623_v18, %v599_v17  ;;  %v889_v28 = vpack.c.bf16 %v241_v20, %v217_v19  ;;  %v7018_v17 = vld [vmem:[%s11797_s1 + $0x280] sm:$0xff]   ;;  %v7021_v20 = vld [vmem:[%s11797_s1 + $0x2c8] sm:$0xff]  }
  0x7c   :  { %v672_v22 = vld [vmem:[%s11798_s0 + $0x1458] sm:$0xff] }
  0x7d   :  { %v1104_v29 = vpack.c.bf16 %v672_v22, %v648_v21  ;;  %v457_v21 = vld [vmem:[%s11798_s0 + $0xda0] sm:$0xff] }
  0x7e   :  { %v481_v22 = vld [vmem:[%s11798_s0 + $0xe60] sm:$0xff] }
  0x82   :  { %2974 = vmatmul.mubr.bf16.gmra.mrb[48].mxu1 %v983_v32  ;;  %3071 = vmatmul.mubr.bf16.vlgmr.msra.gmra.mrb[48].mxu0 %v793_v33  ;;  %v7036_v32 = vld [vmem:[%s11797_s1 + $0x230] sm:$0xff]  }
  0x83   :  { %2981 = vmatprep.mubr.bf16.mxu1 %v1008_v34  ;;  %3078 = vmatprep.mubr.bf16.mxu0 %v818_v35  ;;  %v647_v33 = vld [vmem:[%s11798_s0 + $0x1390] sm:$0xff]  ;;  %v7037_v35 = vld [vmem:[%s11797_s1 + $0x278] sm:$0xff]  }
  0x84   :  { %5968 = vmatpush3.bf16.msra.mxu0 %v7016_v36  ;;  %v671_v34 = vld [vmem:[%s11798_s0 + $0x1450] sm:$0xff]  ;;  %v265_v36 = vld [vmem:[%s11798_s0 + $0x7a0] sm:$0xff] }
  0x85   :  { %5969 = vmatprep.subr.bf16.mxu0 %v7019_v41  ;;  %v338_v41 = vld [vmem:[%s11798_s0 + $0x9e8] sm:$0xff]  ;;  %v1103_v43 = vpack.c.bf16 %v671_v34, %v647_v33  ;;  %v913_v44 = vpack.c.bf16 %v289_v37, %v265_v36  ;;  %v7026_v36 = vld [vmem:[%s11797_s1 + $0x290] sm:$0xff]   ;;  %v505_v37 = vld [vmem:[%s11798_s0 + $0xf20] sm:$0xff] }
  0x88   :  { %5970 = vmatpush3.bf16.msra.mxu0 %v7020_v46  ;;  %v938_v46 = vpack.c.bf16 %v338_v41, %v314_v40  ;;  %v147_v40 = vld [vmem:[%s11798_s0 + $0x3f0] sm:$0xff]  ;;  %v7030_v41 = vld [vmem:[%s11797_s1 + $0x2d8] sm:$0xff]  }
  0x89   :  { %5971 = vmatprep.subr.bf16.mxu0 %v7023_v51  ;;  %v744_v51 = vld [vmem:[%s11798_s0 + $0x1698] sm:$0xff] }
  0x8a   :  { %2982 = vmatmul.mubr.bf16.gmra.mrb[52].mxu1 %v1007_v47  ;;  %3079 = vmatmul.mubr.bf16.gmra.mrb[52].mxu0 %v817_v48  ;;  %v695_v47 = vld [vmem:[%s11798_s0 + $0x1510] sm:$0xff]  ;;  %v1152_v57 = vpack.c.bf16 %v768_v52, %v744_v51  ;;  %v7040_v52 = vld [vmem:[%s11797_s1 + $0x2a0] sm:$0xff]  }
  0x8b   :  { %2989 = vmatprep.mubr.bf16.mxu1 %v1032_v49  ;;  %3086 = vmatprep.mubr.bf16.mxu0 %v842_v50  ;;  %v719_v48 = vld [vmem:[%s11798_s0 + $0x15d0] sm:$0xff]  ;;  %v313_v49 = vld [vmem:[%s11798_s0 + $0x920] sm:$0xff] }
  0x8c   :  { %5972 = vmatpush3.bf16.msra.mxu0 %v7024_v58  ;;  %v337_v50 = vld [vmem:[%s11798_s0 + $0x9e0] sm:$0xff]  ;;  %v1127_v55 = vpack.c.bf16 %v719_v48, %v695_v47  ;;  %v962_v58 = vpack.c.bf16 %v386_v54, %v362_v53  ;;  %v1033_v48 = vpack.c.bf16 %v529_v38, %v505_v37  ;;  %v7041_v53 = vld [vmem:[%s11797_s1 + $0x2e8] sm:$0xff]   ;;  %v364_v38 = vld [vmem:[%s11798_s0 + $0xab8] sm:$0xff] }
  0x8d   :  { %5973 = vmatprep.subr.bf16.mxu0 %v7027_v4  ;;  %v937_v56 = vpack.c.bf16 %v337_v50, %v313_v49  ;;  %v7039_v47 = vld [vmem:[%s11797_s1 + $0x2e0] sm:$0xff]   ;;  %v843_v49 = vpack.c.bf16 %v147_v40, %v123_v39  ;;  %v770_v37 = vld [vmem:[%s11798_s0 + $0x1768] sm:$0xff]  ;;  %v388_v39 = vld [vmem:[%s11798_s0 + $0xb78] sm:$0xff] }
  0x8e   :  { %v553_v54 = vld [vmem:[%s11798_s0 + $0x10a0] sm:$0xff] }
  0x90   :  { %5974 = vmatpush3.bf16.msra.mxu0 %v7028_v7  ;;  %v409_v7 = vld [vmem:[%s11798_s0 + $0xc20] sm:$0xff] }
  0x91   :  { %5975 = vmatprep.subr.bf16.mxu0 %v7029_v13  ;;  %v76_v13 = vld [vmem:[%s11798_s0 + $0x1b8] sm:$0xff] }
  0x92   :  { %2990 = vmatmul.mubr.bf16.gmra.mrb[56].mxu1 %v1031_v61  ;;  %3087 = vmatmul.mubr.bf16.gmra.mrb[56].mxu0 %v841_v62  ;;  %v361_v61 = vld [vmem:[%s11798_s0 + $0xaa0] sm:$0xff] }
  0x93   :  { %2997 = vmatprep.mubr.bf16.mxu1 %v1056_v63  ;;  %3094 = vmatprep.mubr.bf16.mxu0 %v866_v0  ;;  %v385_v62 = vld [vmem:[%s11798_s0 + $0xb60] sm:$0xff]  ;;  %v410_v63 = vld [vmem:[%s11798_s0 + $0xc28] sm:$0xff] }
  0x94   :  { %5976 = vmatpush3.bf16.msra.mxu0 %v7031_v16  ;;  %v434_v0 = vld [vmem:[%s11798_s0 + $0xce8] sm:$0xff]  ;;  %v961_v4 = vpack.c.bf16 %v385_v62, %v361_v61  ;;  %v795_v16 = vpack.c.bf16 %v51_v10, %v27_v9  ;;  %v244_v61 = vld [vmem:[%s11798_s0 + $0x6f8] sm:$0xff]  ;;  %v243_v9 = vld [vmem:[%s11798_s0 + $0x6f0] sm:$0xff] }
  0x95   :  { %5977 = vmatprep.subr.bf16.mxu0 %v7033_v23  ;;  %v986_v5 = vpack.c.bf16 %v434_v0, %v410_v63  ;;  %v75_v23 = vld [vmem:[%s11798_s0 + $0x1b0] sm:$0xff]  ;;  %v7042_v62 = vld [vmem:[%s11797_s1 + $0x2a8] sm:$0xff]  }
  0x96   :  { %v819_v33 = vpack.c.bf16 %v99_v24, %v75_v23  ;;  %v7043_v63 = vld [vmem:[%s11797_s1 + $0x2f0] sm:$0xff]   ;;  %v650_v10 = vld [vmem:[%s11798_s0 + $0x13a8] sm:$0xff] }
  0x97   :  { %v291_v23 = vld [vmem:[%s11798_s0 + $0x870] sm:$0xff]  ;;  %v698_v24 = vld [vmem:[%s11798_s0 + $0x1528] sm:$0xff] }
  0x98   :  { %5978 = vmatpush3.bf16.msra.mxu0 %v7034_v26  ;;  %v530_v26 = vld [vmem:[%s11798_s0 + $0xfe8] sm:$0xff] }
  0x99   :  { %5979 = vmatprep.subr.bf16.mxu0 %v7035_v31  ;;  %v7025_v31 = vld [vmem:[%s11797_s1 + $0x2d0] sm:$0xff]   ;;  %v1034_v34 = vpack.c.bf16 %v530_v26, %v506_v25  ;;  %v722_v25 = vld [vmem:[%s11798_s0 + $0x15e8] sm:$0xff]  ;;  %v316_v26 = vld [vmem:[%s11798_s0 + $0x938] sm:$0xff] }
  0x9a   :  { %2998 = vmatmul.mubr.bf16.gmra.mrb[60].mxu1 %v1055_v11  ;;  %3095 = vmatmul.mubr.bf16.gmra.mrb[60].mxu0 %v865_v12  ;;  %v458_v11 = vld [vmem:[%s11798_s0 + $0xda8] sm:$0xff] }
  0x9b   :  { %3005 = vmatprep.mubr.bf16.mxu1 %v1080_v14  ;;  %3102 = vmatprep.mubr.bf16.mxu0 %v890_v15  ;;  %v482_v12 = vld [vmem:[%s11798_s0 + $0xe68] sm:$0xff]  ;;  %v100_v14 = vld [vmem:[%s11798_s0 + $0x278] sm:$0xff]  ;;  %v985_v15 = vpack.c.bf16 %v433_v8, %v409_v7  ;;  %v625_v7 = vld [vmem:[%s11798_s0 + $0x12e0] sm:$0xff] }
  0x9c   :  { %5980 = vmatpush3.bf16.msra.mxu0 %v7036_v32  ;;  %v1010_v18 = vpack.c.bf16 %v482_v12, %v458_v11  ;;  %v820_v19 = vpack.c.bf16 %v100_v14, %v76_v13  ;;  %v1009_v32 = vpack.c.bf16 %v481_v22, %v457_v21  ;;  %v219_v8 = vld [vmem:[%s11798_s0 + $0x630] sm:$0xff]  ;;  %v674_v11 = vld [vmem:[%s11798_s0 + $0x1468] sm:$0xff]  ;;  %v268_v12 = vld [vmem:[%s11798_s0 + $0x7b8] sm:$0xff] }
  0x9d   :  { %5981 = vmatprep.subr.bf16.mxu0 %v7037_v35  ;;  %v292_v13 = vld [vmem:[%s11798_s0 + $0x878] sm:$0xff]  ;;  %v673_v21 = vld [vmem:[%s11798_s0 + $0x1460] sm:$0xff]  ;;  %v267_v22 = vld [vmem:[%s11798_s0 + $0x7b0] sm:$0xff] }
  0x9e   :  { %v7046_v14 = vld [vmem:[%s11797_s1 + $0x2b8] sm:$0xff]  }
  0xa0   :  { %5982 = vmatpush3.bf16.msra.mxu0 %v7038_v42  ;;  %v554_v42 = vld [vmem:[%s11798_s0 + $0x10a8] sm:$0xff] }
  0xa2   :  { %3006 = vmatmul.mubr.bf16.gmra.mrb[64].mxu1 %v1079_v27  ;;  %3103 = vmatmul.mubr.bf16.gmra.mrb[64].mxu0 %v889_v28  ;;  %v7022_v27 = vld [vmem:[%s11797_s1 + $0x288] sm:$0xff]   ;;  %v7047_v28 = vld [vmem:[%s11797_s1 + $0x340] sm:$0xff]  }
  0xa3   :  { %3013 = vmatprep.mubr.bf16.mxu1 %v1104_v29  ;;  %3110 = vmatprep.mubr.bf16.mxu0 %v914_v30  ;;  %v124_v29 = vld [vmem:[%s11798_s0 + $0x338] sm:$0xff] }
  0xa4   :  { %v148_v30 = vld [vmem:[%s11798_s0 + $0x3f8] sm:$0xff]  ;;  %6191 = vmatprep.subr.bf16.mxu0 %v7047_v28 }
  0xa5   :  { %v844_v35 = vpack.c.bf16 %v148_v30, %v124_v29  ;;  %v915_v29 = vpack.c.bf16 %v291_v23, %v267_v22  ;;  %v1130_v30 = vpack.c.bf16 %v722_v25, %v698_v24 }
  0xaa   :  { %3014 = vmatmul.mubr.bf16.gmra.mrb[68].mxu1 %v1103_v43  ;;  %3111 = vmatmul.mubr.bf16.gmra.mrb[68].mxu0 %v913_v44  ;;  %v578_v43 = vld [vmem:[%s11798_s0 + $0x1168] sm:$0xff]  ;;  %v172_v44 = vld [vmem:[%s11798_s0 + $0x4b8] sm:$0xff] }
  0xab   :  { %3021 = vmatprep.mubr.bf16.mxu1 %v1128_v45  ;;  %3118 = vmatprep.mubr.bf16.mxu0 %v938_v46  ;;  %v196_v45 = vld [vmem:[%s11798_s0 + $0x578] sm:$0xff]  ;;  %v1058_v50 = vpack.c.bf16 %v578_v43, %v554_v42  ;;  %v964_v43 = vpack.c.bf16 %v388_v39, %v364_v38  ;;  %v7052_v38 = vld [vmem:[%s11797_s1 + $0x308] sm:$0xff]   ;;  %v7055_v39 = vld [vmem:[%s11797_s1 + $0x350] sm:$0xff]  }
  0xac   :  { %v7032_v46 = vld [vmem:[%s11797_s1 + $0x298] sm:$0xff]   ;;  %v868_v51 = vpack.c.bf16 %v196_v45, %v172_v44  ;;  %v745_v44 = vld [vmem:[%s11798_s0 + $0x16a0] sm:$0xff] }
  0xad   :  { %v769_v45 = vld [vmem:[%s11798_s0 + $0x1760] sm:$0xff] }
  0xb2   :  { %3022 = vmatmul.mubr.bf16.gmra.mrb[72].mxu1 %v1127_v55  ;;  %3119 = vmatmul.mubr.bf16.gmra.mrb[72].mxu0 %v937_v56  ;;  %v577_v55 = vld [vmem:[%s11798_s0 + $0x1160] sm:$0xff]  ;;  %v171_v56 = vld [vmem:[%s11798_s0 + $0x4b0] sm:$0xff] }
  0xb3   :  { %3029 = vmatprep.mubr.bf16.mxu1 %v1152_v57  ;;  %3126 = vmatprep.mubr.bf16.mxu0 %v962_v58  ;;  %v195_v57 = vld [vmem:[%s11798_s0 + $0x570] sm:$0xff]  ;;  %v602_v58 = vld [vmem:[%s11798_s0 + $0x1228] sm:$0xff]  ;;  %v1057_v0 = vpack.c.bf16 %v577_v55, %v553_v54  ;;  %v1153_v55 = vpack.c.bf16 %v769_v45, %v745_v44 }
  0xb4   :  { %v867_v1 = vpack.c.bf16 %v195_v57, %v171_v56  ;;  %v1082_v2 = vpack.c.bf16 %v626_v59, %v602_v58 }
  0xba   :  { %3030 = vmatmul.mubr.bf16.gmra.mrb[76].mxu1 %v1151_v3  ;;  %3127 = vmatmul.mubr.bf16.gmra.mrb[76].mxu0 %v961_v4  ;;  %v892_v3 = vpack.c.bf16 %v244_v61, %v220_v60  ;;  %v7044_v4 = vld [vmem:[%s11797_s1 + $0x2b0] sm:$0xff]  }
  0xbb   :  { %3134 = vmatprep.mubr.bf16.mxu0 %v986_v5  ;;  %3231 = vmatprep.mubr.bf16.mxu1 %v796_v6  ;;  %v7045_v5 = vld [vmem:[%s11797_s1 + $0x2f8] sm:$0xff]   ;;  %v601_v6 = vld [vmem:[%s11798_s0 + $0x1220] sm:$0xff] }
  0xc2   :  { %3135 = vmatmul.mubr.bf16.gmra.mrb[80].mxu0 %v985_v15  ;;  %3232 = vmatmul.mubr.bf16.vlgmr.msra.gmra.mrb[80].mxu1 %v795_v16  ;;  %v7049_v15 = vld [vmem:[%s11797_s1 + $0x3c0] sm:$0xff]   ;;  %v1081_v16 = vpack.c.bf16 %v625_v7, %v601_v6 }
  0xc3   :  { %6080 = vmatpush3.bf16.msra.mxu1 %v7018_v17  ;;  %3142 = vmatprep.mubr.bf16.mxu0 %v1010_v18  ;;  %v891_v17 = vpack.c.bf16 %v243_v9, %v219_v8  ;;  %v1106_v18 = vpack.c.bf16 %v674_v11, %v650_v10  ;;  %v53_v6 = vld [vmem:[%s11798_s0 + $0x100] sm:$0xff]  ;;  %v460_v8 = vld [vmem:[%s11798_s0 + $0xdb8] sm:$0xff]  ;;  %v78_v10 = vld [vmem:[%s11798_s0 + $0x1c8] sm:$0xff] }
  0xc4   :  { %3239 = vmatprep.mubr.bf16.mxu1 %v820_v19  ;;  %6081 = vmatprep.subr.bf16.mxu1 %v7021_v20  ;;  %v916_v19 = vpack.c.bf16 %v292_v13, %v268_v12  ;;  %v649_v20 = vld [vmem:[%s11798_s0 + $0x13a0] sm:$0xff]  ;;  %v484_v9 = vld [vmem:[%s11798_s0 + $0xe78] sm:$0xff]  ;;  %v102_v11 = vld [vmem:[%s11798_s0 + $0x288] sm:$0xff] }
  0xc5   :  { %v1105_v28 = vpack.c.bf16 %v673_v21, %v649_v20  ;;  %v1012_v20 = vpack.c.bf16 %v484_v9, %v460_v8  ;;  %v822_v21 = vpack.c.bf16 %v102_v11, %v78_v10 }
  0xc7   :  { %6082 = vmatpush3.bf16.msra.mxu1 %v7022_v27  ;;  %v340_v27 = vld [vmem:[%s11798_s0 + $0x9f8] sm:$0xff] }
  0xc8   :  { %6083 = vmatprep.subr.bf16.mxu1 %v7025_v31  ;;  %v940_v31 = vpack.c.bf16 %v340_v27, %v316_v26  ;;  %v7048_v26 = vld [vmem:[%s11797_s1 + $0x300] sm:$0xff]   ;;  %v7051_v27 = vld [vmem:[%s11797_s1 + $0x348] sm:$0xff]  }
  0xca   :  { %3143 = vmatmul.mubr.bf16.gmra.mrb[84].mxu0 %v1009_v32  ;;  %3240 = vmatmul.mubr.bf16.gmra.mrb[84].mxu1 %v819_v33  ;;  %v697_v32 = vld [vmem:[%s11798_s0 + $0x1520] sm:$0xff] }
  0xcb   :  { %3150 = vmatprep.mubr.bf16.mxu0 %v1034_v34  ;;  %3247 = vmatprep.mubr.bf16.mxu1 %v844_v35  ;;  %v721_v33 = vld [vmem:[%s11798_s0 + $0x15e0] sm:$0xff]  ;;  %v315_v34 = vld [vmem:[%s11798_s0 + $0x930] sm:$0xff] }
  0xcc   :  { %6084 = vmatpush3.bf16.msra.mxu1 %v7026_v36  ;;  %v339_v35 = vld [vmem:[%s11798_s0 + $0x9f0] sm:$0xff]  ;;  %v746_v36 = vld [vmem:[%s11798_s0 + $0x16a8] sm:$0xff]  ;;  %v1129_v40 = vpack.c.bf16 %v721_v33, %v697_v32  ;;  %v101_v32 = vld [vmem:[%s11798_s0 + $0x280] sm:$0xff] }
  0xcd   :  { %6085 = vmatprep.subr.bf16.mxu1 %v7030_v41  ;;  %v939_v41 = vpack.c.bf16 %v339_v35, %v315_v34  ;;  %v1154_v42 = vpack.c.bf16 %v770_v37, %v746_v36  ;;  %v508_v34 = vld [vmem:[%s11798_s0 + $0xf38] sm:$0xff]  ;;  %v126_v36 = vld [vmem:[%s11798_s0 + $0x348] sm:$0xff] }
  0xce   :  { %v532_v35 = vld [vmem:[%s11798_s0 + $0xff8] sm:$0xff]  ;;  %v150_v37 = vld [vmem:[%s11798_s0 + $0x408] sm:$0xff] }
  0xd0   :  { %6086 = vmatpush3.bf16.msra.mxu1 %v7032_v46  ;;  %v363_v46 = vld [vmem:[%s11798_s0 + $0xab0] sm:$0xff] }
  0xd1   :  { %6087 = vmatprep.subr.bf16.mxu1 %v7039_v47  ;;  %v387_v47 = vld [vmem:[%s11798_s0 + $0xb70] sm:$0xff] }
  0xd2   :  { %3151 = vmatmul.mubr.bf16.gmra.mrb[88].mxu0 %v1033_v48  ;;  %3248 = vmatmul.mubr.bf16.gmra.mrb[88].mxu1 %v843_v49  ;;  %v412_v48 = vld [vmem:[%s11798_s0 + $0xc38] sm:$0xff]  ;;  %v963_v56 = vpack.c.bf16 %v387_v47, %v363_v46 }
  0xd3   :  { %3158 = vmatprep.mubr.bf16.mxu0 %v1058_v50  ;;  %3255 = vmatprep.mubr.bf16.mxu1 %v868_v51  ;;  %v436_v49 = vld [vmem:[%s11798_s0 + $0xcf8] sm:$0xff]  ;;  %v30_v50 = vld [vmem:[%s11798_s0 + $0x48] sm:$0xff] }
  0xd4   :  { %6088 = vmatpush3.bf16.msra.mxu1 %v7040_v52  ;;  %v54_v51 = vld [vmem:[%s11798_s0 + $0x108] sm:$0xff]  ;;  %v988_v60 = vpack.c.bf16 %v436_v49, %v412_v48  ;;  %v1036_v48 = vpack.c.bf16 %v532_v35, %v508_v34  ;;  %v846_v49 = vpack.c.bf16 %v150_v37, %v126_v36  ;;  %v628_v34 = vld [vmem:[%s11798_s0 + $0x12f8] sm:$0xff]  ;;  %v8443_v36 = vld [vmem:[%s11799_s2] ss:$0 sm:$0xff] }
  0xd5   :  { %6089 = vmatprep.subr.bf16.mxu1 %v7041_v53  ;;  %v798_v61 = vpack.c.bf16 %v54_v51, %v30_v50  ;;  %v222_v37 = vld [vmem:[%s11798_s0 + $0x648] sm:$0xff] }
  0xd8   :  { %6090 = vmatpush3.bf16.msra.mxu1 %v7042_v62 }
  0xd9   :  { %6091 = vmatprep.subr.bf16.mxu1 %v7043_v63 }
  0xda   :  { %3159 = vmatmul.mubr.bf16.gmra.mrb[92].mxu0 %v1057_v0  ;;  %3256 = vmatmul.mubr.bf16.gmra.mrb[92].mxu1 %v867_v1 }
  0xdb   :  { %3166 = vmatprep.mubr.bf16.mxu0 %v1082_v2  ;;  %3263 = vmatprep.mubr.bf16.mxu1 %v892_v3  ;;  %v411_v3 = vld [vmem:[%s11798_s0 + $0xc30] sm:$0xff] }
  0xdc   :  { %6092 = vmatpush3.bf16.msra.mxu1 %v7044_v4  ;;  %v435_v4 = vld [vmem:[%s11798_s0 + $0xcf0] sm:$0xff] }
  0xdd   :  { %6093 = vmatprep.subr.bf16.mxu1 %v7045_v5  ;;  %v29_v5 = vld [vmem:[%s11798_s0 + $0x40] sm:$0xff] }
  0xe0   :  { %6094 = vmatpush3.bf16.msra.mxu1 %v7046_v14 }
  0xe1   :  { %6303 = vmatprep.subr.bf16.mxu1 %v7049_v15  ;;  %v987_v15 = vpack.c.bf16 %v435_v4, %v411_v3  ;;  %v174_v3 = vld [vmem:[%s11798_s0 + $0x4c8] sm:$0xff] }
  0xe2   :  { %3167 = vmatmul.mubr.bf16.gmra.mrb[96].mxu0 %v1081_v16  ;;  %3264 = vmatmul.mubr.bf16.gmra.mrb[96].mxu1 %v891_v17  ;;  %v797_v16 = vpack.c.bf16 %v53_v6, %v29_v5  ;;  %v198_v4 = vld [vmem:[%s11798_s0 + $0x588] sm:$0xff]  ;;  %v7060_v5 = vld [vmem:[%s11797_s1 + $0x318] sm:$0xff]   ;;  %v7061_v6 = vld [vmem:[%s11797_s1 + $0x360] sm:$0xff]  }
  0xe3   :  { %3174 = vmatprep.mubr.bf16.mxu0 %v1106_v18  ;;  %3271 = vmatprep.mubr.bf16.mxu1 %v916_v19 }
  0xea   :  { %3175 = vmatmul.mubr.bf16.gmra.mrb[100].mxu0 %v1105_v28  ;;  %3272 = vmatmul.mubr.bf16.gmra.mrb[100].mxu1 %v915_v29  ;;  %v459_v29 = vld [vmem:[%s11798_s0 + $0xdb0] sm:$0xff] }
  0xeb   :  { %3182 = vmatprep.mubr.bf16.mxu0 %v1130_v30  ;;  %3279 = vmatprep.mubr.bf16.mxu1 %v940_v31  ;;  %v483_v30 = vld [vmem:[%s11798_s0 + $0xe70] sm:$0xff]  ;;  %v77_v31 = vld [vmem:[%s11798_s0 + $0x1c0] sm:$0xff] }
  0xec   :  { %v821_v44 = vpack.c.bf16 %v101_v32, %v77_v31  ;;  %v197_v31 = vld [vmem:[%s11798_s0 + $0x580] sm:$0xff]  ;;  %v604_v32 = vld [vmem:[%s11798_s0 + $0x1238] sm:$0xff] }
  0xf2   :  { %3183 = vmatmul.mubr.bf16.gmra.mrb[104].mxu0 %v1129_v40  ;;  %3280 = vmatmul.mubr.bf16.gmra.mrb[104].mxu1 %v939_v41 }
  0xf3   :  { %3190 = vmatprep.mubr.bf16.mxu0 %v1154_v42  ;;  %3287 = vmatprep.mubr.bf16.mxu1 %v964_v43  ;;  %v1011_v43 = vpack.c.bf16 %v483_v30, %v459_v29  ;;  %v579_v29 = vld [vmem:[%s11798_s0 + $0x1170] sm:$0xff]  ;;  %v173_v30 = vld [vmem:[%s11798_s0 + $0x4c0] sm:$0xff] }
  0xf5   :  { %v5607_v52 = vpop.f32.mrb[0].mxu1  ;;  %v5535_v53 = vpop.f32.mrb[0].mxu0 }
  0xf6   :  { %v5608_v54 = vpop.f32.mrb[1].mxu1  ;;  %v5536_v57 = vpop.f32.mrb[1].mxu0 }
  0xf7   :  { %v8288_v58 = vadd.f32 %v5608_v54, %v5607_v52  ;;  %v5610_v59 = vpop.f32.mrb[2].mxu1  ;;  %v8290_v62 = vadd.f32 %v5536_v57, %v5535_v53  ;;  %v5538_v63 = vpop.f32.mrb[2].mxu0  ;;  %v7056_v54 = vld [vmem:[%s11797_s1 + $0x310] sm:$0xff]  }
  0xf8   :  { %v5611_v0 = vpop.f32.mrb[3].mxu1  ;;  %v5539_v1 = vpop.f32.mrb[3].mxu0  ;;  %v507_v57 = vld [vmem:[%s11798_s0 + $0xf30] sm:$0xff] }
  0xf9   :  { %v8292_v2 = vadd.f32 %v5611_v0, %v5610_v59  ;;  %v8306_v7 = vadd.f32 %v5539_v1, %v5538_v63  ;;  %v531_v59 = vld [vmem:[%s11798_s0 + $0xff0] sm:$0xff]  ;;  %v556_v0 = vld [vmem:[%s11798_s0 + $0x10b8] sm:$0xff] }
  0xfa   :  { %3191 = vmatmul.mubr.bf16.gmra.mrb[108].mxu0 %v1153_v55  ;;  %3288 = vmatmul.mubr.bf16.gmra.mrb[108].mxu1 %v963_v56  ;;  %v7059_v55 = vld [vmem:[%s11797_s1 + $0x358] sm:$0xff]   ;;  %v1035_v11 = vpack.c.bf16 %v531_v59, %v507_v57 }
  0xfb   :  { %3295 = vmatprep.mubr.bf16.mxu1 %v988_v60  ;;  %3392 = vmatprep.mubr.bf16.mxu0 %v798_v61  ;;  %v125_v60 = vld [vmem:[%s11798_s0 + $0x340] sm:$0xff]  ;;  %v580_v1 = vld [vmem:[%s11798_s0 + $0x1178] sm:$0xff] }
  0xfc   :  { %v149_v61 = vld [vmem:[%s11798_s0 + $0x400] sm:$0xff] }
  0xfd   :  { %v5613_v12 = vpop.f32.mrb[4].mxu1  ;;  %v5541_v13 = vpop.f32.mrb[4].mxu0 }
  0xfe   :  { %v5614_v14 = vpop.f32.mrb[5].mxu1  ;;  %v5542_v17 = vpop.f32.mrb[5].mxu0 }
  0xff   :  { %v8320_v18 = vadd.f32 %v5614_v14, %v5613_v12  ;;  %v5616_v19 = vpop.f32.mrb[6].mxu1  ;;  %v8322_v22 = vadd.f32 %v5542_v17, %v5541_v13  ;;  %v5544_v23 = vpop.f32.mrb[6].mxu0  ;;  %v845_v12 = vpack.c.bf16 %v149_v61, %v125_v60  ;;  %v870_v17 = vpack.c.bf16 %v198_v4, %v174_v3  ;;  %v7069_v61 = vld [vmem:[%s11797_s1 + $0x378] sm:$0xff]   ;;  %v627_v3 = vld [vmem:[%s11798_s0 + $0x12f0] sm:$0xff]  ;;  %v221_v4 = vld [vmem:[%s11798_s0 + $0x640] sm:$0xff] }
 0x100   :  { %v5617_v24 = vpop.f32.mrb[7].mxu1  ;;  %v5545_v25 = vpop.f32.mrb[7].mxu0 }
 0x101   :  { %v8330_v28 = vadd.f32 %v5617_v24, %v5616_v19  ;;  %v8344_v33 = vadd.f32 %v5545_v25, %v5544_v23  ;;  %v7063_v24 = vld [vmem:[%s11797_s1 + $0x320] sm:$0xff]   ;;  %v7065_v25 = vld [vmem:[%s11797_s1 + $0x368] sm:$0xff]  }
 0x102   :  { %3296 = vmatmul.mubr.bf16.gmra.mrb[112].mxu1 %v987_v15  ;;  %3393 = vmatmul.mubr.bf16.vlgmr.msra.gmra.mrb[112].mxu0 %v797_v16  ;;  %v1060_v16 = vpack.c.bf16 %v580_v1, %v556_v0  ;;  %v603_v1 = vld [vmem:[%s11798_s0 + $0x1230] sm:$0xff] }
 0x103   :  { %3303 = vmatprep.mubr.bf16.mxu1 %v1012_v20  ;;  %3400 = vmatprep.mubr.bf16.mxu0 %v822_v21 }
 0x104   :  { %6192 = vmatpush3.bf16.msra.mxu0 %v7048_v26 }
 0x105   :  { %v5619_v40 = vpop.f32.mrb[8].mxu1  ;;  %v5547_v41 = vpop.f32.mrb[8].mxu0  ;;  %6193 = vmatprep.subr.bf16.mxu0 %v7051_v27  ;;  %v555_v27 = vld [vmem:[%s11798_s0 + $0x10b0] sm:$0xff] }
 0x106   :  { %v5620_v42 = vpop.f32.mrb[9].mxu1  ;;  %v5548_v45 = vpop.f32.mrb[9].mxu0 }
 0x107   :  { %v8364_v46 = vadd.f32 %v5620_v42, %v5619_v40  ;;  %v5622_v47 = vpop.f32.mrb[10].mxu1  ;;  %v8366_v50 = vadd.f32 %v5548_v45, %v5547_v41  ;;  %v5550_v51 = vpop.f32.mrb[10].mxu0  ;;  %v7067_v40 = vld [vmem:[%s11797_s1 + $0x370] sm:$0xff]   ;;  %v2751_v41 = vadd.f32 %v8290_v62, %v8443_v36  ;;  %v1059_v45 = vpack.c.bf16 %v579_v29, %v555_v27 }
 0x108   :  { %v5623_v52 = vpop.f32.mrb[11].mxu1  ;;  %v5551_v53 = vpop.f32.mrb[11].mxu0  ;;  %6194 = vmatpush3.bf16.msra.mxu0 %v7052_v38  ;;  %v246_v38 = vld [vmem:[%s11798_s0 + $0x708] sm:$0xff]  ;;  %v7068_v62 = vld [vmem:[%s11797_s1 + $0x330] sm:$0xff]   ;;  %v2762_v27 = vadd.f32 %v8344_v33, %v8443_v36 }
 0x109   :  { %v8374_v56 = vadd.f32 %v5623_v52, %v5622_v47  ;;  %v8388_v63 = vadd.f32 %v5551_v53, %v5550_v51  ;;  %6195 = vmatprep.subr.bf16.mxu0 %v7055_v39  ;;  %v7066_v39 = vld [vmem:[%s11797_s1 + $0x328] sm:$0xff]   ;;  %v869_v47 = vpack.c.bf16 %v197_v31, %v173_v30  ;;  %v2754_v51 = vadd.f32 %v8306_v7, %v8443_v36  ;;  %v675_v33 = vld [vmem:[%s11798_s0 + $0x1470] sm:$0xff] }
 0x10a   :  { %3304 = vmatmul.mubr.bf16.gmra.mrb[116].mxu1 %v1011_v43  ;;  %3401 = vmatmul.mubr.bf16.gmra.mrb[116].mxu0 %v821_v44 }
 0x10b   :  { %3311 = vmatprep.mubr.bf16.mxu1 %v1036_v48  ;;  %3408 = vmatprep.mubr.bf16.mxu0 %v846_v49  ;;  %v1084_v48 = vpack.c.bf16 %v628_v34, %v604_v32 }
 0x10c   :  { %6196 = vmatpush3.bf16.msra.mxu0 %v7056_v54  ;;  %v894_v54 = vpack.c.bf16 %v246_v38, %v222_v37 }
 0x10d   :  { %v5625_v8 = vpop.f32.mrb[12].mxu1  ;;  %v5553_v9 = vpop.f32.mrb[12].mxu0  ;;  %6197 = vmatprep.subr.bf16.mxu0 %v7059_v55 }
 0x10e   :  { %v5626_v10 = vpop.f32.mrb[13].mxu1  ;;  %v5554_v13 = vpop.f32.mrb[13].mxu0 }
 0x10f   :  { %v8408_v14 = vadd.f32 %v5626_v10, %v5625_v8  ;;  %v5628_v15 = vpop.f32.mrb[14].mxu1  ;;  %v8410_v19 = vadd.f32 %v5554_v13, %v5553_v9  ;;  %v5556_v20 = vpop.f32.mrb[14].mxu0  ;;  %v676_v8 = vld [vmem:[%s11798_s0 + $0x1478] sm:$0xff]  ;;  %v270_v10 = vld [vmem:[%s11798_s0 + $0x7c8] sm:$0xff] }
 0x110   :  { %v5629_v21 = vpop.f32.mrb[15].mxu1  ;;  %v5557_v23 = vpop.f32.mrb[15].mxu0  ;;  %6198 = vmatpush3.bf16.msra.mxu0 %v7060_v5  ;;  %v245_v5 = vld [vmem:[%s11798_s0 + $0x700] sm:$0xff] }
 0x111   :  { %v8418_v26 = vadd.f32 %v5629_v21, %v5628_v15  ;;  %v8438_v35 = vadd.f32 %v5557_v23, %v5556_v20  ;;  %6199 = vmatprep.subr.bf16.mxu0 %v7061_v6  ;;  %v652_v6 = vld [vmem:[%s11798_s0 + $0x13b8] sm:$0xff]  ;;  %v2759_v15 = vadd.f32 %v8322_v22, %v8443_v36  ;;  %v1083_v21 = vpack.c.bf16 %v627_v3, %v603_v1 }
 0x112   :  { %3312 = vmatmul.mubr.bf16.gmra.mrb[120].mxu1 %v1035_v11  ;;  %3409 = vmatmul.mubr.bf16.gmra.mrb[120].mxu0 %v845_v12  ;;  %v294_v11 = vld [vmem:[%s11798_s0 + $0x888] sm:$0xff]  ;;  %v7070_v12 = vld [vmem:[%s11797_s1 + $0x338] sm:$0xff]   ;;  %v893_v23 = vpack.c.bf16 %v245_v5, %v221_v4 }
 0x113   :  { %3319 = vmatprep.mubr.bf16.mxu1 %v1060_v16  ;;  %3416 = vmatprep.mubr.bf16.mxu0 %v870_v17  ;;  %v918_v31 = vpack.c.bf16 %v294_v11, %v270_v10  ;;  %v699_v11 = vld [vmem:[%s11798_s0 + $0x1530] sm:$0xff] }
 0x114   :  { %6200 = vmatpush3.bf16.msra.mxu0 %v7063_v24  ;;  %v1108_v24 = vpack.c.bf16 %v676_v8, %v652_v6 }
 0x115   :  { %v5647_v42 = vpop.f32.mrb[16].mxu1  ;;  %v5559_v43 = vpop.f32.mrb[16].mxu0  ;;  %6201 = vmatprep.subr.bf16.mxu0 %v7065_v25 }
 0x116   :  { %v5648_v44 = vpop.f32.mrb[17].mxu1  ;;  %v5560_v49 = vpop.f32.mrb[17].mxu0 }
 0x117   :  { %v5649_v52 = vadd.f32 %v5648_v44, %v5647_v42  ;;  %v5650_v53 = vpop.f32.mrb[18].mxu1  ;;  %v8461_v55 = vadd.f32 %v5560_v49, %v5559_v43  ;;  %v5562_v57 = vpop.f32.mrb[18].mxu0  ;;  %v293_v42 = vld [vmem:[%s11798_s0 + $0x880] sm:$0xff]  ;;  %v700_v43 = vld [vmem:[%s11798_s0 + $0x1538] sm:$0xff]  ;;  %v342_v49 = vld [vmem:[%s11798_s0 + $0xa08] sm:$0xff] }
 0x118   :  { %v5651_v59 = vpop.f32.mrb[19].mxu1  ;;  %v5563_v60 = vpop.f32.mrb[19].mxu0  ;;  %6202 = vmatpush3.bf16.msra.mxu0 %v7066_v39  ;;  %v724_v44 = vld [vmem:[%s11798_s0 + $0x15f8] sm:$0xff] }
 0x119   :  { %v8469_v0 = vadd.f32 %v5649_v52, %v2751_v41  ;;  %v5652_v7 = vadd.f32 %v5651_v59, %v5650_v53  ;;  %v8489_v9 = vadd.f32 %v5563_v60, %v5562_v57  ;;  %6203 = vmatprep.subr.bf16.mxu0 %v7067_v40  ;;  %v651_v40 = vld [vmem:[%s11798_s0 + $0x13b0] sm:$0xff]  ;;  %v269_v41 = vld [vmem:[%s11798_s0 + $0x7c0] sm:$0xff]  ;;  %v1132_v60 = vpack.c.bf16 %v724_v44, %v700_v43 }
 0x11a   :  { %3320 = vmatmul.mubr.bf16.gmra.mrb[124].mxu1 %v1059_v45  ;;  %3417 = vmatmul.mubr.bf16.gmra.mrb[124].mxu0 %v869_v47  ;;  %v1107_v57 = vpack.c.bf16 %v675_v33, %v651_v40  ;;  %v917_v59 = vpack.c.bf16 %v293_v42, %v269_v41 }
 0x11b   :  { %v8500_v13 = vadd.f32 %v5652_v7, %v2754_v51  ;;  %3327 = vmatprep.mubr.bf16.mxu1 %v1084_v48  ;;  %3424 = vmatprep.mubr.bf16.mxu0 %v894_v54  ;;  %v318_v48 = vld [vmem:[%s11798_s0 + $0x948] sm:$0xff]  ;;  %v2767_v51 = vadd.f32 %v8366_v50, %v8443_v36 }
 0x11c   :  { %6204 = vmatpush3.bf16.msra.mxu0 %v7068_v62  ;;  %v942_v3 = vpack.c.bf16 %v342_v49, %v318_v48 }
 0x11d   :  { %v5653_v16 = vpop.f32.mrb[20].mxu1  ;;  %v5565_v17 = vpop.f32.mrb[20].mxu0  ;;  %6205 = vmatprep.subr.bf16.mxu0 %v7069_v61  ;;  %v2770_v61 = vadd.f32 %v8388_v63, %v8443_v36  ;;  %v317_v63 = vld [vmem:[%s11798_s0 + $0x940] sm:$0xff] }
 0x11e   :  { %v5654_v20 = vpop.f32.mrb[21].mxu1  ;;  %v5566_v25 = vpop.f32.mrb[21].mxu0 }
 0x11f   :  { %v5655_v29 = vadd.f32 %v5654_v20, %v5653_v16  ;;  %v5656_v30 = vpop.f32.mrb[22].mxu1  ;;  %v8506_v32 = vadd.f32 %v5566_v25, %v5565_v17  ;;  %v5568_v34 = vpop.f32.mrb[22].mxu0  ;;  %v748_v16 = vld [vmem:[%s11798_s0 + $0x16b8] sm:$0xff]  ;;  %v2775_v25 = vadd.f32 %v8410_v19, %v8443_v36 }
 0x120   :  { %v5657_v37 = vpop.f32.mrb[23].mxu1  ;;  %v5569_v38 = vpop.f32.mrb[23].mxu0  ;;  %6206 = vmatpush3.bf16.msra.mxu0 %v7070_v12  ;;  %v723_v12 = vld [vmem:[%s11798_s0 + $0x15f0] sm:$0xff]  ;;  %v772_v17 = vld [vmem:[%s11798_s0 + $0x1778] sm:$0xff] }
 0x121   :  { %v8508_v22 = vadd.f32 %v5655_v29, %v2759_v15  ;;  %v5658_v39 = vadd.f32 %v5657_v37, %v5656_v30  ;;  %v8528_v45 = vadd.f32 %v5569_v38, %v5568_v34  ;;  %v341_v15 = vld [vmem:[%s11798_s0 + $0xa00] sm:$0xff]  ;;  %v1156_v37 = vpack.c.bf16 %v772_v17, %v748_v16 }
 0x122   :  { %3328 = vmatmul.mubr.bf16.gmra.mrb[128].mxu1 %v1083_v21  ;;  %3425 = vmatmul.mubr.bf16.gmra.mrb[128].mxu0 %v893_v23  ;;  %v366_v21 = vld [vmem:[%s11798_s0 + $0xac8] sm:$0xff]  ;;  %v941_v34 = vpack.c.bf16 %v341_v15, %v317_v63 }
 0x123   :  { %v8530_v47 = vadd.f32 %v5658_v39, %v2762_v27  ;;  %3335 = vmatprep.mubr.bf16.mxu1 %v1108_v24  ;;  %3432 = vmatprep.mubr.bf16.mxu0 %v918_v31  ;;  %v390_v23 = vld [vmem:[%s11798_s0 + $0xb88] sm:$0xff]  ;;  %v1131_v31 = vpack.c.bf16 %v723_v12, %v699_v11  ;;  %v2778_v39 = vadd.f32 %v8438_v35, %v8443_v36  ;;  %v365_v35 = vld [vmem:[%s11798_s0 + $0xac0] sm:$0xff] }
 0x124   :  { %v966_v41 = vpack.c.bf16 %v390_v23, %v366_v21  ;;  %v2786_v12 = vadd.f32 %v8489_v9, %v8443_v36 }
 0x125   :  { %v5659_v52 = vpop.f32.mrb[24].mxu1  ;;  %v5571_v53 = vpop.f32.mrb[24].mxu0 }
 0x126   :  { %v5660_v54 = vpop.f32.mrb[25].mxu1  ;;  %v5572_v62 = vpop.f32.mrb[25].mxu0 }
 0x127   :  { %v5661_v7 = vadd.f32 %v5660_v54, %v5659_v52  ;;  %v5662_v1 = vpop.f32.mrb[26].mxu1  ;;  %v8542_v4 = vadd.f32 %v5572_v62, %v5571_v53  ;;  %v5574_v5 = vpop.f32.mrb[26].mxu0  ;;  %v771_v52 = vld [vmem:[%s11798_s0 + $0x1770] sm:$0xff]  ;;  %v389_v53 = vld [vmem:[%s11798_s0 + $0xb80] sm:$0xff]  ;;  %v414_v54 = vld [vmem:[%s11798_s0 + $0xc48] sm:$0xff] }
 0x128   :  { %v5663_v6 = vpop.f32.mrb[27].mxu1  ;;  %v5575_v8 = vpop.f32.mrb[27].mxu0  ;;  %v32_v62 = vld [vmem:[%s11798_s0 + $0x58] sm:$0xff] }
 0x129   :  { %v8544_v10 = vadd.f32 %v5661_v7, %v2767_v51  ;;  %v5664_v50 = vadd.f32 %v5663_v6, %v5662_v1  ;;  %v8564_v20 = vadd.f32 %v5575_v8, %v5574_v5  ;;  %v747_v51 = vld [vmem:[%s11798_s0 + $0x16b0] sm:$0xff]  ;;  %v2783_v7 = vadd.f32 %v8461_v55, %v8443_v36 }
 0x12a   :  { %3336 = vmatmul.mubr.bf16.gmra.mrb[132].mxu1 %v1107_v57  ;;  %3433 = vmatmul.mubr.bf16.gmra.mrb[132].mxu0 %v917_v59  ;;  %v438_v57 = vld [vmem:[%s11798_s0 + $0xd08] sm:$0xff]  ;;  %v1155_v6 = vpack.c.bf16 %v771_v52, %v747_v51  ;;  %v965_v8 = vpack.c.bf16 %v389_v53, %v365_v35  ;;  %v2794_v35 = vadd.f32 %v8528_v45, %v8443_v36 }
 0x12b   :  { %v8572_v24 = vadd.f32 %v5664_v50, %v2770_v61  ;;  %3343 = vmatprep.mubr.bf16.mxu1 %v1132_v60  ;;  %3440 = vmatprep.mubr.bf16.mxu0 %v942_v3  ;;  %v56_v61 = vld [vmem:[%s11798_s0 + $0x118] sm:$0xff]  ;;  %v990_v50 = vpack.c.bf16 %v438_v57, %v414_v54 }
 0x12c   :  { %v800_v16 = vpack.c.bf16 %v56_v61, %v32_v62 }
 0x12d   :  { %v5665_v27 = vpop.f32.mrb[28].mxu1  ;;  %v5577_v29 = vpop.f32.mrb[28].mxu0 }
 0x12e   :  { %v5666_v30 = vpop.f32.mrb[29].mxu1  ;;  %v5578_v38 = vpop.f32.mrb[29].mxu0 }
 0x12f   :  { %v5667_v40 = vadd.f32 %v5666_v30, %v5665_v27  ;;  %v5668_v33 = vpop.f32.mrb[30].mxu1  ;;  %v8578_v42 = vadd.f32 %v5578_v38, %v5577_v29  ;;  %v5580_v43 = vpop.f32.mrb[30].mxu0  ;;  %v413_v30 = vld [vmem:[%s11798_s0 + $0xc40] sm:$0xff]  ;;  %v462_v38 = vld [vmem:[%s11798_s0 + $0xdc8] sm:$0xff] }
 0x130   :  { %v5669_v44 = vpop.f32.mrb[31].mxu1  ;;  %v5581_v48 = vpop.f32.mrb[31].mxu0 }
 0x131   :  { %v8580_v49 = vadd.f32 %v5667_v40, %v2775_v25  ;;  %v5670_v19 = vadd.f32 %v5669_v44, %v5668_v33  ;;  %v8600_v59 = vadd.f32 %v5581_v48, %v5580_v43  ;;  %v2791_v40 = vadd.f32 %v8506_v32, %v8443_v36  ;;  %v80_v43 = vld [vmem:[%s11798_s0 + $0x1d8] sm:$0xff]  ;;  %v7050_v32 = vld [vmem:[%s11797_s1 + $0x380] sm:$0xff]  }
 0x132   :  { %3344 = vmatmul.mubr.bf16.gmra.mrb[136].mxu1 %v1131_v31  ;;  %3441 = vmatmul.mubr.bf16.gmra.mrb[136].mxu0 %v941_v34  ;;  %v437_v31 = vld [vmem:[%s11798_s0 + $0xd00] sm:$0xff]  ;;  %v31_v34 = vld [vmem:[%s11798_s0 + $0x50] sm:$0xff]  ;;  %v104_v44 = vld [vmem:[%s11798_s0 + $0x298] sm:$0xff] }
 0x133   :  { %v8602_v60 = vadd.f32 %v5670_v19, %v2778_v39  ;;  %3351 = vmatprep.mubr.bf16.mxu1 %v1156_v37  ;;  %3448 = vmatprep.mubr.bf16.mxu0 %v966_v41  ;;  %v55_v37 = vld [vmem:[%s11798_s0 + $0x110] sm:$0xff]  ;;  %v486_v39 = vld [vmem:[%s11798_s0 + $0xe88] sm:$0xff]  ;;  %v989_v19 = vpack.c.bf16 %v437_v31, %v413_v30  ;;  %v152_v30 = vld [vmem:[%s11798_s0 + $0x418] sm:$0xff] }
 0x134   :  { %v799_v51 = vpack.c.bf16 %v55_v37, %v31_v34  ;;  %v1014_v57 = vpack.c.bf16 %v486_v39, %v462_v38  ;;  %v7057_v31 = vld [vmem:[%s11797_s1 + $0x3d0] sm:$0xff]   ;;  %v2799_v34 = vadd.f32 %v8542_v4, %v8443_v36 }
 0x135   :  { %v5671_v1 = vpop.f32.mrb[32].mxu1  ;;  %v5583_v3 = vpop.f32.mrb[32].mxu0 }
 0x136   :  { %v5672_v5 = vpop.f32.mrb[33].mxu1  ;;  %v5584_v11 = vpop.f32.mrb[33].mxu0 }
 0x137   :  { %v5673_v63 = vadd.f32 %v5672_v5, %v5671_v1  ;;  %v5674_v15 = vpop.f32.mrb[34].mxu1  ;;  %v8614_v17 = vadd.f32 %v5584_v11, %v5583_v3  ;;  %v5586_v21 = vpop.f32.mrb[34].mxu0  ;;  %v824_v1 = vpack.c.bf16 %v104_v44, %v80_v43  ;;  %v7053_v5 = vld [vmem:[%s11797_s1 + $0x3c8] sm:$0xff]   ;;  %v2802_v44 = vadd.f32 %v8564_v20, %v8443_v36  ;;  %v7062_v20 = vld [vmem:[%s11797_s1 + $0x3d8] sm:$0xff]  }
 0x138   :  { %v5675_v23 = vpop.f32.mrb[35].mxu1  ;;  %v5587_v25 = vpop.f32.mrb[35].mxu0 }
 0x139   :  { %v8616_v27 = vadd.f32 %v5673_v63, %v2783_v7  ;;  %v5676_v55 = vadd.f32 %v5675_v23, %v5674_v15  ;;  %v8618_v29 = vadd.f32 %v5587_v25, %v5586_v21  ;;  %v103_v63 = vld [vmem:[%s11798_s0 + $0x290] sm:$0xff]  ;;  %v510_v15 = vld [vmem:[%s11798_s0 + $0xf48] sm:$0xff]  ;;  %v7079_v25 = vld [vmem:[%s11797_s1 + $0x440] sm:$0xff]  }
 0x13a   :  { %3352 = vmatmul.mubr.bf16.gmra.mrb[140].mxu1 %v1155_v6  ;;  %3449 = vmatmul.mubr.bf16.gmra.mrb[140].mxu0 %v965_v8  ;;  %v461_v8 = vld [vmem:[%s11798_s0 + $0xdc0] sm:$0xff]  ;;  %v534_v21 = vld [vmem:[%s11798_s0 + $0x1008] sm:$0xff] }
 0x13b   :  { %v8623_v9 = vadd.f32 %v5676_v55, %v2786_v12  ;;  %3456 = vmatprep.mubr.bf16.mxu0 %v990_v50  ;;  %3553 = vmatprep.mubr.bf16.mxu1 %v800_v16  ;;  %v485_v50 = vld [vmem:[%s11798_s0 + $0xe80] sm:$0xff]  ;;  %v79_v12 = vld [vmem:[%s11798_s0 + $0x1d0] sm:$0xff]  ;;  %v7054_v23 = vld [vmem:[%s11797_s1 + $0x388] sm:$0xff]   ;;  %v1038_v43 = vpack.c.bf16 %v534_v21, %v510_v15  ;;  %v2807_v21 = vadd.f32 %v8578_v42, %v8443_v36 }
 0x13c   :  { %v128_v55 = vld [vmem:[%s11798_s0 + $0x358] sm:$0xff]  ;;  %6415 = vmatprep.subr.bf16.mxu0 %v7079_v25 }
 0x13d   :  { %v5677_v33 = vpop.f32.mrb[36].mxu1  ;;  %v5589_v41 = vpop.f32.mrb[36].mxu0  ;;  %v7064_v15 = vld [vmem:[%s11797_s1 + $0x398] sm:$0xff]  }
 0x13e   :  { %v5678_v48 = vpop.f32.mrb[37].mxu1  ;;  %v5590_v52 = vpop.f32.mrb[37].mxu0 }
 0x13f   :  { %v5679_v53 = vadd.f32 %v5678_v48, %v5677_v33  ;;  %v5680_v54 = vpop.f32.mrb[38].mxu1  ;;  %v8653_v62 = vadd.f32 %v5590_v52, %v5589_v41  ;;  %v5592_v61 = vpop.f32.mrb[38].mxu0  ;;  %v823_v33 = vpack.c.bf16 %v103_v63, %v79_v12  ;;  %v176_v12 = vld [vmem:[%s11798_s0 + $0x4d8] sm:$0xff] }
 0x140   :  { %v5681_v7 = vpop.f32.mrb[39].mxu1  ;;  %v5593_v3 = vpop.f32.mrb[39].mxu0  ;;  %v200_v63 = vld [vmem:[%s11798_s0 + $0x598] sm:$0xff] }
 0x141   :  { %v8658_v6 = vadd.f32 %v5679_v53, %v2791_v40  ;;  %v5682_v45 = vadd.f32 %v5681_v7, %v5680_v54  ;;  %v8666_v11 = vadd.f32 %v5593_v3, %v5592_v61  ;;  %v1013_v40 = vpack.c.bf16 %v485_v50, %v461_v8  ;;  %v7058_v54 = vld [vmem:[%s11797_s1 + $0x390] sm:$0xff]   ;;  %v509_v7 = vld [vmem:[%s11798_s0 + $0xf40] sm:$0xff]  ;;  %v558_v8 = vld [vmem:[%s11798_s0 + $0x10c8] sm:$0xff] }
 0x142   :  { %3457 = vmatmul.mubr.bf16.gmra.mrb[144].mxu0 %v989_v19  ;;  %3554 = vmatmul.mubr.bf16.vlgmr.msra.gmra.mrb[144].mxu1 %v799_v51  ;;  %v127_v3 = vld [vmem:[%s11798_s0 + $0x350] sm:$0xff]  ;;  %v582_v50 = vld [vmem:[%s11798_s0 + $0x1188] sm:$0xff] }
 0x143   :  { %v8677_v16 = vadd.f32 %v5682_v45, %v2794_v35  ;;  %6304 = vmatpush3.bf16.msra.mxu1 %v7050_v32  ;;  %3464 = vmatprep.mubr.bf16.mxu0 %v1014_v57  ;;  %v848_v35 = vpack.c.bf16 %v152_v30, %v128_v55  ;;  %v151_v45 = vld [vmem:[%s11798_s0 + $0x410] sm:$0xff]  ;;  %v7071_v55 = vld [vmem:[%s11797_s1 + $0x3e0] sm:$0xff]  }
 0x144   :  { %3561 = vmatprep.mubr.bf16.mxu1 %v824_v1  ;;  %6305 = vmatprep.subr.bf16.mxu1 %v7053_v5  ;;  %v533_v1 = vld [vmem:[%s11798_s0 + $0x1000] sm:$0xff] }
 0x145   :  { %v5683_v37 = vpop.f32.mrb[40].mxu1  ;;  %v5595_v38 = vpop.f32.mrb[40].mxu0 }
 0x146   :  { %v5684_v39 = vpop.f32.mrb[41].mxu1  ;;  %v5596_v41 = vpop.f32.mrb[41].mxu0 }
 0x147   :  { %v5685_v48 = vadd.f32 %v5684_v39, %v5683_v37  ;;  %v5686_v19 = vpop.f32.mrb[42].mxu1  ;;  %v8701_v51 = vadd.f32 %v5596_v41, %v5595_v38  ;;  %v5598_v52 = vpop.f32.mrb[42].mxu0  ;;  %6306 = vmatpush3.bf16.msra.mxu1 %v7054_v23  ;;  %v847_v37 = vpack.c.bf16 %v151_v45, %v127_v3  ;;  %v1062_v38 = vpack.c.bf16 %v582_v50, %v558_v8  ;;  %v630_v3 = vld [vmem:[%s11798_s0 + $0x1308] sm:$0xff]  ;;  %v224_v45 = vld [vmem:[%s11798_s0 + $0x658] sm:$0xff] }
 0x148   :  { %v5687_v53 = vpop.f32.mrb[43].mxu1  ;;  %v5599_v4 = vpop.f32.mrb[43].mxu0  ;;  %6307 = vmatprep.subr.bf16.mxu1 %v7057_v31  ;;  %v2810_v39 = vadd.f32 %v8600_v59, %v8443_v36  ;;  %v7073_v59 = vld [vmem:[%s11797_s1 + $0x3e8] sm:$0xff]   ;;  %v248_v8 = vld [vmem:[%s11798_s0 + $0x718] sm:$0xff] }
 0x149   :  { %v8706_v32 = vadd.f32 %v5685_v48, %v2799_v34  ;;  %v5688_v57 = vadd.f32 %v5687_v53, %v5686_v19  ;;  %v8708_v61 = vadd.f32 %v5599_v4, %v5598_v52  ;;  %v1037_v34 = vpack.c.bf16 %v533_v1, %v509_v7  ;;  %v7072_v19 = vld [vmem:[%s11797_s1 + $0x3a0] sm:$0xff]   ;;  %v199_v7 = vld [vmem:[%s11798_s0 + $0x590] sm:$0xff]  ;;  %v606_v1 = vld [vmem:[%s11798_s0 + $0x1248] sm:$0xff] }
 0x14a   :  { %3465 = vmatmul.mubr.bf16.gmra.mrb[148].mxu0 %v1013_v40  ;;  %3562 = vmatmul.mubr.bf16.gmra.mrb[148].mxu1 %v823_v33  ;;  %v557_v4 = vld [vmem:[%s11798_s0 + $0x10c0] sm:$0xff]  ;;  %v7074_v50 = vld [vmem:[%s11797_s1 + $0x3a8] sm:$0xff]  }
 0x14b   :  { %v8722_v5 = vadd.f32 %v5688_v57, %v2802_v44  ;;  %3472 = vmatprep.mubr.bf16.mxu0 %v1038_v43  ;;  %3569 = vmatprep.mubr.bf16.mxu1 %v848_v35  ;;  %v872_v43 = vpack.c.bf16 %v200_v63, %v176_v12  ;;  %v175_v57 = vld [vmem:[%s11798_s0 + $0x4d0] sm:$0xff]  ;;  %v2815_v12 = vadd.f32 %v8614_v17, %v8443_v36 }
 0x14c   :  { %6308 = vmatpush3.bf16.msra.mxu1 %v7058_v54  ;;  %v581_v54 = vld [vmem:[%s11798_s0 + $0x1180] sm:$0xff]  ;;  %v896_v17 = vpack.c.bf16 %v248_v8, %v224_v45  ;;  %v272_v45 = vld [vmem:[%s11798_s0 + $0x7d8] sm:$0xff] }
 0x14d   :  { %v5689_v23 = vpop.f32.mrb[44].mxu1  ;;  %v5601_v25 = vpop.f32.mrb[44].mxu0  ;;  %6309 = vmatprep.subr.bf16.mxu1 %v7062_v20  ;;  %v7078_v8 = vld [vmem:[%s11797_s1 + $0x3b8] sm:$0xff]  }
 0x14e   :  { %v5690_v30 = vpop.f32.mrb[45].mxu1  ;;  %v5602_v31 = vpop.f32.mrb[45].mxu0 }
 0x14f   :  { %v5691_v40 = vadd.f32 %v5690_v30, %v5689_v23  ;;  %v5692_v33 = vpop.f32.mrb[46].mxu1  ;;  %v8749_v41 = vadd.f32 %v5602_v31, %v5601_v25  ;;  %v5604_v42 = vpop.f32.mrb[46].mxu0  ;;  %v871_v30 = vpack.c.bf16 %v199_v7, %v175_v57  ;;  %v1086_v31 = vpack.c.bf16 %v630_v3, %v606_v1  ;;  %v247_v7 = vld [vmem:[%s11798_s0 + $0x710] sm:$0xff]  ;;  %v654_v1 = vld [vmem:[%s11798_s0 + $0x13c8] sm:$0xff] }
 0x150   :  { %v5693_v44 = vpop.f32.mrb[47].mxu1  ;;  %v5605_v48 = vpop.f32.mrb[47].mxu0  ;;  %6310 = vmatpush3.bf16.msra.mxu1 %v7064_v15  ;;  %v678_v3 = vld [vmem:[%s11798_s0 + $0x1488] sm:$0xff] }
 0x151   :  { %v8754_v52 = vadd.f32 %v5691_v40, %v2807_v21  ;;  %v5694_v35 = vadd.f32 %v5693_v44, %v5692_v33  ;;  %v8756_v53 = vadd.f32 %v5605_v48, %v5604_v42  ;;  %6311 = vmatprep.subr.bf16.mxu1 %v7071_v55  ;;  %v7075_v21 = vld [vmem:[%s11797_s1 + $0x3f0] sm:$0xff]   ;;  %v1061_v55 = vpack.c.bf16 %v581_v54, %v557_v4  ;;  %v629_v4 = vld [vmem:[%s11798_s0 + $0x1300] sm:$0xff] }
 0x152   :  { %3473 = vmatmul.mubr.bf16.gmra.mrb[152].mxu0 %v1037_v34  ;;  %3570 = vmatmul.mubr.bf16.gmra.mrb[152].mxu1 %v847_v37  ;;  %v2818_v34 = vadd.f32 %v8618_v29, %v8443_v36  ;;  %v7077_v29 = vld [vmem:[%s11797_s1 + $0x3f8] sm:$0xff]  }
 0x153   :  { %v8770_v20 = vadd.f32 %v5694_v35, %v2810_v39  ;;  %3480 = vmatprep.mubr.bf16.mxu0 %v1062_v38  ;;  %3577 = vmatprep.mubr.bf16.mxu1 %v872_v43  ;;  %v7076_v43 = vld [vmem:[%s11797_s1 + $0x3b0] sm:$0xff]  }
 0x154   :  { %6312 = vmatpush3.bf16.msra.mxu1 %v7072_v19 }
 0x155   :  { %v5695_v63 = vpop.f32.mrb[48].mxu1  ;;  %v5759_v15 = vpop.f32.mrb[48].mxu0  ;;  %6313 = vmatprep.subr.bf16.mxu1 %v7073_v59  ;;  %v605_v59 = vld [vmem:[%s11798_s0 + $0x1240] sm:$0xff] }
 0x156   :  { %v5696_v23 = vpop.f32.mrb[49].mxu1  ;;  %v5760_v25 = vpop.f32.mrb[49].mxu0 }
 0x157   :  { %v5697_v37 = vadd.f32 %v5696_v23, %v5695_v63  ;;  %v5761_v38 = vadd.f32 %v5760_v25, %v5759_v15  ;;  %v5698_v39 = vpop.f32.mrb[50].mxu1  ;;  %v5762_v40 = vpop.f32.mrb[50].mxu0  ;;  %v7081_v15 = vld [vmem:[%s11797_s1 + $0x4c0] sm:$0xff]   ;;  %v1085_v25 = vpack.c.bf16 %v629_v4, %v605_v59  ;;  %v295_v4 = vld [vmem:[%s11798_s0 + $0x890] sm:$0xff] }
 0x158   :  { %v5699_v33 = vpop.f32.mrb[51].mxu1  ;;  %v5763_v42 = vpop.f32.mrb[51].mxu0  ;;  %6314 = vmatpush3.bf16.msra.mxu1 %v7074_v50  ;;  %v2823_v50 = vadd.f32 %v8653_v62, %v8443_v36 }
 0x159   :  { %v8800_v44 = vadd.f32 %v5697_v37, %v2815_v12  ;;  %v8803_v48 = vadd.f32 %v5761_v38, %v8469_v0  ;;  %v5700_v19 = vadd.f32 %v5699_v33, %v5698_v39  ;;  %v5764_v35 = vadd.f32 %v5763_v42, %v5762_v40  ;;  %6315 = vmatprep.subr.bf16.mxu1 %v7075_v21  ;;  %v223_v0 = vld [vmem:[%s11798_s0 + $0x650] sm:$0xff] }
 0x15a   :  { %3481 = vmatmul.mubr.bf16.gmra.mrb[156].mxu0 %v1061_v55  ;;  %3578 = vmatmul.mubr.bf16.gmra.mrb[156].mxu1 %v871_v30  ;;  %v895_v55 = vpack.c.bf16 %v247_v7, %v223_v0  ;;  %v1110_v30 = vpack.c.bf16 %v678_v3, %v654_v1  ;;  %v702_v0 = vld [vmem:[%s11798_s0 + $0x1548] sm:$0xff]  ;;  %v320_v1 = vld [vmem:[%s11798_s0 + $0x958] sm:$0xff]  ;;  %v2831_v3 = vadd.f32 %v8701_v51, %v8443_v36 }
 0x15b   :  { %v8817_v54 = vadd.f32 %v5700_v19, %v2818_v34  ;;  %v8820_v57 = vadd.f32 %v5764_v35, %v8500_v13  ;;  %3488 = vmatprep.mubr.bf16.mxu0 %v1086_v31  ;;  %3585 = vmatprep.mubr.bf16.mxu1 %v896_v17  ;;  %v296_v13 = vld [vmem:[%s11798_s0 + $0x898] sm:$0xff]  ;;  %v2826_v31 = vadd.f32 %v8666_v11, %v8443_v36  ;;  %v653_v11 = vld [vmem:[%s11798_s0 + $0x13c0] sm:$0xff]  ;;  %v726_v7 = vld [vmem:[%s11798_s0 + $0x1608] sm:$0xff] }
 0x15c   :  { %6316 = vmatpush3.bf16.msra.mxu1 %v7076_v43  ;;  %v920_v62 = vpack.c.bf16 %v296_v13, %v272_v45  ;;  %v677_v35 = vld [vmem:[%s11798_s0 + $0x1480] sm:$0xff] }
 0x15d   :  { %v5701_v12 = vpop.f32.mrb[52].mxu1  ;;  %v5765_v63 = vpop.f32.mrb[52].mxu0  ;;  %6317 = vmatprep.subr.bf16.mxu1 %v7077_v29  ;;  %v271_v29 = vld [vmem:[%s11798_s0 + $0x7d0] sm:$0xff] }
 0x15e   :  { %v5702_v21 = vpop.f32.mrb[53].mxu1  ;;  %v5766_v23 = vpop.f32.mrb[53].mxu0 }
 0x15f   :  { %v5703_v34 = vadd.f32 %v5702_v21, %v5701_v12  ;;  %v5767_v37 = vadd.f32 %v5766_v23, %v5765_v63  ;;  %v5704_v38 = vpop.f32.mrb[54].mxu1  ;;  %v5768_v39 = vpop.f32.mrb[54].mxu0  ;;  %v1109_v12 = vpack.c.bf16 %v677_v35, %v653_v11  ;;  %v919_v63 = vpack.c.bf16 %v295_v4, %v271_v29  ;;  %v750_v11 = vld [vmem:[%s11798_s0 + $0x16c8] sm:$0xff]  ;;  %v368_v29 = vld [vmem:[%s11798_s0 + $0xad8] sm:$0xff] }
 0x160   :  { %v5705_v40 = vpop.f32.mrb[55].mxu1  ;;  %v5769_v17 = vpop.f32.mrb[55].mxu0  ;;  %6318 = vmatpush3.bf16.msra.mxu1 %v7078_v8  ;;  %v2834_v21 = vadd.f32 %v8708_v61, %v8443_v36  ;;  %v701_v61 = vld [vmem:[%s11798_s0 + $0x1540] sm:$0xff]  ;;  %v774_v35 = vld [vmem:[%s11798_s0 + $0x1788] sm:$0xff]  ;;  %v2839_v4 = vadd.f32 %v8749_v41, %v8443_v36 }
 0x161   :  { %v8847_v33 = vadd.f32 %v5703_v34, %v2823_v50  ;;  %v8850_v42 = vadd.f32 %v5767_v37, %v8508_v22  ;;  %v5706_v43 = vadd.f32 %v5705_v40, %v5704_v38  ;;  %v5770_v19 = vadd.f32 %v5769_v17, %v5768_v39  ;;  %6527 = vmatprep.subr.bf16.mxu1 %v7081_v15  ;;  %v725_v40 = vld [vmem:[%s11798_s0 + $0x1600] sm:$0xff]  ;;  %v319_v17 = vld [vmem:[%s11798_s0 + $0x950] sm:$0xff] }
 0x162   :  { %3489 = vmatmul.mubr.bf16.gmra.mrb[160].mxu0 %v1085_v25  ;;  %3586 = vmatmul.mubr.bf16.gmra.mrb[160].mxu1 %v895_v55  ;;  %v1134_v15 = vpack.c.bf16 %v726_v7, %v702_v0 }
 0x163   :  { %v8861_v59 = vadd.f32 %v5706_v43, %v2826_v31  ;;  %v8864_v22 = vadd.f32 %v5770_v19, %v8530_v47  ;;  %3496 = vmatprep.mubr.bf16.mxu0 %v1110_v30  ;;  %3593 = vmatprep.mubr.bf16.mxu1 %v920_v62  ;;  %v344_v47 = vld [vmem:[%s11798_s0 + $0xa18] sm:$0xff]  ;;  %v343_v19 = vld [vmem:[%s11798_s0 + $0xa10] sm:$0xff] }
 0x164   :  { %v944_v31 = vpack.c.bf16 %v344_v47, %v320_v1 }
 0x165   :  { %v5707_v45 = vpop.f32.mrb[56].mxu1  ;;  %v5771_v13 = vpop.f32.mrb[56].mxu0 }
 0x166   :  { %v5708_v8 = vpop.f32.mrb[57].mxu1  ;;  %v5772_v50 = vpop.f32.mrb[57].mxu0 }
 0x167   :  { %v5709_v23 = vadd.f32 %v5708_v8, %v5707_v45  ;;  %v5773_v25 = vadd.f32 %v5772_v50, %v5771_v13  ;;  %v5710_v55 = vpop.f32.mrb[58].mxu1  ;;  %v5774_v30 = vpop.f32.mrb[58].mxu0  ;;  %v943_v45 = vpack.c.bf16 %v343_v19, %v319_v17  ;;  %v1158_v13 = vpack.c.bf16 %v774_v35, %v750_v11  ;;  %v8960_v11 = vld [vmem:[%s11799_s2] ss:$0 sm:$0xff] }
 0x168   :  { %v5711_v34 = vpop.f32.mrb[59].mxu1  ;;  %v5775_v37 = vpop.f32.mrb[59].mxu0  ;;  %v2842_v8 = vadd.f32 %v8756_v53, %v8443_v36  ;;  %v749_v36 = vld [vmem:[%s11798_s0 + $0x16c0] sm:$0xff]  ;;  %v2847_v35 = vadd.f32 %v8960_v11, %v8288_v58 }
 0x169   :  { %v8885_v38 = vadd.f32 %v5709_v23, %v2831_v3  ;;  %v8888_v51 = vadd.f32 %v5773_v25, %v8544_v10  ;;  %v5712_v39 = vadd.f32 %v5711_v34, %v5710_v55  ;;  %v5776_v62 = vadd.f32 %v5775_v37, %v5774_v30  ;;  %v773_v53 = vld [vmem:[%s11798_s0 + $0x1780] sm:$0xff] }
 0x16a   :  { %3497 = vmatmul.mubr.bf16.gmra.mrb[164].mxu0 %v1109_v12  ;;  %3594 = vmatmul.mubr.bf16.gmra.mrb[164].mxu1 %v919_v63  ;;  %v1133_v3 = vpack.c.bf16 %v725_v40, %v701_v61  ;;  %v440_v61 = vld [vmem:[%s11798_s0 + $0xd18] sm:$0xff]  ;;  %v58_v40 = vld [vmem:[%s11798_s0 + $0x128] sm:$0xff] }
 0x16b   :  { %v8899_v43 = vadd.f32 %v5712_v39, %v2834_v21  ;;  %v8902_v10 = vadd.f32 %v5776_v62, %v8572_v24  ;;  %3504 = vmatprep.mubr.bf16.mxu0 %v1134_v15  ;;  %3601 = vmatprep.mubr.bf16.mxu1 %v944_v31  ;;  %v392_v24 = vld [vmem:[%s11798_s0 + $0xb98] sm:$0xff]  ;;  %v391_v39 = vld [vmem:[%s11798_s0 + $0xb90] sm:$0xff] }
 0x16c   :  { %v968_v21 = vpack.c.bf16 %v392_v24, %v368_v29  ;;  %v416_v62 = vld [vmem:[%s11798_s0 + $0xc58] sm:$0xff] }
 0x16d   :  { %v5713_v0 = vpop.f32.mrb[60].mxu1  ;;  %v5777_v7 = vpop.f32.mrb[60].mxu0 }
 0x16e   :  { %v5714_v1 = vpop.f32.mrb[61].mxu1  ;;  %v5778_v47 = vpop.f32.mrb[61].mxu0 }
 0x16f   :  { %v5715_v50 = vadd.f32 %v5714_v1, %v5713_v0  ;;  %v5779_v12 = vadd.f32 %v5778_v47, %v5777_v7  ;;  %v5716_v63 = vpop.f32.mrb[62].mxu1  ;;  %v5780_v15 = vpop.f32.mrb[62].mxu0 }
 0x170   :  { %v5717_v23 = vpop.f32.mrb[63].mxu1  ;;  %v5781_v25 = vpop.f32.mrb[63].mxu0 }
 0x171   :  { %v8923_v55 = vadd.f32 %v5715_v50, %v2839_v4  ;;  %v8926_v41 = vadd.f32 %v5779_v12, %v8580_v49  ;;  %v5718_v30 = vadd.f32 %v5717_v23, %v5716_v63  ;;  %v5782_v31 = vadd.f32 %v5781_v25, %v5780_v15  ;;  %v367_v49 = vld [vmem:[%s11798_s0 + $0xad0] sm:$0xff] }
 0x172   :  { %3505 = vmatmul.mubr.bf16.gmra.mrb[168].mxu0 %v1133_v3  ;;  %3602 = vmatmul.mubr.bf16.gmra.mrb[168].mxu1 %v943_v45  ;;  %v1157_v4 = vpack.c.bf16 %v773_v53, %v749_v36  ;;  %v967_v0 = vpack.c.bf16 %v391_v39, %v367_v49  ;;  %v992_v45 = vpack.c.bf16 %v440_v61, %v416_v62  ;;  %v415_v23 = vld [vmem:[%s11798_s0 + $0xc50] sm:$0xff]  ;;  %v464_v36 = vld [vmem:[%s11798_s0 + $0xdd8] sm:$0xff]  ;;  %v106_v49 = vld [vmem:[%s11798_s0 + $0x2a8] sm:$0xff] }
 0x173   :  { %v8934_v34 = vadd.f32 %v5718_v30, %v2842_v8  ;;  %v8937_v37 = vadd.f32 %v5782_v31, %v8602_v60  ;;  %3512 = vmatprep.mubr.bf16.mxu0 %v1158_v13  ;;  %3609 = vmatprep.mubr.bf16.mxu1 %v968_v21  ;;  %v34_v60 = vld [vmem:[%s11798_s0 + $0x68] sm:$0xff]  ;;  %v2850_v8 = vadd.f32 %v8960_v11, %v8292_v2  ;;  %v439_v25 = vld [vmem:[%s11798_s0 + $0xd10] sm:$0xff]  ;;  %v57_v31 = vld [vmem:[%s11798_s0 + $0x120] sm:$0xff] }
 0x174   :  { %v802_v13 = vpack.c.bf16 %v58_v40, %v34_v60  ;;  %v488_v53 = vld [vmem:[%s11798_s0 + $0xe98] sm:$0xff]  ;;  %v2855_v61 = vadd.f32 %v8960_v11, %v8320_v18 }
 0x175   :  { %v5719_v17 = vpop.f32.mrb[64].mxu1  ;;  %v5783_v19 = vpop.f32.mrb[64].mxu0 }
 0x176   :  { %v5720_v29 = vpop.f32.mrb[65].mxu1  ;;  %v5784_v24 = vpop.f32.mrb[65].mxu0 }
 0x177   :  { %v5721_v7 = vadd.f32 %v5720_v29, %v5719_v17  ;;  %v5785_v1 = vadd.f32 %v5784_v24, %v5783_v19  ;;  %v5722_v47 = vpop.f32.mrb[66].mxu1  ;;  %v5786_v3 = vpop.f32.mrb[66].mxu0  ;;  %v991_v17 = vpack.c.bf16 %v439_v25, %v415_v23  ;;  %v105_v25 = vld [vmem:[%s11798_s0 + $0x2a0] sm:$0xff] }
 0x178   :  { %v5723_v50 = vpop.f32.mrb[67].mxu1  ;;  %v5787_v12 = vpop.f32.mrb[67].mxu0 }
 0x179   :  { %v8966_v63 = vadd.f32 %v5721_v7, %v2847_v35  ;;  %v8969_v15 = vadd.f32 %v5785_v1, %v8616_v27  ;;  %v5724_v58 = vadd.f32 %v5723_v50, %v5722_v47  ;;  %v5788_v21 = vadd.f32 %v5787_v12, %v5786_v3  ;;  %v33_v27 = vld [vmem:[%s11798_s0 + $0x60] sm:$0xff]  ;;  %v7083_v12 = vld [vmem:[%s11797_s1 + $0x448] sm:$0xff]  }
 0x17a   :  { %3513 = vmatmul.mubr.bf16.gmra.mrb[172].mxu0 %v1157_v4  ;;  %3610 = vmatmul.mubr.bf16.gmra.mrb[172].mxu1 %v967_v0  ;;  %v801_v19 = vpack.c.bf16 %v57_v31, %v33_v27  ;;  %v1016_v0 = vpack.c.bf16 %v488_v53, %v464_v36  ;;  %v2858_v1 = vadd.f32 %v8960_v11, %v8330_v28  ;;  %v463_v28 = vld [vmem:[%s11798_s0 + $0xdd0] sm:$0xff]  ;;  %v512_v27 = vld [vmem:[%s11798_s0 + $0xf58] sm:$0xff]  ;;  %v130_v36 = vld [vmem:[%s11798_s0 + $0x368] sm:$0xff] }
 0x17b   :  { %v8977_v2 = vadd.f32 %v5724_v58, %v2850_v8  ;;  %v8980_v30 = vadd.f32 %v5788_v21, %v8623_v9  ;;  %3617 = vmatprep.mubr.bf16.mxu1 %v992_v45  ;;  %3714 = vmatprep.mubr.bf16.mxu0 %v802_v13  ;;  %v82_v9 = vld [vmem:[%s11798_s0 + $0x1e8] sm:$0xff]  ;;  %v7080_v45 = vld [vmem:[%s11797_s1 + $0x400] sm:$0xff]   ;;  %v487_v58 = vld [vmem:[%s11798_s0 + $0xe90] sm:$0xff] }
 0x17c   :  { %v826_v7 = vpack.c.bf16 %v106_v49, %v82_v9  ;;  %v536_v31 = vld [vmem:[%s11798_s0 + $0x1018] sm:$0xff]  ;;  %v7084_v53 = vld [vmem:[%s11797_s1 + $0x408] sm:$0xff]  }
 0x17d   :  { %v5725_v39 = vpop.f32.mrb[68].mxu1  ;;  %v5789_v62 = vpop.f32.mrb[68].mxu0 }
 0x17e   :  { %v5726_v60 = vpop.f32.mrb[69].mxu1  ;;  %v5790_v40 = vpop.f32.mrb[69].mxu0 }
 0x17f   :  { %v5727_v35 = vadd.f32 %v5726_v60, %v5725_v39  ;;  %v5791_v29 = vadd.f32 %v5790_v40, %v5789_v62  ;;  %v5728_v24 = vpop.f32.mrb[70].mxu1  ;;  %v5792_v4 = vpop.f32.mrb[70].mxu0  ;;  %v7087_v39 = vld [vmem:[%s11797_s1 + $0x450] sm:$0xff]   ;;  %v2863_v62 = vadd.f32 %v8960_v11, %v8364_v46  ;;  %v1015_v40 = vpack.c.bf16 %v487_v58, %v463_v28 }
 0x180   :  { %v5729_v47 = vpop.f32.mrb[71].mxu1  ;;  %v5793_v3 = vpop.f32.mrb[71].mxu0  ;;  %v7088_v46 = vld [vmem:[%s11797_s1 + $0x410] sm:$0xff]  }
 0x181   :  { %v9007_v18 = vadd.f32 %v5727_v35, %v2855_v61  ;;  %v9010_v13 = vadd.f32 %v5791_v29, %v8658_v6  ;;  %v5730_v8 = vadd.f32 %v5729_v47, %v5728_v24  ;;  %v5794_v50 = vadd.f32 %v5793_v3, %v5792_v4  ;;  %v81_v6 = vld [vmem:[%s11798_s0 + $0x1e0] sm:$0xff]  ;;  %v535_v28 = vld [vmem:[%s11798_s0 + $0x1010] sm:$0xff] }
 0x182   :  { %3618 = vmatmul.mubr.bf16.gmra.mrb[176].mxu1 %v991_v17  ;;  %3715 = vmatmul.mubr.bf16.vlgmr.msra.gmra.mrb[176].mxu0 %v801_v19  ;;  %v825_v17 = vpack.c.bf16 %v105_v25, %v81_v6  ;;  %v1040_v4 = vpack.c.bf16 %v536_v31, %v512_v27  ;;  %v153_v25 = vld [vmem:[%s11798_s0 + $0x420] sm:$0xff]  ;;  %v560_v27 = vld [vmem:[%s11798_s0 + $0x10d8] sm:$0xff] }
 0x183   :  { %v9024_v21 = vadd.f32 %v5730_v8, %v2858_v1  ;;  %v9027_v23 = vadd.f32 %v5794_v50, %v8677_v16  ;;  %3625 = vmatprep.mubr.bf16.mxu1 %v1016_v0  ;;  %3722 = vmatprep.mubr.bf16.mxu0 %v826_v7  ;;  %v154_v16 = vld [vmem:[%s11798_s0 + $0x428] sm:$0xff]  ;;  %v2866_v7 = vadd.f32 %v8960_v11, %v8374_v56  ;;  %v511_v56 = vld [vmem:[%s11798_s0 + $0xf50] sm:$0xff]  ;;  %v584_v31 = vld [vmem:[%s11798_s0 + $0x1198] sm:$0xff] }
 0x184   :  { %6416 = vmatpush3.bf16.msra.mxu0 %v7080_v45  ;;  %v850_v0 = vpack.c.bf16 %v154_v16, %v130_v36  ;;  %v178_v36 = vld [vmem:[%s11798_s0 + $0x4e8] sm:$0xff]  ;;  %v7092_v16 = vld [vmem:[%s11797_s1 + $0x418] sm:$0xff]  }
 0x185   :  { %v5731_v9 = vpop.f32.mrb[72].mxu1  ;;  %v5795_v49 = vpop.f32.mrb[72].mxu0  ;;  %6417 = vmatprep.subr.bf16.mxu0 %v7083_v12  ;;  %v7091_v12 = vld [vmem:[%s11797_s1 + $0x458] sm:$0xff]  }
 0x186   :  { %v5732_v61 = vpop.f32.mrb[73].mxu1  ;;  %v5796_v60 = vpop.f32.mrb[73].mxu0 }
 0x187   :  { %v5733_v19 = vadd.f32 %v5732_v61, %v5731_v9  ;;  %v5797_v35 = vadd.f32 %v5796_v60, %v5795_v49  ;;  %v5734_v29 = vpop.f32.mrb[74].mxu1  ;;  %v5798_v24 = vpop.f32.mrb[74].mxu0  ;;  %v7093_v49 = vld [vmem:[%s11797_s1 + $0x460] sm:$0xff]   ;;  %v1039_v60 = vpack.c.bf16 %v535_v28, %v511_v56 }
 0x188   :  { %v5735_v1 = vpop.f32.mrb[75].mxu1  ;;  %v5799_v47 = vpop.f32.mrb[75].mxu0  ;;  %6418 = vmatpush3.bf16.msra.mxu0 %v7084_v53 }
 0x189   :  { %v9057_v3 = vadd.f32 %v5733_v19, %v2863_v62  ;;  %v9060_v45 = vadd.f32 %v5797_v35, %v8706_v32  ;;  %v5736_v8 = vadd.f32 %v5735_v1, %v5734_v29  ;;  %v5800_v50 = vadd.f32 %v5799_v47, %v5798_v24  ;;  %6419 = vmatprep.subr.bf16.mxu0 %v7087_v39  ;;  %v129_v32 = vld [vmem:[%s11798_s0 + $0x360] sm:$0xff] }
 0x18a   :  { %3626 = vmatmul.mubr.bf16.gmra.mrb[180].mxu1 %v1015_v40  ;;  %3723 = vmatmul.mubr.bf16.gmra.mrb[180].mxu0 %v825_v17  ;;  %v2871_v39 = vadd.f32 %v8960_v11, %v8408_v14  ;;  %v849_v40 = vpack.c.bf16 %v153_v25, %v129_v32  ;;  %v1064_v24 = vpack.c.bf16 %v584_v31, %v560_v27  ;;  %v7095_v14 = vld [vmem:[%s11797_s1 + $0x420] sm:$0xff]   ;;  %v608_v25 = vld [vmem:[%s11798_s0 + $0x1258] sm:$0xff]  ;;  %v226_v31 = vld [vmem:[%s11798_s0 + $0x668] sm:$0xff] }
 0x18b   :  { %v9074_v58 = vadd.f32 %v5736_v8, %v2866_v7  ;;  %v9077_v6 = vadd.f32 %v5800_v50, %v8722_v5  ;;  %3633 = vmatprep.mubr.bf16.mxu1 %v1040_v4  ;;  %3730 = vmatprep.mubr.bf16.mxu0 %v850_v0  ;;  %v202_v5 = vld [vmem:[%s11798_s0 + $0x5a8] sm:$0xff]  ;;  %v2874_v0 = vadd.f32 %v8960_v11, %v8418_v26  ;;  %v559_v26 = vld [vmem:[%s11798_s0 + $0x10d0] sm:$0xff]  ;;  %v201_v32 = vld [vmem:[%s11798_s0 + $0x5a0] sm:$0xff] }
 0x18c   :  { %6420 = vmatpush3.bf16.msra.mxu0 %v7088_v46  ;;  %v874_v4 = vpack.c.bf16 %v202_v5, %v178_v36  ;;  %v583_v11 = vld [vmem:[%s11798_s0 + $0x1190] sm:$0xff]  ;;  %v632_v27 = vld [vmem:[%s11798_s0 + $0x1318] sm:$0xff]  ;;  %v7098_v36 = vld [vmem:[%s11797_s1 + $0x428] sm:$0xff]  }
 0x18d   :  { %v5737_v53 = vpop.f32.mrb[76].mxu1  ;;  %v5801_v9 = vpop.f32.mrb[76].mxu0  ;;  %6421 = vmatprep.subr.bf16.mxu0 %v7091_v12  ;;  %v7097_v12 = vld [vmem:[%s11797_s1 + $0x468] sm:$0xff]  }
 0x18e   :  { %v5738_v62 = vpop.f32.mrb[77].mxu1  ;;  %v5802_v61 = vpop.f32.mrb[77].mxu0 }
 0x18f   :  { %v5739_v17 = vadd.f32 %v5738_v62, %v5737_v53  ;;  %v5803_v19 = vadd.f32 %v5802_v61, %v5801_v9  ;;  %v5740_v35 = vpop.f32.mrb[78].mxu1  ;;  %v5804_v29 = vpop.f32.mrb[78].mxu0  ;;  %v7099_v53 = vld [vmem:[%s11797_s1 + $0x470] sm:$0xff]  }
 0x190   :  { %v5741_v7 = vpop.f32.mrb[79].mxu1  ;;  %v5805_v1 = vpop.f32.mrb[79].mxu0  ;;  %6422 = vmatpush3.bf16.msra.mxu0 %v7092_v16 }
 0x191   :  { %v9107_v47 = vadd.f32 %v5739_v17, %v2871_v39  ;;  %v9110_v46 = vadd.f32 %v5803_v19, %v8754_v52  ;;  %v5742_v8 = vadd.f32 %v5741_v7, %v5740_v35  ;;  %v5806_v50 = vadd.f32 %v5805_v1, %v5804_v29  ;;  %6423 = vmatprep.subr.bf16.mxu0 %v7093_v49  ;;  %v177_v52 = vld [vmem:[%s11798_s0 + $0x4e0] sm:$0xff] }
 0x192   :  { %3634 = vmatmul.mubr.bf16.gmra.mrb[184].mxu1 %v1039_v60  ;;  %3731 = vmatmul.mubr.bf16.gmra.mrb[184].mxu0 %v849_v40  ;;  %v1063_v39 = vpack.c.bf16 %v583_v11, %v559_v26  ;;  %v873_v62 = vpack.c.bf16 %v201_v32, %v177_v52  ;;  %v1088_v19 = vpack.c.bf16 %v632_v27, %v608_v25  ;;  %v249_v11 = vld [vmem:[%s11798_s0 + $0x720] sm:$0xff]  ;;  %v656_v52 = vld [vmem:[%s11798_s0 + $0x13d8] sm:$0xff] }
 0x193   :  { %v9124_v56 = vadd.f32 %v5742_v8, %v2874_v0  ;;  %v9127_v28 = vadd.f32 %v5806_v50, %v8770_v20  ;;  %3641 = vmatprep.mubr.bf16.mxu1 %v1064_v24  ;;  %3738 = vmatprep.mubr.bf16.mxu0 %v874_v4  ;;  %v250_v20 = vld [vmem:[%s11798_s0 + $0x728] sm:$0xff]  ;;  %v7100_v4 = vld [vmem:[%s11797_s1 + $0x430] sm:$0xff]   ;;  %v7101_v8 = vld [vmem:[%s11797_s1 + $0x478] sm:$0xff]  }
 0x194   :  { %6424 = vmatpush3.bf16.msra.mxu0 %v7095_v14  ;;  %v898_v35 = vpack.c.bf16 %v250_v20, %v226_v31  ;;  %v607_v50 = vld [vmem:[%s11798_s0 + $0x1250] sm:$0xff]  ;;  %v680_v32 = vld [vmem:[%s11798_s0 + $0x1498] sm:$0xff] }
 0x195   :  { %v5807_v5 = vpop.f32.mrb[80].mxu0  ;;  %v5871_v16 = vpop.f32.mrb[80].mxu1  ;;  %6425 = vmatprep.subr.bf16.mxu0 %v7097_v12  ;;  %v7102_v25 = vld [vmem:[%s11797_s1 + $0x438] sm:$0xff]  }
 0x196   :  { %v5808_v9 = vpop.f32.mrb[81].mxu0  ;;  %v5872_v49 = vpop.f32.mrb[81].mxu1 }
 0x197   :  { %v5809_v61 = vadd.f32 %v5808_v9, %v5807_v5  ;;  %v5873_v60 = vadd.f32 %v5872_v49, %v5871_v16  ;;  %v5810_v40 = vpop.f32.mrb[82].mxu0  ;;  %v5874_v17 = vpop.f32.mrb[82].mxu1 }
 0x198   :  { %v5811_v29 = vpop.f32.mrb[83].mxu0  ;;  %v5875_v24 = vpop.f32.mrb[83].mxu1  ;;  %6426 = vmatpush3.bf16.msra.mxu0 %v7098_v36 }
 0x199   :  { %v9154_v0 = vadd.f32 %v5809_v61, %v8800_v44  ;;  %v9157_v7 = vadd.f32 %v5873_v60, %v8803_v48  ;;  %v5812_v1 = vadd.f32 %v5811_v29, %v5810_v40  ;;  %v5876_v14 = vadd.f32 %v5875_v24, %v5874_v17  ;;  %6427 = vmatprep.subr.bf16.mxu0 %v7099_v53  ;;  %v631_v44 = vld [vmem:[%s11798_s0 + $0x1310] sm:$0xff]  ;;  %v225_v48 = vld [vmem:[%s11798_s0 + $0x660] sm:$0xff] }
 0x19a   :  { %3642 = vmatmul.mubr.bf16.gmra.mrb[188].mxu1 %v1063_v39  ;;  %3739 = vmatmul.mubr.bf16.gmra.mrb[188].mxu0 %v873_v62  ;;  %v1087_v5 = vpack.c.bf16 %v631_v44, %v607_v50  ;;  %v897_v16 = vpack.c.bf16 %v249_v11, %v225_v48  ;;  %v1112_v62 = vpack.c.bf16 %v680_v32, %v656_v52  ;;  %v655_v24 = vld [vmem:[%s11798_s0 + $0x13d0] sm:$0xff]  ;;  %v346_v50 = vld [vmem:[%s11798_s0 + $0xa28] sm:$0xff] }
 0x19b   :  { %v9172_v12 = vadd.f32 %v5812_v1, %v8817_v54  ;;  %v9175_v26 = vadd.f32 %v5876_v14, %v8820_v57  ;;  %3649 = vmatprep.mubr.bf16.mxu1 %v1088_v19  ;;  %3746 = vmatprep.mubr.bf16.mxu0 %v898_v35  ;;  %v274_v54 = vld [vmem:[%s11798_s0 + $0x7e8] sm:$0xff]  ;;  %v297_v14 = vld [vmem:[%s11798_s0 + $0x8a0] sm:$0xff] }
 0x19c   :  { %v298_v57 = vld [vmem:[%s11798_s0 + $0x8a8] sm:$0xff]  ;;  %6428 = vmatpush3.bf16.msra.mxu0 %v7100_v4  ;;  %v679_v4 = vld [vmem:[%s11798_s0 + $0x1490] sm:$0xff] }
 0x19d   :  { %v5813_v27 = vpop.f32.mrb[84].mxu0  ;;  %v5877_v31 = vpop.f32.mrb[84].mxu1  ;;  %6429 = vmatprep.subr.bf16.mxu0 %v7101_v8  ;;  %v922_v61 = vpack.c.bf16 %v298_v57, %v274_v54  ;;  %v704_v8 = vld [vmem:[%s11798_s0 + $0x1558] sm:$0xff]  ;;  %v1111_v32 = vpack.c.bf16 %v679_v4, %v655_v24 }
 0x19e   :  { %v5814_v20 = vpop.f32.mrb[85].mxu0  ;;  %v5878_v36 = vpop.f32.mrb[85].mxu1 }
 0x19f   :  { %v5815_v53 = vadd.f32 %v5814_v20, %v5813_v27  ;;  %v5879_v9 = vadd.f32 %v5878_v36, %v5877_v31  ;;  %v5816_v49 = vpop.f32.mrb[86].mxu0  ;;  %v5880_v39 = vpop.f32.mrb[86].mxu1 }
 0x1a0   :  { %v5817_v60 = vpop.f32.mrb[87].mxu0  ;;  %v5881_v40 = vpop.f32.mrb[87].mxu1  ;;  %6430 = vmatpush3.bf16.msra.mxu0 %v7102_v25 }
 0x1a1   :  { %v9196_v17 = vadd.f32 %v5815_v53, %v8847_v33  ;;  %v9199_v19 = vadd.f32 %v5879_v9, %v8850_v42  ;;  %v5818_v35 = vadd.f32 %v5817_v60, %v5816_v49  ;;  %v5882_v29 = vadd.f32 %v5881_v40, %v5880_v39  ;;  %v273_v42 = vld [vmem:[%s11798_s0 + $0x7e0] sm:$0xff] }
 0x1a2   :  { %3650 = vmatmul.mubr.bf16.gmra.mrb[192].mxu1 %v1087_v5  ;;  %3747 = vmatmul.mubr.bf16.gmra.mrb[192].mxu0 %v897_v16  ;;  %v921_v54 = vpack.c.bf16 %v297_v14, %v273_v42  ;;  %v345_v40 = vld [vmem:[%s11798_s0 + $0xa20] sm:$0xff] }
 0x1a3   :  { %v9208_v1 = vadd.f32 %v5818_v35, %v8861_v59  ;;  %v9211_v33 = vadd.f32 %v5882_v29, %v8864_v22  ;;  %3657 = vmatprep.mubr.bf16.mxu1 %v1112_v62  ;;  %3754 = vmatprep.mubr.bf16.mxu0 %v922_v61  ;;  %v728_v59 = vld [vmem:[%s11798_s0 + $0x1618] sm:$0xff]  ;;  %v322_v22 = vld [vmem:[%s11798_s0 + $0x968] sm:$0xff]  ;;  %v703_v62 = vld [vmem:[%s11798_s0 + $0x1550] sm:$0xff] }
 0x1a4   :  { %v1136_v20 = vpack.c.bf16 %v728_v59, %v704_v8  ;;  %v946_v36 = vpack.c.bf16 %v346_v50, %v322_v22  ;;  %v727_v61 = vld [vmem:[%s11798_s0 + $0x1610] sm:$0xff]  ;;  %v752_v35 = vld [vmem:[%s11798_s0 + $0x16d8] sm:$0xff]  ;;  %v394_v29 = vld [vmem:[%s11798_s0 + $0xba8] sm:$0xff] }
 0x1a5   :  { %v5819_v44 = vpop.f32.mrb[88].mxu0  ;;  %v5883_v48 = vpop.f32.mrb[88].mxu1  ;;  %v1135_v8 = vpack.c.bf16 %v727_v61, %v703_v62 }
 0x1a6   :  { %v5820_v11 = vpop.f32.mrb[89].mxu0  ;;  %v5884_v52 = vpop.f32.mrb[89].mxu1 }
 0x1a7   :  { %v5821_v57 = vadd.f32 %v5820_v11, %v5819_v44  ;;  %v5885_v25 = vadd.f32 %v5884_v52, %v5883_v48  ;;  %v5822_v27 = vpop.f32.mrb[90].mxu0  ;;  %v5886_v31 = vpop.f32.mrb[90].mxu1 }
 0x1a8   :  { %v5823_v5 = vpop.f32.mrb[91].mxu0  ;;  %v5887_v16 = vpop.f32.mrb[91].mxu1 }
 0x1a9   :  { %v9232_v53 = vadd.f32 %v5821_v57, %v8885_v38  ;;  %v9235_v9 = vadd.f32 %v5885_v25, %v8888_v51  ;;  %v5824_v49 = vadd.f32 %v5823_v5, %v5822_v27  ;;  %v5888_v39 = vadd.f32 %v5887_v16, %v5886_v31  ;;  %v321_v51 = vld [vmem:[%s11798_s0 + $0x960] sm:$0xff] }
 0x1aa   :  { %3658 = vmatmul.mubr.bf16.gmra.mrb[196].mxu1 %v1111_v32  ;;  %3755 = vmatmul.mubr.bf16.gmra.mrb[196].mxu0 %v921_v54  ;;  %v945_v59 = vpack.c.bf16 %v345_v40, %v321_v51  ;;  %v393_v16 = vld [vmem:[%s11798_s0 + $0xba0] sm:$0xff] }
 0x1ab   :  { %v9244_v60 = vadd.f32 %v5824_v49, %v8899_v43  ;;  %v9247_v38 = vadd.f32 %v5888_v39, %v8902_v10  ;;  %3665 = vmatprep.mubr.bf16.mxu1 %v1136_v20  ;;  %3762 = vmatprep.mubr.bf16.mxu0 %v946_v36  ;;  %v776_v43 = vld [vmem:[%s11798_s0 + $0x1798] sm:$0xff]  ;;  %v370_v10 = vld [vmem:[%s11798_s0 + $0xae8] sm:$0xff]  ;;  %v751_v20 = vld [vmem:[%s11798_s0 + $0x16d0] sm:$0xff] }
 0x1ac   :  { %v1160_v11 = vpack.c.bf16 %v776_v43, %v752_v35  ;;  %v970_v52 = vpack.c.bf16 %v394_v29, %v370_v10  ;;  %v775_v36 = vld [vmem:[%s11798_s0 + $0x1790] sm:$0xff]  ;;  %v418_v49 = vld [vmem:[%s11798_s0 + $0xc68] sm:$0xff]  ;;  %v60_v39 = vld [vmem:[%s11798_s0 + $0x138] sm:$0xff] }
 0x1ad   :  { %v5825_v24 = vpop.f32.mrb[92].mxu0  ;;  %v5889_v4 = vpop.f32.mrb[92].mxu1  ;;  %v1159_v35 = vpack.c.bf16 %v775_v36, %v751_v20  ;;  %v84_v20 = vld [vmem:[%s11798_s0 + $0x1f8] sm:$0xff] }
 0x1ae   :  { %v5826_v42 = vpop.f32.mrb[93].mxu0  ;;  %v5890_v14 = vpop.f32.mrb[93].mxu1  ;;  %v108_v36 = vld [vmem:[%s11798_s0 + $0x2b8] sm:$0xff] }
 0x1af   :  { %v5827_v22 = vadd.f32 %v5826_v42, %v5825_v24  ;;  %v5891_v50 = vadd.f32 %v5890_v14, %v5889_v4  ;;  %v5828_v44 = vpop.f32.mrb[94].mxu0  ;;  %v5892_v48 = vpop.f32.mrb[94].mxu1 }
 0x1b0   :  { %v5829_v32 = vpop.f32.mrb[95].mxu0  ;;  %v5893_v54 = vpop.f32.mrb[95].mxu1 }
 0x1b1   :  { %v9268_v57 = vadd.f32 %v5827_v22, %v8923_v55  ;;  %v9271_v25 = vadd.f32 %v5891_v50, %v8926_v41  ;;  %v5830_v27 = vadd.f32 %v5829_v32, %v5828_v44  ;;  %v5894_v31 = vadd.f32 %v5893_v54, %v5892_v48  ;;  %v369_v41 = vld [vmem:[%s11798_s0 + $0xae0] sm:$0xff]  ;;  %v59_v54 = vld [vmem:[%s11798_s0 + $0x130] sm:$0xff] }
 0x1b2   :  { %3666 = vmatmul.mubr.bf16.gmra.mrb[200].mxu1 %v1135_v8  ;;  %3763 = vmatmul.mubr.bf16.gmra.mrb[200].mxu0 %v945_v59  ;;  %v969_v43 = vpack.c.bf16 %v393_v16, %v369_v41 }
 0x1b3   :  { %v9280_v5 = vadd.f32 %v5830_v27, %v8934_v34  ;;  %v9283_v55 = vadd.f32 %v5894_v31, %v8937_v37  ;;  %3673 = vmatprep.mubr.bf16.mxu1 %v1160_v11  ;;  %3770 = vmatprep.mubr.bf16.mxu0 %v970_v52  ;;  %v442_v34 = vld [vmem:[%s11798_s0 + $0xd28] sm:$0xff]  ;;  %v36_v37 = vld [vmem:[%s11798_s0 + $0x78] sm:$0xff]  ;;  %v417_v11 = vld [vmem:[%s11798_s0 + $0xc60] sm:$0xff] }
 0x1b4   :  { %v994_v42 = vpack.c.bf16 %v442_v34, %v418_v49  ;;  %v804_v14 = vpack.c.bf16 %v60_v39, %v36_v37 }
 0x1b5   :  { %v5831_v62 = vpop.f32.mrb[96].mxu0  ;;  %v5895_v61 = vpop.f32.mrb[96].mxu1 }
 0x1b6   :  { %v5832_v51 = vpop.f32.mrb[97].mxu0  ;;  %v5896_v40 = vpop.f32.mrb[97].mxu1 }
 0x1b7   :  { %v5833_v10 = vadd.f32 %v5832_v51, %v5831_v62  ;;  %v5897_v29 = vadd.f32 %v5896_v40, %v5895_v61  ;;  %v5834_v24 = vpop.f32.mrb[98].mxu0  ;;  %v5898_v4 = vpop.f32.mrb[98].mxu1  ;;  %v7082_v51 = vld [vmem:[%s11797_s1 + $0x480] sm:$0xff]  }
 0x1b8   :  { %v5835_v8 = vpop.f32.mrb[99].mxu0  ;;  %v5899_v59 = vpop.f32.mrb[99].mxu1 }
 0x1b9   :  { %v9304_v22 = vadd.f32 %v5833_v10, %v8966_v63  ;;  %v9307_v50 = vadd.f32 %v5897_v29, %v8969_v15  ;;  %v5836_v44 = vadd.f32 %v5835_v8, %v5834_v24  ;;  %v5900_v48 = vadd.f32 %v5899_v59, %v5898_v4  ;;  %v441_v63 = vld [vmem:[%s11798_s0 + $0xd20] sm:$0xff]  ;;  %v35_v15 = vld [vmem:[%s11798_s0 + $0x70] sm:$0xff]  ;;  %v7085_v29 = vld [vmem:[%s11797_s1 + $0x4c8] sm:$0xff]  }
 0x1ba   :  { %3674 = vmatmul.mubr.bf16.gmra.mrb[204].mxu1 %v1159_v35  ;;  %3771 = vmatmul.mubr.bf16.gmra.mrb[204].mxu0 %v969_v43  ;;  %v993_v49 = vpack.c.bf16 %v441_v63, %v417_v11  ;;  %v803_v34 = vpack.c.bf16 %v59_v54, %v35_v15  ;;  %v828_v10 = vpack.c.bf16 %v108_v36, %v84_v20  ;;  %v465_v8 = vld [vmem:[%s11798_s0 + $0xde0] sm:$0xff]  ;;  %v538_v63 = vld [vmem:[%s11798_s0 + $0x1028] sm:$0xff] }
 0x1bb   :  { %v9313_v52 = vadd.f32 %v5836_v44, %v8977_v2  ;;  %v9316_v32 = vadd.f32 %v5900_v48, %v8980_v30  ;;  %3778 = vmatprep.mubr.bf16.mxu0 %v994_v42  ;;  %3875 = vmatprep.mubr.bf16.mxu1 %v804_v14  ;;  %v466_v2 = vld [vmem:[%s11798_s0 + $0xde8] sm:$0xff]  ;;  %v489_v59 = vld [vmem:[%s11798_s0 + $0xea0] sm:$0xff] }
 0x1bc   :  { %v490_v30 = vld [vmem:[%s11798_s0 + $0xea8] sm:$0xff]  ;;  %v7111_v54 = vld [vmem:[%s11797_s1 + $0x540] sm:$0xff]   ;;  %v1017_v36 = vpack.c.bf16 %v489_v59, %v465_v8 }
 0x1bd   :  { %v5837_v27 = vpop.f32.mrb[100].mxu0  ;;  %v5901_v31 = vpop.f32.mrb[100].mxu1  ;;  %v1018_v40 = vpack.c.bf16 %v490_v30, %v466_v2  ;;  %v514_v44 = vld [vmem:[%s11798_s0 + $0xf68] sm:$0xff]  ;;  %v7089_v2 = vld [vmem:[%s11797_s1 + $0x4d0] sm:$0xff]   ;;  %6639 = vmatprep.subr.bf16.mxu0 %v7111_v54 }
 0x1be   :  { %v5838_v41 = vpop.f32.mrb[101].mxu0  ;;  %v5902_v16 = vpop.f32.mrb[101].mxu1  ;;  %v7086_v15 = vld [vmem:[%s11797_s1 + $0x488] sm:$0xff]  }
 0x1bf   :  { %v5839_v37 = vadd.f32 %v5838_v41, %v5837_v27  ;;  %v5903_v39 = vadd.f32 %v5902_v16, %v5901_v31  ;;  %v5840_v62 = vpop.f32.mrb[102].mxu0  ;;  %v5904_v61 = vpop.f32.mrb[102].mxu1 }
 0x1c0   :  { %v5841_v35 = vpop.f32.mrb[103].mxu0  ;;  %v5905_v43 = vpop.f32.mrb[103].mxu1 }
 0x1c1   :  { %v9346_v24 = vadd.f32 %v5839_v37, %v9007_v18  ;;  %v9349_v4 = vadd.f32 %v5903_v39, %v9010_v13  ;;  %v5842_v42 = vadd.f32 %v5841_v35, %v5840_v62  ;;  %v5906_v14 = vadd.f32 %v5905_v43, %v5904_v61  ;;  %v83_v18 = vld [vmem:[%s11798_s0 + $0x1f0] sm:$0xff] }
 0x1c2   :  { %3779 = vmatmul.mubr.bf16.gmra.mrb[208].mxu0 %v993_v49  ;;  %3876 = vmatmul.mubr.bf16.vlgmr.msra.gmra.mrb[208].mxu1 %v803_v34  ;;  %v107_v13 = vld [vmem:[%s11798_s0 + $0x2b0] sm:$0xff]  ;;  %v1042_v39 = vpack.c.bf16 %v538_v63, %v514_v44  ;;  %v586_v44 = vld [vmem:[%s11798_s0 + $0x11a8] sm:$0xff]  ;;  %v7096_v63 = vld [vmem:[%s11797_s1 + $0x498] sm:$0xff]  }
 0x1c3   :  { %v9367_v48 = vadd.f32 %v5842_v42, %v9024_v21  ;;  %v9370_v11 = vadd.f32 %v5906_v14, %v9027_v23  ;;  %6528 = vmatpush3.bf16.msra.mxu1 %v7082_v51  ;;  %3786 = vmatprep.mubr.bf16.mxu0 %v1018_v40  ;;  %v132_v21 = vld [vmem:[%s11798_s0 + $0x378] sm:$0xff]  ;;  %v827_v41 = vpack.c.bf16 %v107_v13, %v83_v18  ;;  %v7090_v40 = vld [vmem:[%s11797_s1 + $0x490] sm:$0xff]   ;;  %v513_v14 = vld [vmem:[%s11798_s0 + $0xf60] sm:$0xff] }
 0x1c4   :  { %3883 = vmatprep.mubr.bf16.mxu1 %v828_v10  ;;  %v156_v23 = vld [vmem:[%s11798_s0 + $0x438] sm:$0xff]  ;;  %6529 = vmatprep.subr.bf16.mxu1 %v7085_v29  ;;  %v155_v18 = vld [vmem:[%s11798_s0 + $0x430] sm:$0xff]  ;;  %v562_v13 = vld [vmem:[%s11798_s0 + $0x10e8] sm:$0xff] }
 0x1c5   :  { %v5843_v30 = vpop.f32.mrb[104].mxu0  ;;  %v5907_v27 = vpop.f32.mrb[104].mxu1  ;;  %v852_v62 = vpack.c.bf16 %v156_v23, %v132_v21  ;;  %v7094_v42 = vld [vmem:[%s11797_s1 + $0x4d8] sm:$0xff]   ;;  %v7103_v21 = vld [vmem:[%s11797_s1 + $0x4e0] sm:$0xff]  }
 0x1c6   :  { %v5844_v31 = vpop.f32.mrb[105].mxu0  ;;  %v5908_v20 = vpop.f32.mrb[105].mxu1 }
 0x1c7   :  { %v5845_v16 = vadd.f32 %v5844_v31, %v5843_v30  ;;  %v5909_v49 = vadd.f32 %v5908_v20, %v5907_v27  ;;  %v5846_v34 = vpop.f32.mrb[106].mxu0  ;;  %v5910_v37 = vpop.f32.mrb[106].mxu1  ;;  %6530 = vmatpush3.bf16.msra.mxu1 %v7086_v15 }
 0x1c8   :  { %v5847_v61 = vpop.f32.mrb[107].mxu0  ;;  %v5911_v51 = vpop.f32.mrb[107].mxu1  ;;  %6531 = vmatprep.subr.bf16.mxu1 %v7089_v2 }
 0x1c9   :  { %v9394_v35 = vadd.f32 %v5845_v16, %v9057_v3  ;;  %v9397_v43 = vadd.f32 %v5909_v49, %v9060_v45  ;;  %v5848_v10 = vadd.f32 %v5847_v61, %v5846_v34  ;;  %v5912_v29 = vadd.f32 %v5911_v51, %v5910_v37  ;;  %v537_v3 = vld [vmem:[%s11798_s0 + $0x1020] sm:$0xff]  ;;  %v131_v45 = vld [vmem:[%s11798_s0 + $0x370] sm:$0xff] }
 0x1ca   :  { %3787 = vmatmul.mubr.bf16.gmra.mrb[212].mxu0 %v1017_v36  ;;  %3884 = vmatmul.mubr.bf16.gmra.mrb[212].mxu1 %v827_v41  ;;  %v1041_v30 = vpack.c.bf16 %v537_v3, %v513_v14  ;;  %v851_v27 = vpack.c.bf16 %v155_v18, %v131_v45  ;;  %v1066_v16 = vpack.c.bf16 %v586_v44, %v562_v13  ;;  %v203_v3 = vld [vmem:[%s11798_s0 + $0x5b0] sm:$0xff]  ;;  %v610_v45 = vld [vmem:[%s11798_s0 + $0x1268] sm:$0xff] }
 0x1cb   :  { %v9412_v8 = vadd.f32 %v5848_v10, %v9074_v58  ;;  %v9415_v59 = vadd.f32 %v5912_v29, %v9077_v6  ;;  %3794 = vmatprep.mubr.bf16.mxu0 %v1042_v39  ;;  %3891 = vmatprep.mubr.bf16.mxu1 %v852_v62  ;;  %v180_v58 = vld [vmem:[%s11798_s0 + $0x4f8] sm:$0xff]  ;;  %v7104_v39 = vld [vmem:[%s11797_s1 + $0x4a0] sm:$0xff]   ;;  %v7105_v10 = vld [vmem:[%s11797_s1 + $0x4e8] sm:$0xff]  }
 0x1cc   :  { %v204_v6 = vld [vmem:[%s11798_s0 + $0x5b8] sm:$0xff]  ;;  %6532 = vmatpush3.bf16.msra.mxu1 %v7090_v40  ;;  %v561_v29 = vld [vmem:[%s11798_s0 + $0x10e0] sm:$0xff]  ;;  %v634_v18 = vld [vmem:[%s11798_s0 + $0x1328] sm:$0xff] }
 0x1cd   :  { %v5849_v15 = vpop.f32.mrb[108].mxu0  ;;  %v5913_v54 = vpop.f32.mrb[108].mxu1  ;;  %6533 = vmatprep.subr.bf16.mxu1 %v7094_v42  ;;  %v876_v49 = vpack.c.bf16 %v204_v6, %v180_v58  ;;  %v7106_v13 = vld [vmem:[%s11797_s1 + $0x4a8] sm:$0xff]   ;;  %v7107_v6 = vld [vmem:[%s11797_s1 + $0x4f0] sm:$0xff]  }
 0x1ce   :  { %v5850_v23 = vpop.f32.mrb[109].mxu0  ;;  %v5914_v2 = vpop.f32.mrb[109].mxu1 }
 0x1cf   :  { %v5851_v31 = vadd.f32 %v5850_v23, %v5849_v15  ;;  %v5915_v20 = vadd.f32 %v5914_v2, %v5913_v54  ;;  %v5852_v36 = vpop.f32.mrb[110].mxu0  ;;  %v5916_v41 = vpop.f32.mrb[110].mxu1 }
 0x1d0   :  { %v5853_v34 = vpop.f32.mrb[111].mxu0  ;;  %v5917_v37 = vpop.f32.mrb[111].mxu1  ;;  %6534 = vmatpush3.bf16.msra.mxu1 %v7096_v63 }
 0x1d1   :  { %v9442_v62 = vadd.f32 %v5851_v31, %v9107_v47  ;;  %v9445_v61 = vadd.f32 %v5915_v20, %v9110_v46  ;;  %v5854_v51 = vadd.f32 %v5853_v34, %v5852_v36  ;;  %v5918_v40 = vadd.f32 %v5917_v37, %v5916_v41  ;;  %6535 = vmatprep.subr.bf16.mxu1 %v7103_v21  ;;  %v585_v47 = vld [vmem:[%s11798_s0 + $0x11a0] sm:$0xff]  ;;  %v179_v46 = vld [vmem:[%s11798_s0 + $0x4f0] sm:$0xff] }
 0x1d2   :  { %3795 = vmatmul.mubr.bf16.gmra.mrb[216].mxu0 %v1041_v30  ;;  %3892 = vmatmul.mubr.bf16.gmra.mrb[216].mxu1 %v851_v27  ;;  %v1065_v54 = vpack.c.bf16 %v585_v47, %v561_v29  ;;  %v875_v21 = vpack.c.bf16 %v203_v3, %v179_v46  ;;  %v1090_v31 = vpack.c.bf16 %v634_v18, %v610_v45  ;;  %v658_v29 = vld [vmem:[%s11798_s0 + $0x13e8] sm:$0xff]  ;;  %v276_v45 = vld [vmem:[%s11798_s0 + $0x7f8] sm:$0xff] }
 0x1d3   :  { %v9460_v42 = vadd.f32 %v5854_v51, %v9124_v56  ;;  %v9463_v14 = vadd.f32 %v5918_v40, %v9127_v28  ;;  %3802 = vmatprep.mubr.bf16.mxu0 %v1066_v16  ;;  %3899 = vmatprep.mubr.bf16.mxu1 %v876_v49  ;;  %v228_v56 = vld [vmem:[%s11798_s0 + $0x678] sm:$0xff]  ;;  %v7108_v16 = vld [vmem:[%s11797_s1 + $0x4b0] sm:$0xff]   ;;  %v609_v40 = vld [vmem:[%s11798_s0 + $0x1260] sm:$0xff] }
 0x1d4   :  { %v252_v28 = vld [vmem:[%s11798_s0 + $0x738] sm:$0xff]  ;;  %6536 = vmatpush3.bf16.msra.mxu1 %v7104_v39  ;;  %v682_v47 = vld [vmem:[%s11798_s0 + $0x14a8] sm:$0xff] }
 0x1d5   :  { %v5919_v44 = vpop.f32.mrb[112].mxu1  ;;  %v5983_v58 = vpop.f32.mrb[112].mxu0  ;;  %6537 = vmatprep.subr.bf16.mxu1 %v7105_v10  ;;  %v900_v20 = vpack.c.bf16 %v252_v28, %v228_v56  ;;  %v7109_v51 = vld [vmem:[%s11797_s1 + $0x4f8] sm:$0xff]   ;;  %v633_v10 = vld [vmem:[%s11798_s0 + $0x1320] sm:$0xff] }
 0x1d6   :  { %v5920_v63 = vpop.f32.mrb[113].mxu1  ;;  %v5984_v15 = vpop.f32.mrb[113].mxu0  ;;  %v300_v18 = vld [vmem:[%s11798_s0 + $0x8b8] sm:$0xff] }
 0x1d7   :  { %v5921_v23 = vadd.f32 %v5920_v63, %v5919_v44  ;;  %v5985_v2 = vadd.f32 %v5984_v15, %v5983_v58  ;;  %v5922_v30 = vpop.f32.mrb[114].mxu1  ;;  %v5986_v27 = vpop.f32.mrb[114].mxu0  ;;  %v7110_v56 = vld [vmem:[%s11797_s1 + $0x4b8] sm:$0xff]   ;;  %v1089_v58 = vpack.c.bf16 %v633_v10, %v609_v40  ;;  %v730_v10 = vld [vmem:[%s11798_s0 + $0x1628] sm:$0xff] }
 0x1d8   :  { %v5923_v36 = vpop.f32.mrb[115].mxu1  ;;  %v5987_v41 = vpop.f32.mrb[115].mxu0  ;;  %6538 = vmatpush3.bf16.msra.mxu1 %v7106_v13 }
 0x1d9   :  { %v5924_v49 = vadd.f32 %v5923_v36, %v5922_v30  ;;  %v5988_v34 = vadd.f32 %v5987_v41, %v5986_v27  ;;  %v9490_v37 = vadd.f32 %v5921_v23, %v9154_v0  ;;  %v9493_v39 = vadd.f32 %v5985_v2, %v9157_v7  ;;  %6539 = vmatprep.subr.bf16.mxu1 %v7107_v6  ;;  %v227_v0 = vld [vmem:[%s11798_s0 + $0x670] sm:$0xff] }
 0x1da   :  { %3803 = vmatmul.mubr.bf16.gmra.mrb[220].mxu0 %v1065_v54  ;;  %3900 = vmatmul.mubr.bf16.gmra.mrb[220].mxu1 %v875_v21  ;;  %v251_v7 = vld [vmem:[%s11798_s0 + $0x730] sm:$0xff]  ;;  %v1114_v23 = vpack.c.bf16 %v682_v47, %v658_v29  ;;  %v924_v2 = vpack.c.bf16 %v300_v18, %v276_v45 }
 0x1db   :  { %3810 = vmatprep.mubr.bf16.mxu0 %v1090_v31  ;;  %3907 = vmatprep.mubr.bf16.mxu1 %v900_v20  ;;  %v9517_v46 = vadd.f32 %v5924_v49, %v9172_v12  ;;  %v9520_v3 = vadd.f32 %v5988_v34, %v9175_v26  ;;  %v7113_v12 = vld [vmem:[%s11797_s1 + $0x5c0] sm:$0xff]   ;;  %v899_v6 = vpack.c.bf16 %v251_v7, %v227_v0  ;;  %v706_v34 = vld [vmem:[%s11798_s0 + $0x1568] sm:$0xff]  ;;  %v324_v0 = vld [vmem:[%s11798_s0 + $0x978] sm:$0xff] }
 0x1dc   :  { %6540 = vmatpush3.bf16.msra.mxu1 %v7108_v16  ;;  %v657_v16 = vld [vmem:[%s11798_s0 + $0x13e0] sm:$0xff]  ;;  %v348_v7 = vld [vmem:[%s11798_s0 + $0xa38] sm:$0xff] }
 0x1dd   :  { %v5925_v28 = vpop.f32.mrb[116].mxu1  ;;  %v5989_v13 = vpop.f32.mrb[116].mxu0  ;;  %6541 = vmatprep.subr.bf16.mxu1 %v7109_v51  ;;  %v681_v49 = vld [vmem:[%s11798_s0 + $0x14a0] sm:$0xff] }
 0x1de   :  { %v5926_v26 = vpop.f32.mrb[117].mxu1  ;;  %v5990_v44 = vpop.f32.mrb[117].mxu0  ;;  %v1113_v18 = vpack.c.bf16 %v681_v49, %v657_v16  ;;  %v372_v16 = vld [vmem:[%s11798_s0 + $0xaf8] sm:$0xff] }
 0x1df   :  { %v5927_v63 = vadd.f32 %v5926_v26, %v5925_v28  ;;  %v5991_v15 = vadd.f32 %v5990_v44, %v5989_v13  ;;  %v5928_v54 = vpop.f32.mrb[118].mxu1  ;;  %v5992_v21 = vpop.f32.mrb[118].mxu0  ;;  %v1138_v26 = vpack.c.bf16 %v730_v10, %v706_v34  ;;  %v948_v44 = vpack.c.bf16 %v348_v7, %v324_v0  ;;  %v396_v49 = vld [vmem:[%s11798_s0 + $0xbb8] sm:$0xff] }
 0x1e0   :  { %v5929_v30 = vpop.f32.mrb[119].mxu1  ;;  %v5993_v27 = vpop.f32.mrb[119].mxu0  ;;  %6542 = vmatpush3.bf16.msra.mxu1 %v7110_v56 }
 0x1e1   :  { %v5930_v31 = vadd.f32 %v5929_v30, %v5928_v54  ;;  %v5994_v20 = vadd.f32 %v5993_v27, %v5992_v21  ;;  %v9535_v36 = vadd.f32 %v5927_v63, %v9196_v17  ;;  %v9538_v41 = vadd.f32 %v5991_v15, %v9199_v19  ;;  %6751 = vmatprep.subr.bf16.mxu1 %v7113_v12  ;;  %v275_v17 = vld [vmem:[%s11798_s0 + $0x7f0] sm:$0xff]  ;;  %v754_v30 = vld [vmem:[%s11798_s0 + $0x16e8] sm:$0xff] }
 0x1e2   :  { %3811 = vmatmul.mubr.bf16.gmra.mrb[224].mxu0 %v1089_v58  ;;  %3908 = vmatmul.mubr.bf16.gmra.mrb[224].mxu1 %v899_v6  ;;  %v299_v19 = vld [vmem:[%s11798_s0 + $0x8b0] sm:$0xff] }
 0x1e3   :  { %3818 = vmatprep.mubr.bf16.mxu0 %v1114_v23  ;;  %3915 = vmatprep.mubr.bf16.mxu1 %v924_v2  ;;  %v9556_v51 = vadd.f32 %v5930_v31, %v9208_v1  ;;  %v9559_v40 = vadd.f32 %v5994_v20, %v9211_v33  ;;  %v923_v56 = vpack.c.bf16 %v299_v19, %v275_v17  ;;  %v705_v23 = vld [vmem:[%s11798_s0 + $0x1560] sm:$0xff]  ;;  %v778_v20 = vld [vmem:[%s11798_s0 + $0x17a8] sm:$0xff] }
 0x1e4   :  { %v729_v2 = vld [vmem:[%s11798_s0 + $0x1620] sm:$0xff] }
 0x1e5   :  { %v5931_v29 = vpop.f32.mrb[120].mxu1  ;;  %v5995_v47 = vpop.f32.mrb[120].mxu0  ;;  %v1137_v10 = vpack.c.bf16 %v729_v2, %v705_v23  ;;  %v38_v23 = vld [vmem:[%s11798_s0 + $0x88] sm:$0xff] }
 0x1e6   :  { %v5932_v45 = vpop.f32.mrb[121].mxu1  ;;  %v5996_v1 = vpop.f32.mrb[121].mxu0  ;;  %v62_v2 = vld [vmem:[%s11798_s0 + $0x148] sm:$0xff] }
 0x1e7   :  { %v5933_v33 = vadd.f32 %v5932_v45, %v5931_v29  ;;  %v5997_v28 = vadd.f32 %v5996_v1, %v5995_v47  ;;  %v5934_v13 = vpop.f32.mrb[122].mxu1  ;;  %v5998_v12 = vpop.f32.mrb[122].mxu0  ;;  %v1162_v45 = vpack.c.bf16 %v778_v20, %v754_v30  ;;  %v972_v1 = vpack.c.bf16 %v396_v49, %v372_v16 }
 0x1e8   :  { %v5935_v58 = vpop.f32.mrb[123].mxu1  ;;  %v5999_v6 = vpop.f32.mrb[123].mxu0 }
 0x1e9   :  { %v5936_v63 = vadd.f32 %v5935_v58, %v5934_v13  ;;  %v6000_v15 = vadd.f32 %v5999_v6, %v5998_v12  ;;  %v9571_v54 = vadd.f32 %v5933_v33, %v9232_v53  ;;  %v9574_v21 = vadd.f32 %v5997_v28, %v9235_v9  ;;  %v323_v53 = vld [vmem:[%s11798_s0 + $0x970] sm:$0xff]  ;;  %v420_v58 = vld [vmem:[%s11798_s0 + $0xc78] sm:$0xff] }
 0x1ea   :  { %3819 = vmatmul.mubr.bf16.gmra.mrb[228].mxu0 %v1113_v18  ;;  %3916 = vmatmul.mubr.bf16.gmra.mrb[228].mxu1 %v923_v56  ;;  %v347_v9 = vld [vmem:[%s11798_s0 + $0xa30] sm:$0xff] }
 0x1eb   :  { %3826 = vmatprep.mubr.bf16.mxu0 %v1138_v26  ;;  %3923 = vmatprep.mubr.bf16.mxu1 %v948_v44  ;;  %v9592_v27 = vadd.f32 %v5936_v63, %v9244_v60  ;;  %v9595_v31 = vadd.f32 %v6000_v15, %v9247_v38  ;;  %v947_v0 = vpack.c.bf16 %v347_v9, %v323_v53  ;;  %v753_v26 = vld [vmem:[%s11798_s0 + $0x16e0] sm:$0xff]  ;;  %v444_v15 = vld [vmem:[%s11798_s0 + $0xd38] sm:$0xff] }
 0x1ec   :  { %v777_v44 = vld [vmem:[%s11798_s0 + $0x17a0] sm:$0xff] }
 0x1ed   :  { %v5937_v17 = vpop.f32.mrb[124].mxu1  ;;  %v6001_v19 = vpop.f32.mrb[124].mxu0  ;;  %v1161_v20 = vpack.c.bf16 %v777_v44, %v753_v26  ;;  %v86_v26 = vld [vmem:[%s11798_s0 + $0x208] sm:$0xff] }
 0x1ee   :  { %v5938_v34 = vpop.f32.mrb[125].mxu1  ;;  %v6002_v60 = vpop.f32.mrb[125].mxu0  ;;  %v110_v44 = vld [vmem:[%s11798_s0 + $0x2c8] sm:$0xff] }
 0x1ef   :  { %v5939_v38 = vadd.f32 %v5938_v34, %v5937_v17  ;;  %v6003_v7 = vadd.f32 %v6002_v60, %v6001_v19  ;;  %v5940_v29 = vpop.f32.mrb[126].mxu1  ;;  %v6004_v47 = vpop.f32.mrb[126].mxu0  ;;  %v996_v34 = vpack.c.bf16 %v444_v15, %v420_v58  ;;  %v806_v60 = vpack.c.bf16 %v62_v2, %v38_v23 }
 0x1f0   :  { %v5941_v18 = vpop.f32.mrb[127].mxu1  ;;  %v6005_v56 = vpop.f32.mrb[127].mxu0 }
 0x1f1   :  { %v5942_v33 = vadd.f32 %v5941_v18, %v5940_v29  ;;  %v6006_v28 = vadd.f32 %v6005_v56, %v6004_v47  ;;  %v9607_v13 = vadd.f32 %v5939_v38, %v9268_v57  ;;  %v9610_v12 = vadd.f32 %v6003_v7, %v9271_v25  ;;  %v371_v57 = vld [vmem:[%s11798_s0 + $0xaf0] sm:$0xff]  ;;  %v468_v18 = vld [vmem:[%s11798_s0 + $0xdf8] sm:$0xff] }
 0x1f2   :  { %3827 = vmatmul.mubr.bf16.gmra.mrb[232].mxu0 %v1137_v10  ;;  %3924 = vmatmul.mubr.bf16.gmra.mrb[232].mxu1 %v947_v0  ;;  %v395_v25 = vld [vmem:[%s11798_s0 + $0xbb0] sm:$0xff] }
 0x1f3   :  { %3834 = vmatprep.mubr.bf16.mxu0 %v1162_v45  ;;  %3931 = vmatprep.mubr.bf16.mxu1 %v972_v1  ;;  %v9628_v6 = vadd.f32 %v5942_v33, %v9280_v5  ;;  %v9631_v63 = vadd.f32 %v6006_v28, %v9283_v55  ;;  %v971_v16 = vpack.c.bf16 %v395_v25, %v371_v57  ;;  %v419_v45 = vld [vmem:[%s11798_s0 + $0xc70] sm:$0xff]  ;;  %v492_v28 = vld [vmem:[%s11798_s0 + $0xeb8] sm:$0xff] }
 0x1f4   :  { %v443_v1 = vld [vmem:[%s11798_s0 + $0xd30] sm:$0xff] }
 0x1f5   :  { %v5943_v53 = vpop.f32.mrb[128].mxu1  ;;  %v6007_v9 = vpop.f32.mrb[128].mxu0  ;;  %v995_v15 = vpack.c.bf16 %v443_v1, %v419_v45 }
 0x1f6   :  { %v5944_v30 = vpop.f32.mrb[129].mxu1  ;;  %v6008_v5 = vpop.f32.mrb[129].mxu0 }
 0x1f7   :  { %v5945_v55 = vadd.f32 %v5944_v30, %v5943_v53  ;;  %v6009_v49 = vadd.f32 %v6008_v5, %v6007_v9  ;;  %v5946_v17 = vpop.f32.mrb[130].mxu1  ;;  %v6010_v19 = vpop.f32.mrb[130].mxu0  ;;  %v1020_v30 = vpack.c.bf16 %v492_v28, %v468_v18  ;;  %v830_v5 = vpack.c.bf16 %v110_v44, %v86_v26  ;;  %v7116_v18 = vld [vmem:[%s11797_s1 + $0x508] sm:$0xff]  }
 0x1f8   :  { %v5947_v10 = vpop.f32.mrb[131].mxu1  ;;  %v6011_v0 = vpop.f32.mrb[131].mxu0 }
 0x1f9   :  { %v5948_v38 = vadd.f32 %v5947_v10, %v5946_v17  ;;  %v6012_v7 = vadd.f32 %v6011_v0, %v6010_v19  ;;  %v9643_v29 = vadd.f32 %v5945_v55, %v9304_v22  ;;  %v9646_v47 = vadd.f32 %v6009_v49, %v9307_v50  ;;  %v37_v22 = vld [vmem:[%s11798_s0 + $0x80] sm:$0xff]  ;;  %v467_v10 = vld [vmem:[%s11798_s0 + $0xdf0] sm:$0xff] }
 0x1fa   :  { %3835 = vmatmul.mubr.bf16.gmra.mrb[236].mxu0 %v1161_v20  ;;  %3932 = vmatmul.mubr.bf16.gmra.mrb[236].mxu1 %v971_v16  ;;  %v61_v50 = vld [vmem:[%s11798_s0 + $0x140] sm:$0xff]  ;;  %v491_v0 = vld [vmem:[%s11798_s0 + $0xeb0] sm:$0xff] }
 0x1fb   :  { %3939 = vmatprep.mubr.bf16.mxu1 %v996_v34  ;;  %4036 = vmatprep.mubr.bf16.mxu0 %v806_v60  ;;  %v9664_v56 = vadd.f32 %v5948_v38, %v9313_v52  ;;  %v9667_v33 = vadd.f32 %v6012_v7, %v9316_v32  ;;  %v805_v23 = vpack.c.bf16 %v61_v50, %v37_v22  ;;  %v7112_v55 = vld [vmem:[%s11797_s1 + $0x500] sm:$0xff]   ;;  %v7115_v60 = vld [vmem:[%s11797_s1 + $0x548] sm:$0xff]   ;;  %v516_v38 = vld [vmem:[%s11798_s0 + $0xf78] sm:$0xff] }
 0x1fc   :  { %v540_v7 = vld [vmem:[%s11798_s0 + $0x1038] sm:$0xff]  ;;  %v134_v22 = vld [vmem:[%s11798_s0 + $0x388] sm:$0xff] }
 0x1fd   :  { %v5949_v57 = vpop.f32.mrb[132].mxu1  ;;  %v6013_v25 = vpop.f32.mrb[132].mxu0  ;;  %v158_v50 = vld [vmem:[%s11798_s0 + $0x448] sm:$0xff] }
 0x1fe   :  { %v5950_v58 = vpop.f32.mrb[133].mxu1  ;;  %v6014_v52 = vpop.f32.mrb[133].mxu0 }
 0x1ff   :  { %v5951_v32 = vadd.f32 %v5950_v58, %v5949_v57  ;;  %v6015_v2 = vadd.f32 %v6014_v52, %v6013_v25  ;;  %v5952_v53 = vpop.f32.mrb[134].mxu1  ;;  %v6016_v9 = vpop.f32.mrb[134].mxu0  ;;  %v1019_v57 = vpack.c.bf16 %v491_v0, %v467_v10  ;;  %v564_v10 = vld [vmem:[%s11798_s0 + $0x10f8] sm:$0xff] }
 0x200   :  { %v5953_v20 = vpop.f32.mrb[135].mxu1  ;;  %v6017_v16 = vpop.f32.mrb[135].mxu0  ;;  %v588_v0 = vld [vmem:[%s11798_s0 + $0x11b8] sm:$0xff] }
 0x201   :  { %v5954_v49 = vadd.f32 %v5953_v20, %v5952_v53  ;;  %v6018_v17 = vadd.f32 %v6017_v16, %v6016_v9  ;;  %v9682_v19 = vadd.f32 %v5951_v32, %v9346_v24  ;;  %v9685_v34 = vadd.f32 %v6015_v2, %v9349_v4  ;;  %v85_v24 = vld [vmem:[%s11798_s0 + $0x200] sm:$0xff] }
 0x202   :  { %3940 = vmatmul.mubr.bf16.gmra.mrb[240].mxu1 %v995_v15  ;;  %4037 = vmatmul.mubr.bf16.vlgmr.msra.gmra.mrb[240].mxu0 %v805_v23  ;;  %v109_v4 = vld [vmem:[%s11798_s0 + $0x2c0] sm:$0xff]  ;;  %v1044_v32 = vpack.c.bf16 %v540_v7, %v516_v38  ;;  %v854_v2 = vpack.c.bf16 %v158_v50, %v134_v22  ;;  %v182_v38 = vld [vmem:[%s11798_s0 + $0x508] sm:$0xff]  ;;  %v7124_v22 = vld [vmem:[%s11797_s1 + $0x518] sm:$0xff]  }
 0x203   :  { %3947 = vmatprep.mubr.bf16.mxu1 %v1020_v30  ;;  %4044 = vmatprep.mubr.bf16.mxu0 %v830_v5  ;;  %v9709_v45 = vadd.f32 %v5954_v49, %v9367_v48  ;;  %v9712_v1 = vadd.f32 %v6018_v17, %v9370_v11  ;;  %v7119_v48 = vld [vmem:[%s11797_s1 + $0x550] sm:$0xff]   ;;  %v829_v25 = vpack.c.bf16 %v109_v4, %v85_v24  ;;  %v7123_v49 = vld [vmem:[%s11797_s1 + $0x558] sm:$0xff]   ;;  %v206_v7 = vld [vmem:[%s11798_s0 + $0x5c8] sm:$0xff] }
 0x204   :  { %6640 = vmatpush3.bf16.msra.mxu0 %v7112_v55  ;;  %v7120_v30 = vld [vmem:[%s11797_s1 + $0x510] sm:$0xff]  }
 0x205   :  { %v5955_v28 = vpop.f32.mrb[136].mxu1  ;;  %v6019_v26 = vpop.f32.mrb[136].mxu0  ;;  %6641 = vmatprep.subr.bf16.mxu0 %v7115_v60  ;;  %v515_v17 = vld [vmem:[%s11798_s0 + $0xf70] sm:$0xff] }
 0x206   :  { %v5956_v11 = vpop.f32.mrb[137].mxu1  ;;  %v6020_v44 = vpop.f32.mrb[137].mxu0  ;;  %v539_v60 = vld [vmem:[%s11798_s0 + $0x1030] sm:$0xff] }
 0x207   :  { %v5957_v58 = vadd.f32 %v5956_v11, %v5955_v28  ;;  %v6021_v52 = vadd.f32 %v6020_v44, %v6019_v26  ;;  %v5958_v15 = vpop.f32.mrb[138].mxu1  ;;  %v6022_v23 = vpop.f32.mrb[138].mxu0  ;;  %v1043_v26 = vpack.c.bf16 %v539_v60, %v515_v17  ;;  %v612_v17 = vld [vmem:[%s11798_s0 + $0x1278] sm:$0xff] }
 0x208   :  { %v5959_v53 = vpop.f32.mrb[139].mxu1  ;;  %v6023_v9 = vpop.f32.mrb[139].mxu0  ;;  %6642 = vmatpush3.bf16.msra.mxu0 %v7116_v18  ;;  %v636_v60 = vld [vmem:[%s11798_s0 + $0x1338] sm:$0xff] }
 0x209   :  { %v5960_v5 = vadd.f32 %v5959_v53, %v5958_v15  ;;  %v6024_v20 = vadd.f32 %v6023_v9, %v6022_v23  ;;  %v9730_v16 = vadd.f32 %v5957_v58, %v9394_v35  ;;  %v9733_v55 = vadd.f32 %v6021_v52, %v9397_v43  ;;  %6643 = vmatprep.subr.bf16.mxu0 %v7119_v48  ;;  %v133_v35 = vld [vmem:[%s11798_s0 + $0x380] sm:$0xff] }
 0x20a   :  { %3948 = vmatmul.mubr.bf16.gmra.mrb[244].mxu1 %v1019_v57  ;;  %4045 = vmatmul.mubr.bf16.gmra.mrb[244].mxu0 %v829_v25  ;;  %v157_v43 = vld [vmem:[%s11798_s0 + $0x440] sm:$0xff]  ;;  %v1068_v58 = vpack.c.bf16 %v588_v0, %v564_v10  ;;  %v878_v52 = vpack.c.bf16 %v206_v7, %v182_v38  ;;  %v230_v10 = vld [vmem:[%s11798_s0 + $0x688] sm:$0xff] }
 0x20b   :  { %3955 = vmatprep.mubr.bf16.mxu1 %v1044_v32  ;;  %4052 = vmatprep.mubr.bf16.mxu0 %v854_v2  ;;  %v9757_v24 = vadd.f32 %v5960_v5, %v9412_v8  ;;  %v9760_v4 = vadd.f32 %v6024_v20, %v9415_v59  ;;  %v7125_v8 = vld [vmem:[%s11797_s1 + $0x560] sm:$0xff]   ;;  %v853_v48 = vpack.c.bf16 %v157_v43, %v133_v35  ;;  %v7129_v5 = vld [vmem:[%s11797_s1 + $0x568] sm:$0xff]   ;;  %v563_v20 = vld [vmem:[%s11798_s0 + $0x10f0] sm:$0xff] }
 0x20c   :  { %6644 = vmatpush3.bf16.msra.mxu0 %v7120_v30  ;;  %v7127_v32 = vld [vmem:[%s11797_s1 + $0x520] sm:$0xff]   ;;  %v254_v0 = vld [vmem:[%s11798_s0 + $0x748] sm:$0xff] }
 0x20d   :  { %v5961_v50 = vpop.f32.mrb[140].mxu1  ;;  %v6025_v18 = vpop.f32.mrb[140].mxu0  ;;  %6645 = vmatprep.subr.bf16.mxu0 %v7123_v49  ;;  %v587_v49 = vld [vmem:[%s11798_s0 + $0x11b0] sm:$0xff]  ;;  %v7130_v38 = vld [vmem:[%s11797_s1 + $0x528] sm:$0xff]  }
 0x20e   :  { %v5962_v59 = vpop.f32.mrb[141].mxu1  ;;  %v6026_v28 = vpop.f32.mrb[141].mxu0 }
 0x20f   :  { %v5963_v11 = vadd.f32 %v5962_v59, %v5961_v50  ;;  %v6027_v44 = vadd.f32 %v6026_v28, %v6025_v18  ;;  %v5964_v57 = vpop.f32.mrb[142].mxu1  ;;  %v6028_v25 = vpop.f32.mrb[142].mxu0  ;;  %v1067_v18 = vpack.c.bf16 %v587_v49, %v563_v20  ;;  %v253_v49 = vld [vmem:[%s11798_s0 + $0x740] sm:$0xff] }
 0x210   :  { %v5965_v15 = vpop.f32.mrb[143].mxu1  ;;  %v6029_v23 = vpop.f32.mrb[143].mxu0  ;;  %6646 = vmatpush3.bf16.msra.mxu0 %v7124_v22 }
 0x211   :  { %v5966_v2 = vadd.f32 %v5965_v15, %v5964_v57  ;;  %v6030_v53 = vadd.f32 %v6029_v23, %v6028_v25  ;;  %v9778_v9 = vadd.f32 %v5963_v11, %v9442_v62  ;;  %v9781_v30 = vadd.f32 %v6027_v44, %v9445_v61  ;;  %6647 = vmatprep.subr.bf16.mxu0 %v7125_v8  ;;  %v181_v62 = vld [vmem:[%s11798_s0 + $0x500] sm:$0xff] }
 0x212   :  { %3956 = vmatmul.mubr.bf16.gmra.mrb[248].mxu1 %v1043_v26  ;;  %4053 = vmatmul.mubr.bf16.gmra.mrb[248].mxu0 %v853_v48  ;;  %v205_v61 = vld [vmem:[%s11798_s0 + $0x5c0] sm:$0xff]  ;;  %v1092_v11 = vpack.c.bf16 %v636_v60, %v612_v17  ;;  %v902_v44 = vpack.c.bf16 %v254_v0, %v230_v10  ;;  %v7134_v17 = vld [vmem:[%s11797_s1 + $0x538] sm:$0xff]  }
 0x213   :  { %3963 = vmatprep.mubr.bf16.mxu1 %v1068_v58  ;;  %4060 = vmatprep.mubr.bf16.mxu0 %v878_v52  ;;  %v9805_v35 = vadd.f32 %v5966_v2, %v9460_v42  ;;  %v9808_v43 = vadd.f32 %v6030_v53, %v9463_v14  ;;  %v7131_v42 = vld [vmem:[%s11797_s1 + $0x570] sm:$0xff]   ;;  %v877_v8 = vpack.c.bf16 %v205_v61, %v181_v62  ;;  %v7133_v2 = vld [vmem:[%s11797_s1 + $0x578] sm:$0xff]  }
 0x214   :  { %6648 = vmatpush3.bf16.msra.mxu0 %v7127_v32  ;;  %v7132_v58 = vld [vmem:[%s11797_s1 + $0x530] sm:$0xff]   ;;  %v660_v62 = vld [vmem:[%s11798_s0 + $0x13f8] sm:$0xff] }
 0x215   :  { %v6031_v7 = vpop.f32.mrb[144].mxu0  ;;  %v6095_v22 = vpop.f32.mrb[144].mxu1  ;;  %6649 = vmatprep.subr.bf16.mxu0 %v7129_v5  ;;  %v611_v53 = vld [vmem:[%s11798_s0 + $0x1270] sm:$0xff]  ;;  %v684_v61 = vld [vmem:[%s11798_s0 + $0x14b8] sm:$0xff] }
 0x216   :  { %v6032_v14 = vpop.f32.mrb[145].mxu0  ;;  %v6096_v50 = vpop.f32.mrb[145].mxu1 }
 0x217   :  { %v6033_v59 = vadd.f32 %v6032_v14, %v6031_v7  ;;  %v6097_v28 = vadd.f32 %v6096_v50, %v6095_v22  ;;  %v6034_v26 = vpop.f32.mrb[146].mxu0  ;;  %v6098_v48 = vpop.f32.mrb[146].mxu1 }
 0x218   :  { %v6035_v57 = vpop.f32.mrb[147].mxu0  ;;  %v6099_v25 = vpop.f32.mrb[147].mxu1  ;;  %6650 = vmatpush3.bf16.msra.mxu0 %v7130_v38 }
 0x219   :  { %v9826_v52 = vadd.f32 %v6033_v59, %v9490_v37  ;;  %v9829_v15 = vadd.f32 %v6097_v28, %v9493_v39  ;;  %v6036_v23 = vadd.f32 %v6035_v57, %v6034_v26  ;;  %v6100_v32 = vadd.f32 %v6099_v25, %v6098_v48  ;;  %6651 = vmatprep.subr.bf16.mxu0 %v7131_v42  ;;  %v635_v37 = vld [vmem:[%s11798_s0 + $0x1330] sm:$0xff]  ;;  %v229_v39 = vld [vmem:[%s11798_s0 + $0x680] sm:$0xff] }
 0x21a   :  { %3964 = vmatmul.mubr.bf16.gmra.mrb[252].mxu1 %v1067_v18  ;;  %4061 = vmatmul.mubr.bf16.gmra.mrb[252].mxu0 %v877_v8  ;;  %v1091_v7 = vpack.c.bf16 %v635_v37, %v611_v53  ;;  %v901_v22 = vpack.c.bf16 %v253_v49, %v229_v39  ;;  %v1116_v8 = vpack.c.bf16 %v684_v61, %v660_v62  ;;  %v659_v25 = vld [vmem:[%s11798_s0 + $0x13f0] sm:$0xff]  ;;  %v350_v53 = vld [vmem:[%s11798_s0 + $0xa48] sm:$0xff] }
 0x21b   :  { %v9844_v5 = vadd.f32 %v6036_v23, %v9517_v46  ;;  %v9847_v20 = vadd.f32 %v6100_v32, %v9520_v3  ;;  %3971 = vmatprep.mubr.bf16.mxu1 %v1092_v11  ;;  %4068 = vmatprep.mubr.bf16.mxu0 %v902_v44  ;;  %v278_v46 = vld [vmem:[%s11798_s0 + $0x808] sm:$0xff]  ;;  %v301_v32 = vld [vmem:[%s11798_s0 + $0x8c0] sm:$0xff] }
 0x21c   :  { %v302_v3 = vld [vmem:[%s11798_s0 + $0x8c8] sm:$0xff]  ;;  %6652 = vmatpush3.bf16.msra.mxu0 %v7132_v58  ;;  %v683_v58 = vld [vmem:[%s11798_s0 + $0x14b0] sm:$0xff] }
 0x21d   :  { %v6037_v60 = vpop.f32.mrb[148].mxu0  ;;  %v6101_v10 = vpop.f32.mrb[148].mxu1  ;;  %6653 = vmatprep.subr.bf16.mxu0 %v7133_v2  ;;  %v926_v59 = vpack.c.bf16 %v302_v3, %v278_v46  ;;  %v708_v2 = vld [vmem:[%s11798_s0 + $0x1578] sm:$0xff]  ;;  %v1115_v61 = vpack.c.bf16 %v683_v58, %v659_v25 }
 0x21e   :  { %v6038_v0 = vpop.f32.mrb[149].mxu0  ;;  %v6102_v38 = vpop.f32.mrb[149].mxu1 }
 0x21f   :  { %v6039_v42 = vadd.f32 %v6038_v0, %v6037_v60  ;;  %v6103_v14 = vadd.f32 %v6102_v38, %v6101_v10  ;;  %v6040_v50 = vpop.f32.mrb[150].mxu0  ;;  %v6104_v18 = vpop.f32.mrb[150].mxu1 }
 0x220   :  { %v6041_v28 = vpop.f32.mrb[151].mxu0  ;;  %v6105_v26 = vpop.f32.mrb[151].mxu1  ;;  %6654 = vmatpush3.bf16.msra.mxu0 %v7134_v17 }
 0x221   :  { %v9868_v48 = vadd.f32 %v6039_v42, %v9535_v36  ;;  %v9871_v11 = vadd.f32 %v6103_v14, %v9538_v41  ;;  %v6042_v44 = vadd.f32 %v6041_v28, %v6040_v50  ;;  %v6106_v57 = vadd.f32 %v6105_v26, %v6104_v18  ;;  %v277_v41 = vld [vmem:[%s11798_s0 + $0x800] sm:$0xff] }
 0x222   :  { %3972 = vmatmul.mubr.bf16.gmra.mrb[0].mxu1 %v1091_v7  ;;  %4069 = vmatmul.mubr.bf16.gmra.mrb[0].mxu0 %v901_v22  ;;  %v925_v46 = vpack.c.bf16 %v301_v32, %v277_v41  ;;  %v349_v26 = vld [vmem:[%s11798_s0 + $0xa40] sm:$0xff] }
 0x223   :  { %v9880_v23 = vadd.f32 %v6042_v44, %v9556_v51  ;;  %v9883_v36 = vadd.f32 %v6106_v57, %v9559_v40  ;;  %3979 = vmatprep.mubr.bf16.mxu1 %v1116_v8  ;;  %4076 = vmatprep.mubr.bf16.mxu0 %v926_v59  ;;  %v732_v51 = vld [vmem:[%s11798_s0 + $0x1638] sm:$0xff]  ;;  %v326_v40 = vld [vmem:[%s11798_s0 + $0x988] sm:$0xff]  ;;  %v707_v8 = vld [vmem:[%s11798_s0 + $0x1570] sm:$0xff] }
 0x224   :  { %v1140_v0 = vpack.c.bf16 %v732_v51, %v708_v2  ;;  %v950_v38 = vpack.c.bf16 %v350_v53, %v326_v40  ;;  %v731_v59 = vld [vmem:[%s11798_s0 + $0x1630] sm:$0xff]  ;;  %v756_v44 = vld [vmem:[%s11798_s0 + $0x16f8] sm:$0xff]  ;;  %v398_v57 = vld [vmem:[%s11798_s0 + $0xbc8] sm:$0xff] }
 0x225   :  { %v6043_v37 = vpop.f32.mrb[152].mxu0  ;;  %v6107_v39 = vpop.f32.mrb[152].mxu1  ;;  %v1139_v2 = vpack.c.bf16 %v731_v59, %v707_v8 }
 0x226   :  { %v6044_v49 = vpop.f32.mrb[153].mxu0  ;;  %v6108_v62 = vpop.f32.mrb[153].mxu1 }
 0x227   :  { %v6045_v3 = vadd.f32 %v6044_v49, %v6043_v37  ;;  %v6109_v17 = vadd.f32 %v6108_v62, %v6107_v39  ;;  %v6046_v60 = vpop.f32.mrb[154].mxu0  ;;  %v6110_v10 = vpop.f32.mrb[154].mxu1 }
 0x228   :  { %v6047_v7 = vpop.f32.mrb[155].mxu0  ;;  %v6111_v22 = vpop.f32.mrb[155].mxu1 }
 0x229   :  { %v9904_v42 = vadd.f32 %v6045_v3, %v9571_v54  ;;  %v9907_v14 = vadd.f32 %v6109_v17, %v9574_v21  ;;  %v6048_v50 = vadd.f32 %v6047_v7, %v6046_v60  ;;  %v6112_v18 = vadd.f32 %v6111_v22, %v6110_v10  ;;  %v325_v21 = vld [vmem:[%s11798_s0 + $0x980] sm:$0xff] }
 0x22a   :  { %3980 = vmatmul.mubr.bf16.gmra.mrb[4].mxu1 %v1115_v61  ;;  %4077 = vmatmul.mubr.bf16.gmra.mrb[4].mxu0 %v925_v46  ;;  %v949_v51 = vpack.c.bf16 %v349_v26, %v325_v21  ;;  %v397_v22 = vld [vmem:[%s11798_s0 + $0xbc0] sm:$0xff] }
 0x22b   :  { %v9916_v28 = vadd.f32 %v6048_v50, %v9592_v27  ;;  %v9919_v54 = vadd.f32 %v6112_v18, %v9595_v31  ;;  %3987 = vmatprep.mubr.bf16.mxu1 %v1140_v0  ;;  %4084 = vmatprep.mubr.bf16.mxu0 %v950_v38  ;;  %v780_v27 = vld [vmem:[%s11798_s0 + $0x17b8] sm:$0xff]  ;;  %v374_v31 = vld [vmem:[%s11798_s0 + $0xb08] sm:$0xff]  ;;  %v755_v0 = vld [vmem:[%s11798_s0 + $0x16f0] sm:$0xff] }
 0x22c   :  { %v1164_v49 = vpack.c.bf16 %v780_v27, %v756_v44  ;;  %v974_v62 = vpack.c.bf16 %v398_v57, %v374_v31  ;;  %v779_v38 = vld [vmem:[%s11798_s0 + $0x17b0] sm:$0xff]  ;;  %v422_v50 = vld [vmem:[%s11798_s0 + $0xc88] sm:$0xff]  ;;  %v64_v18 = vld [vmem:[%s11798_s0 + $0x158] sm:$0xff] }
 0x22d   :  { %v6049_v25 = vpop.f32.mrb[156].mxu0  ;;  %v6113_v58 = vpop.f32.mrb[156].mxu1  ;;  %v1163_v44 = vpack.c.bf16 %v779_v38, %v755_v0  ;;  %v88_v0 = vld [vmem:[%s11798_s0 + $0x218] sm:$0xff] }
 0x22e   :  { %v6050_v41 = vpop.f32.mrb[157].mxu0  ;;  %v6114_v32 = vpop.f32.mrb[157].mxu1  ;;  %v112_v38 = vld [vmem:[%s11798_s0 + $0x2d8] sm:$0xff] }
 0x22f   :  { %v6051_v40 = vadd.f32 %v6050_v41, %v6049_v25  ;;  %v6115_v53 = vadd.f32 %v6114_v32, %v6113_v58  ;;  %v6052_v37 = vpop.f32.mrb[158].mxu0  ;;  %v6116_v39 = vpop.f32.mrb[158].mxu1 }
 0x230   :  { %v6053_v61 = vpop.f32.mrb[159].mxu0  ;;  %v6117_v46 = vpop.f32.mrb[159].mxu1 }
 0x231   :  { %v9940_v3 = vadd.f32 %v6051_v40, %v9607_v13  ;;  %v9943_v17 = vadd.f32 %v6115_v53, %v9610_v12  ;;  %v6054_v60 = vadd.f32 %v6053_v61, %v6052_v37  ;;  %v6118_v10 = vadd.f32 %v6117_v46, %v6116_v39  ;;  %v373_v12 = vld [vmem:[%s11798_s0 + $0xb00] sm:$0xff]  ;;  %v63_v46 = vld [vmem:[%s11798_s0 + $0x150] sm:$0xff] }
 0x232   :  { %3988 = vmatmul.mubr.bf16.gmra.mrb[8].mxu1 %v1139_v2  ;;  %4085 = vmatmul.mubr.bf16.gmra.mrb[8].mxu0 %v949_v51  ;;  %v973_v27 = vpack.c.bf16 %v397_v22, %v373_v12 }
 0x233   :  { %v9952_v7 = vadd.f32 %v6054_v60, %v9628_v6  ;;  %v9955_v13 = vadd.f32 %v6118_v10, %v9631_v63  ;;  %3995 = vmatprep.mubr.bf16.mxu1 %v1164_v49  ;;  %4092 = vmatprep.mubr.bf16.mxu0 %v974_v62  ;;  %v446_v6 = vld [vmem:[%s11798_s0 + $0xd48] sm:$0xff]  ;;  %v40_v63 = vld [vmem:[%s11798_s0 + $0x98] sm:$0xff]  ;;  %v421_v49 = vld [vmem:[%s11798_s0 + $0xc80] sm:$0xff] }
 0x234   :  { %v998_v41 = vpack.c.bf16 %v446_v6, %v422_v50  ;;  %v808_v32 = vpack.c.bf16 %v64_v18, %v40_v63 }
 0x235   :  { %v6055_v8 = vpop.f32.mrb[160].mxu0  ;;  %v6119_v59 = vpop.f32.mrb[160].mxu1 }
 0x236   :  { %v6056_v21 = vpop.f32.mrb[161].mxu0  ;;  %v6120_v26 = vpop.f32.mrb[161].mxu1 }
 0x237   :  { %v6057_v31 = vadd.f32 %v6056_v21, %v6055_v8  ;;  %v6121_v57 = vadd.f32 %v6120_v26, %v6119_v59  ;;  %v6058_v25 = vpop.f32.mrb[162].mxu0  ;;  %v6122_v58 = vpop.f32.mrb[162].mxu1  ;;  %v7114_v21 = vld [vmem:[%s11797_s1 + $0x580] sm:$0xff]  }
 0x238   :  { %v6059_v2 = vpop.f32.mrb[163].mxu0  ;;  %v6123_v51 = vpop.f32.mrb[163].mxu1 }
 0x239   :  { %v9976_v40 = vadd.f32 %v6057_v31, %v9643_v29  ;;  %v9979_v53 = vadd.f32 %v6121_v57, %v9646_v47  ;;  %v6060_v37 = vadd.f32 %v6059_v2, %v6058_v25  ;;  %v6124_v39 = vadd.f32 %v6123_v51, %v6122_v58  ;;  %v445_v29 = vld [vmem:[%s11798_s0 + $0xd40] sm:$0xff]  ;;  %v39_v47 = vld [vmem:[%s11798_s0 + $0x90] sm:$0xff]  ;;  %v7117_v57 = vld [vmem:[%s11797_s1 + $0x5c8] sm:$0xff]  }
 0x23a   :  { %3996 = vmatmul.mubr.bf16.gmra.mrb[12].mxu1 %v1163_v44  ;;  %4093 = vmatmul.mubr.bf16.gmra.mrb[12].mxu0 %v973_v27  ;;  %v997_v50 = vpack.c.bf16 %v445_v29, %v421_v49  ;;  %v807_v6 = vpack.c.bf16 %v63_v46, %v39_v47  ;;  %v832_v31 = vpack.c.bf16 %v112_v38, %v88_v0  ;;  %v469_v2 = vld [vmem:[%s11798_s0 + $0xe00] sm:$0xff]  ;;  %v518_v49 = vld [vmem:[%s11798_s0 + $0xf88] sm:$0xff]  ;;  %v7121_v46 = vld [vmem:[%s11797_s1 + $0x5d0] sm:$0xff]  }
 0x23b   :  { %v9985_v62 = vadd.f32 %v6060_v37, %v9664_v56  ;;  %v9988_v61 = vadd.f32 %v6124_v39, %v9667_v33  ;;  %4100 = vmatprep.mubr.bf16.mxu0 %v998_v41  ;;  %4197 = vmatprep.mubr.bf16.mxu1 %v808_v32  ;;  %v470_v56 = vld [vmem:[%s11798_s0 + $0xe08] sm:$0xff]  ;;  %v493_v51 = vld [vmem:[%s11798_s0 + $0xec0] sm:$0xff] }
 0x23c   :  { %v494_v33 = vld [vmem:[%s11798_s0 + $0xec8] sm:$0xff]  ;;  %v1021_v0 = vpack.c.bf16 %v493_v51, %v469_v2  ;;  %v159_v51 = vld [vmem:[%s11798_s0 + $0x450] sm:$0xff] }
 0x23d   :  { %v6061_v60 = vpop.f32.mrb[164].mxu0  ;;  %v6125_v10 = vpop.f32.mrb[164].mxu1  ;;  %v1022_v26 = vpack.c.bf16 %v494_v33, %v470_v56  ;;  %v542_v29 = vld [vmem:[%s11798_s0 + $0x1048] sm:$0xff] }
 0x23e   :  { %v6062_v12 = vpop.f32.mrb[165].mxu0  ;;  %v6126_v22 = vpop.f32.mrb[165].mxu1  ;;  %v7118_v47 = vld [vmem:[%s11797_s1 + $0x588] sm:$0xff]  }
 0x23f   :  { %v6063_v63 = vadd.f32 %v6062_v12, %v6061_v60  ;;  %v6127_v18 = vadd.f32 %v6126_v22, %v6125_v10  ;;  %v6064_v8 = vpop.f32.mrb[166].mxu0  ;;  %v6128_v59 = vpop.f32.mrb[166].mxu1 }
 0x240   :  { %v6065_v44 = vpop.f32.mrb[167].mxu0  ;;  %v6129_v27 = vpop.f32.mrb[167].mxu1 }
 0x241   :  { %v10018_v25 = vadd.f32 %v6063_v63, %v9682_v19  ;;  %v10021_v58 = vadd.f32 %v6127_v18, %v9685_v34  ;;  %v6066_v41 = vadd.f32 %v6065_v44, %v6064_v8  ;;  %v6130_v32 = vadd.f32 %v6129_v27, %v6128_v59  ;;  %v87_v19 = vld [vmem:[%s11798_s0 + $0x210] sm:$0xff] }
 0x242   :  { %4101 = vmatmul.mubr.bf16.gmra.mrb[16].mxu0 %v997_v50  ;;  %4198 = vmatmul.mubr.bf16.vlgmr.msra.gmra.mrb[16].mxu1 %v807_v6  ;;  %v111_v34 = vld [vmem:[%s11798_s0 + $0x2d0] sm:$0xff]  ;;  %v1046_v63 = vpack.c.bf16 %v542_v29, %v518_v49  ;;  %v7128_v49 = vld [vmem:[%s11797_s1 + $0x598] sm:$0xff]  }
 0x243   :  { %v10036_v37 = vadd.f32 %v6066_v41, %v9709_v45  ;;  %v10039_v39 = vadd.f32 %v6130_v32, %v9712_v1  ;;  %6752 = vmatpush3.bf16.msra.mxu1 %v7114_v21  ;;  %4108 = vmatprep.mubr.bf16.mxu0 %v1022_v26  ;;  %v136_v45 = vld [vmem:[%s11798_s0 + $0x398] sm:$0xff]  ;;  %v831_v38 = vpack.c.bf16 %v111_v34, %v87_v19  ;;  %v7122_v21 = vld [vmem:[%s11797_s1 + $0x590] sm:$0xff]   ;;  %v517_v41 = vld [vmem:[%s11798_s0 + $0xf80] sm:$0xff] }
 0x244   :  { %4205 = vmatprep.mubr.bf16.mxu1 %v832_v31  ;;  %v160_v1 = vld [vmem:[%s11798_s0 + $0x458] sm:$0xff]  ;;  %6753 = vmatprep.subr.bf16.mxu1 %v7117_v57  ;;  %v566_v19 = vld [vmem:[%s11798_s0 + $0x1108] sm:$0xff] }
 0x245   :  { %v6067_v56 = vpop.f32.mrb[168].mxu0  ;;  %v6131_v33 = vpop.f32.mrb[168].mxu1  ;;  %v856_v18 = vpack.c.bf16 %v160_v1, %v136_v45  ;;  %v7126_v57 = vld [vmem:[%s11797_s1 + $0x5d8] sm:$0xff]   ;;  %v590_v34 = vld [vmem:[%s11798_s0 + $0x11c8] sm:$0xff]  ;;  %v7135_v45 = vld [vmem:[%s11797_s1 + $0x5e0] sm:$0xff]  }
 0x246   :  { %v6068_v60 = vpop.f32.mrb[169].mxu0  ;;  %v6132_v10 = vpop.f32.mrb[169].mxu1 }
 0x247   :  { %v6069_v12 = vadd.f32 %v6068_v60, %v6067_v56  ;;  %v6133_v22 = vadd.f32 %v6132_v10, %v6131_v33  ;;  %v6070_v50 = vpop.f32.mrb[170].mxu0  ;;  %v6134_v6 = vpop.f32.mrb[170].mxu1  ;;  %6754 = vmatpush3.bf16.msra.mxu1 %v7118_v47 }
 0x248   :  { %v6071_v8 = vpop.f32.mrb[171].mxu0  ;;  %v6135_v59 = vpop.f32.mrb[171].mxu1  ;;  %6755 = vmatprep.subr.bf16.mxu1 %v7121_v46 }
 0x249   :  { %v10063_v26 = vadd.f32 %v6069_v12, %v9730_v16  ;;  %v10066_v44 = vadd.f32 %v6133_v22, %v9733_v55  ;;  %v6072_v27 = vadd.f32 %v6071_v8, %v6070_v50  ;;  %v6136_v31 = vadd.f32 %v6135_v59, %v6134_v6  ;;  %v541_v16 = vld [vmem:[%s11798_s0 + $0x1040] sm:$0xff]  ;;  %v135_v55 = vld [vmem:[%s11798_s0 + $0x390] sm:$0xff] }
 0x24a   :  { %4109 = vmatmul.mubr.bf16.gmra.mrb[20].mxu0 %v1021_v0  ;;  %4206 = vmatmul.mubr.bf16.gmra.mrb[20].mxu1 %v831_v38  ;;  %v1045_v56 = vpack.c.bf16 %v541_v16, %v517_v41  ;;  %v855_v33 = vpack.c.bf16 %v159_v51, %v135_v55  ;;  %v1070_v12 = vpack.c.bf16 %v590_v34, %v566_v19  ;;  %v207_v16 = vld [vmem:[%s11798_s0 + $0x5d0] sm:$0xff]  ;;  %v614_v55 = vld [vmem:[%s11798_s0 + $0x1288] sm:$0xff] }
 0x24b   :  { %v10081_v32 = vadd.f32 %v6072_v27, %v9757_v24  ;;  %v10084_v2 = vadd.f32 %v6136_v31, %v9760_v4  ;;  %4116 = vmatprep.mubr.bf16.mxu0 %v1046_v63  ;;  %4213 = vmatprep.mubr.bf16.mxu1 %v856_v18  ;;  %v184_v24 = vld [vmem:[%s11798_s0 + $0x518] sm:$0xff]  ;;  %v7136_v63 = vld [vmem:[%s11797_s1 + $0x5a0] sm:$0xff]   ;;  %v7137_v27 = vld [vmem:[%s11797_s1 + $0x5e8] sm:$0xff]  }
 0x24c   :  { %v208_v4 = vld [vmem:[%s11798_s0 + $0x5d8] sm:$0xff]  ;;  %6756 = vmatpush3.bf16.msra.mxu1 %v7122_v21  ;;  %v565_v31 = vld [vmem:[%s11798_s0 + $0x1100] sm:$0xff]  ;;  %v638_v51 = vld [vmem:[%s11798_s0 + $0x1348] sm:$0xff] }
 0x24d   :  { %v6073_v29 = vpop.f32.mrb[172].mxu0  ;;  %v6137_v47 = vpop.f32.mrb[172].mxu1  ;;  %6757 = vmatprep.subr.bf16.mxu1 %v7126_v57  ;;  %v880_v22 = vpack.c.bf16 %v208_v4, %v184_v24  ;;  %v7138_v19 = vld [vmem:[%s11797_s1 + $0x5a8] sm:$0xff]   ;;  %v7139_v4 = vld [vmem:[%s11797_s1 + $0x5f0] sm:$0xff]  }
 0x24e   :  { %v6074_v1 = vpop.f32.mrb[173].mxu0  ;;  %v6138_v46 = vpop.f32.mrb[173].mxu1 }
 0x24f   :  { %v6075_v60 = vadd.f32 %v6074_v1, %v6073_v29  ;;  %v6139_v10 = vadd.f32 %v6138_v46, %v6137_v47  ;;  %v6076_v0 = vpop.f32.mrb[174].mxu0  ;;  %v6140_v38 = vpop.f32.mrb[174].mxu1 }
 0x250   :  { %v6077_v50 = vpop.f32.mrb[175].mxu0  ;;  %v6141_v6 = vpop.f32.mrb[175].mxu1  ;;  %6758 = vmatpush3.bf16.msra.mxu1 %v7128_v49 }
 0x251   :  { %v10111_v18 = vadd.f32 %v6075_v60, %v9778_v9  ;;  %v10114_v8 = vadd.f32 %v6139_v10, %v9781_v30  ;;  %v6078_v59 = vadd.f32 %v6077_v50, %v6076_v0  ;;  %v6142_v21 = vadd.f32 %v6141_v6, %v6140_v38  ;;  %6759 = vmatprep.subr.bf16.mxu1 %v7135_v45  ;;  %v589_v9 = vld [vmem:[%s11798_s0 + $0x11c0] sm:$0xff]  ;;  %v183_v30 = vld [vmem:[%s11798_s0 + $0x510] sm:$0xff] }
 0x252   :  { %4117 = vmatmul.mubr.bf16.gmra.mrb[24].mxu0 %v1045_v56  ;;  %4214 = vmatmul.mubr.bf16.gmra.mrb[24].mxu1 %v855_v33  ;;  %v1069_v47 = vpack.c.bf16 %v589_v9, %v565_v31  ;;  %v879_v45 = vpack.c.bf16 %v207_v16, %v183_v30  ;;  %v1094_v60 = vpack.c.bf16 %v638_v51, %v614_v55  ;;  %v255_v9 = vld [vmem:[%s11798_s0 + $0x750] sm:$0xff]  ;;  %v662_v30 = vld [vmem:[%s11798_s0 + $0x1408] sm:$0xff]  ;;  %v7142_v55 = vld [vmem:[%s11797_s1 + $0x5b8] sm:$0xff]  }
 0x253   :  { %v10129_v57 = vadd.f32 %v6078_v59, %v9805_v35  ;;  %v10132_v41 = vadd.f32 %v6142_v21, %v9808_v43  ;;  %4124 = vmatprep.mubr.bf16.mxu0 %v1070_v12  ;;  %4221 = vmatprep.mubr.bf16.mxu1 %v880_v22  ;;  %v232_v35 = vld [vmem:[%s11798_s0 + $0x698] sm:$0xff]  ;;  %v7140_v12 = vld [vmem:[%s11797_s1 + $0x5b0] sm:$0xff]   ;;  %v613_v21 = vld [vmem:[%s11798_s0 + $0x1280] sm:$0xff] }
 0x254   :  { %v256_v43 = vld [vmem:[%s11798_s0 + $0x758] sm:$0xff]  ;;  %6760 = vmatpush3.bf16.msra.mxu1 %v7136_v63  ;;  %v686_v16 = vld [vmem:[%s11798_s0 + $0x14c8] sm:$0xff] }
 0x255   :  { %v6143_v34 = vpop.f32.mrb[176].mxu1  ;;  %v6207_v24 = vpop.f32.mrb[176].mxu0  ;;  %6761 = vmatprep.subr.bf16.mxu1 %v7137_v27  ;;  %v904_v10 = vpack.c.bf16 %v256_v43, %v232_v35  ;;  %v7141_v59 = vld [vmem:[%s11797_s1 + $0x5f8] sm:$0xff]  }
 0x256   :  { %v6144_v49 = vpop.f32.mrb[177].mxu1  ;;  %v6208_v29 = vpop.f32.mrb[177].mxu0 }
 0x257   :  { %v6145_v1 = vadd.f32 %v6144_v49, %v6143_v34  ;;  %v6209_v46 = vadd.f32 %v6208_v29, %v6207_v24  ;;  %v6146_v56 = vpop.f32.mrb[178].mxu1  ;;  %v6210_v33 = vpop.f32.mrb[178].mxu0 }
 0x258   :  { %v6147_v0 = vpop.f32.mrb[179].mxu1  ;;  %v6211_v38 = vpop.f32.mrb[179].mxu0  ;;  %6762 = vmatpush3.bf16.msra.mxu1 %v7138_v19 }
 0x259   :  { %v10159_v22 = vadd.f32 %v6145_v1, %v9826_v52  ;;  %v10162_v50 = vadd.f32 %v6209_v46, %v9829_v15  ;;  %v6148_v6 = vadd.f32 %v6147_v0, %v6146_v56  ;;  %v6212_v63 = vadd.f32 %v6211_v38, %v6210_v33  ;;  %6763 = vmatprep.subr.bf16.mxu1 %v7139_v4  ;;  %v637_v52 = vld [vmem:[%s11798_s0 + $0x1340] sm:$0xff]  ;;  %v231_v15 = vld [vmem:[%s11798_s0 + $0x690] sm:$0xff] }
 0x25a   :  { %4125 = vmatmul.mubr.bf16.gmra.mrb[28].mxu0 %v1069_v47  ;;  %4222 = vmatmul.mubr.bf16.gmra.mrb[28].mxu1 %v879_v45  ;;  %v1093_v34 = vpack.c.bf16 %v637_v52, %v613_v21  ;;  %v903_v24 = vpack.c.bf16 %v255_v9, %v231_v15  ;;  %v1118_v45 = vpack.c.bf16 %v686_v16, %v662_v30  ;;  %v661_v38 = vld [vmem:[%s11798_s0 + $0x1400] sm:$0xff]  ;;  %v352_v21 = vld [vmem:[%s11798_s0 + $0xa58] sm:$0xff] }
 0x25b   :  { %v10177_v27 = vadd.f32 %v6148_v6, %v9844_v5  ;;  %v10180_v31 = vadd.f32 %v6212_v63, %v9847_v20  ;;  %4132 = vmatprep.mubr.bf16.mxu0 %v1094_v60  ;;  %4229 = vmatprep.mubr.bf16.mxu1 %v904_v10  ;;  %v280_v5 = vld [vmem:[%s11798_s0 + $0x818] sm:$0xff]  ;;  %v303_v63 = vld [vmem:[%s11798_s0 + $0x8d0] sm:$0xff] }
 0x25c   :  { %v304_v20 = vld [vmem:[%s11798_s0 + $0x8d8] sm:$0xff]  ;;  %6764 = vmatpush3.bf16.msra.mxu1 %v7140_v12  ;;  %v685_v12 = vld [vmem:[%s11798_s0 + $0x14c0] sm:$0xff] }
 0x25d   :  { %v6149_v51 = vpop.f32.mrb[180].mxu1  ;;  %v6213_v35 = vpop.f32.mrb[180].mxu0  ;;  %6765 = vmatprep.subr.bf16.mxu1 %v7141_v59  ;;  %v928_v1 = vpack.c.bf16 %v304_v20, %v280_v5  ;;  %v710_v59 = vld [vmem:[%s11798_s0 + $0x1588] sm:$0xff]  ;;  %v1117_v16 = vpack.c.bf16 %v685_v12, %v661_v38 }
 0x25e   :  { %v6150_v43 = vpop.f32.mrb[181].mxu1  ;;  %v6214_v19 = vpop.f32.mrb[181].mxu0 }
 0x25f   :  { %v6151_v4 = vadd.f32 %v6150_v43, %v6149_v51  ;;  %v6215_v49 = vadd.f32 %v6214_v19, %v6213_v35  ;;  %v6152_v29 = vpop.f32.mrb[182].mxu1  ;;  %v6216_v47 = vpop.f32.mrb[182].mxu0 }
 0x260   :  { %v6153_v46 = vpop.f32.mrb[183].mxu1  ;;  %v6217_v56 = vpop.f32.mrb[183].mxu0  ;;  %6766 = vmatpush3.bf16.msra.mxu1 %v7142_v55 }
 0x261   :  { %v10201_v33 = vadd.f32 %v6151_v4, %v9868_v48  ;;  %v10204_v60 = vadd.f32 %v6215_v49, %v9871_v11  ;;  %v6154_v10 = vadd.f32 %v6153_v46, %v6152_v29  ;;  %v6218_v0 = vadd.f32 %v6217_v56, %v6216_v47  ;;  %v279_v11 = vld [vmem:[%s11798_s0 + $0x810] sm:$0xff] }
 0x262   :  { %4133 = vmatmul.mubr.bf16.gmra.mrb[32].mxu0 %v1093_v34  ;;  %4230 = vmatmul.mubr.bf16.gmra.mrb[32].mxu1 %v903_v24  ;;  %v927_v5 = vpack.c.bf16 %v303_v63, %v279_v11  ;;  %v351_v56 = vld [vmem:[%s11798_s0 + $0xa50] sm:$0xff] }
 0x263   :  { %v10213_v6 = vadd.f32 %v6154_v10, %v9880_v23  ;;  %v10216_v48 = vadd.f32 %v6218_v0, %v9883_v36  ;;  %4140 = vmatprep.mubr.bf16.mxu0 %v1118_v45  ;;  %4237 = vmatprep.mubr.bf16.mxu1 %v928_v1  ;;  %v734_v23 = vld [vmem:[%s11798_s0 + $0x1648] sm:$0xff]  ;;  %v328_v36 = vld [vmem:[%s11798_s0 + $0x998] sm:$0xff]  ;;  %v709_v45 = vld [vmem:[%s11798_s0 + $0x1580] sm:$0xff] }
 0x264   :  { %v1142_v43 = vpack.c.bf16 %v734_v23, %v710_v59  ;;  %v952_v19 = vpack.c.bf16 %v352_v21, %v328_v36  ;;  %v733_v1 = vld [vmem:[%s11798_s0 + $0x1640] sm:$0xff]  ;;  %v758_v10 = vld [vmem:[%s11798_s0 + $0x1708] sm:$0xff]  ;;  %v400_v0 = vld [vmem:[%s11798_s0 + $0xbd8] sm:$0xff] }
 0x265   :  { %v6155_v52 = vpop.f32.mrb[184].mxu1  ;;  %v6219_v15 = vpop.f32.mrb[184].mxu0  ;;  %v1141_v59 = vpack.c.bf16 %v733_v1, %v709_v45 }
 0x266   :  { %v6156_v9 = vpop.f32.mrb[185].mxu1  ;;  %v6220_v30 = vpop.f32.mrb[185].mxu0 }
 0x267   :  { %v6157_v20 = vadd.f32 %v6156_v9, %v6155_v52  ;;  %v6221_v55 = vadd.f32 %v6220_v30, %v6219_v15  ;;  %v6158_v51 = vpop.f32.mrb[186].mxu1  ;;  %v6222_v35 = vpop.f32.mrb[186].mxu0 }
 0x268   :  { %v6159_v34 = vpop.f32.mrb[187].mxu1  ;;  %v6223_v24 = vpop.f32.mrb[187].mxu0 }
 0x269   :  { %v10237_v4 = vadd.f32 %v6157_v20, %v9904_v42  ;;  %v10240_v49 = vadd.f32 %v6221_v55, %v9907_v14  ;;  %v6160_v29 = vadd.f32 %v6159_v34, %v6158_v51  ;;  %v6224_v47 = vadd.f32 %v6223_v24, %v6222_v35  ;;  %v327_v14 = vld [vmem:[%s11798_s0 + $0x990] sm:$0xff] }
 0x26a   :  { %4141 = vmatmul.mubr.bf16.gmra.mrb[36].mxu0 %v1117_v16  ;;  %4238 = vmatmul.mubr.bf16.gmra.mrb[36].mxu1 %v927_v5  ;;  %v951_v23 = vpack.c.bf16 %v351_v56, %v327_v14  ;;  %v399_v24 = vld [vmem:[%s11798_s0 + $0xbd0] sm:$0xff] }
 0x26b   :  { %v10249_v46 = vadd.f32 %v6160_v29, %v9916_v28  ;;  %v10252_v42 = vadd.f32 %v6224_v47, %v9919_v54  ;;  %4148 = vmatprep.mubr.bf16.mxu0 %v1142_v43  ;;  %4245 = vmatprep.mubr.bf16.mxu1 %v952_v19  ;;  %v782_v28 = vld [vmem:[%s11798_s0 + $0x17c8] sm:$0xff]  ;;  %v376_v54 = vld [vmem:[%s11798_s0 + $0xb18] sm:$0xff]  ;;  %v757_v43 = vld [vmem:[%s11798_s0 + $0x1700] sm:$0xff] }
 0x26c   :  { %v1166_v9 = vpack.c.bf16 %v782_v28, %v758_v10  ;;  %v976_v30 = vpack.c.bf16 %v400_v0, %v376_v54  ;;  %v781_v19 = vld [vmem:[%s11798_s0 + $0x17c0] sm:$0xff]  ;;  %v424_v29 = vld [vmem:[%s11798_s0 + $0xc98] sm:$0xff]  ;;  %v66_v47 = vld [vmem:[%s11798_s0 + $0x168] sm:$0xff] }
 0x26d   :  { %v6161_v38 = vpop.f32.mrb[188].mxu1  ;;  %v6225_v12 = vpop.f32.mrb[188].mxu0  ;;  %v1165_v10 = vpack.c.bf16 %v781_v19, %v757_v43 }
 0x26e   :  { %v6162_v11 = vpop.f32.mrb[189].mxu1  ;;  %v6226_v63 = vpop.f32.mrb[189].mxu0 }
 0x26f   :  { %v6163_v36 = vadd.f32 %v6162_v11, %v6161_v38  ;;  %v6227_v21 = vadd.f32 %v6226_v63, %v6225_v12  ;;  %v6164_v52 = vpop.f32.mrb[190].mxu1  ;;  %v6228_v15 = vpop.f32.mrb[190].mxu0 }
 0x270   :  { %v6165_v16 = vpop.f32.mrb[191].mxu1  ;;  %v6229_v5 = vpop.f32.mrb[191].mxu0 }
 0x271   :  { %v10273_v20 = vadd.f32 %v6163_v36, %v9940_v3  ;;  %v10276_v55 = vadd.f32 %v6227_v21, %v9943_v17  ;;  %v6166_v51 = vadd.f32 %v6165_v16, %v6164_v52  ;;  %v6230_v35 = vadd.f32 %v6229_v5, %v6228_v15  ;;  %v375_v17 = vld [vmem:[%s11798_s0 + $0xb10] sm:$0xff]  ;;  %v65_v5 = vld [vmem:[%s11798_s0 + $0x160] sm:$0xff] }
 0x272   :  { %4149 = vmatmul.mubr.bf16.gmra.mrb[40].mxu0 %v1141_v59  ;;  %4246 = vmatmul.mubr.bf16.gmra.mrb[40].mxu1 %v951_v23  ;;  %v975_v28 = vpack.c.bf16 %v399_v24, %v375_v17 }
 0x273   :  { %v10285_v34 = vadd.f32 %v6166_v51, %v9952_v7  ;;  %v10288_v3 = vadd.f32 %v6230_v35, %v9955_v13  ;;  %4156 = vmatprep.mubr.bf16.mxu0 %v1166_v9  ;;  %4253 = vmatprep.mubr.bf16.mxu1 %v976_v30  ;;  %v448_v7 = vld [vmem:[%s11798_s0 + $0xd58] sm:$0xff]  ;;  %v42_v13 = vld [vmem:[%s11798_s0 + $0xa8] sm:$0xff]  ;;  %v423_v9 = vld [vmem:[%s11798_s0 + $0xc90] sm:$0xff] }
 0x274   :  { %v1000_v11 = vpack.c.bf16 %v448_v7, %v424_v29  ;;  %v810_v63 = vpack.c.bf16 %v66_v47, %v42_v13  ;;  %v447_v30 = vld [vmem:[%s11798_s0 + $0xd50] sm:$0xff]  ;;  %v472_v51 = vld [vmem:[%s11798_s0 + $0xe18] sm:$0xff]  ;;  %v114_v35 = vld [vmem:[%s11798_s0 + $0x2e8] sm:$0xff] }
 0x275   :  { %v6167_v45 = vpop.f32.mrb[192].mxu1  ;;  %v6231_v1 = vpop.f32.mrb[192].mxu0  ;;  %v999_v29 = vpack.c.bf16 %v447_v30, %v423_v9 }
 0x276   :  { %v6168_v14 = vpop.f32.mrb[193].mxu1  ;;  %v6232_v56 = vpop.f32.mrb[193].mxu0 }
 0x277   :  { %v6169_v54 = vadd.f32 %v6168_v14, %v6167_v45  ;;  %v6233_v0 = vadd.f32 %v6232_v56, %v6231_v1  ;;  %v6170_v38 = vpop.f32.mrb[194].mxu1  ;;  %v6234_v12 = vpop.f32.mrb[194].mxu0 }
 0x278   :  { %v6171_v59 = vpop.f32.mrb[195].mxu1  ;;  %v6235_v23 = vpop.f32.mrb[195].mxu0 }
 0x279   :  { %v10309_v36 = vadd.f32 %v6169_v54, %v9976_v40  ;;  %v10312_v21 = vadd.f32 %v6233_v0, %v9979_v53  ;;  %v6172_v52 = vadd.f32 %v6171_v59, %v6170_v38  ;;  %v6236_v15 = vadd.f32 %v6235_v23, %v6234_v12  ;;  %v41_v53 = vld [vmem:[%s11798_s0 + $0xa0] sm:$0xff] }
 0x27a   :  { %4157 = vmatmul.mubr.bf16.gmra.mrb[44].mxu0 %v1165_v10  ;;  %4254 = vmatmul.mubr.bf16.gmra.mrb[44].mxu1 %v975_v28  ;;  %v809_v7 = vpack.c.bf16 %v65_v5, %v41_v53  ;;  %v113_v23 = vld [vmem:[%s11798_s0 + $0x2e0] sm:$0xff] }
 0x27b   :  { %v10321_v16 = vadd.f32 %v6172_v52, %v9985_v62  ;;  %v10324_v40 = vadd.f32 %v6236_v15, %v9988_v61  ;;  %4261 = vmatprep.mubr.bf16.mxu1 %v1000_v11  ;;  %4358 = vmatprep.mubr.bf16.mxu0 %v810_v63  ;;  %v496_v62 = vld [vmem:[%s11798_s0 + $0xed8] sm:$0xff]  ;;  %v90_v61 = vld [vmem:[%s11798_s0 + $0x228] sm:$0xff]  ;;  %v471_v11 = vld [vmem:[%s11798_s0 + $0xe10] sm:$0xff] }
 0x27c   :  { %v1024_v14 = vpack.c.bf16 %v496_v62, %v472_v51  ;;  %v834_v56 = vpack.c.bf16 %v114_v35, %v90_v61  ;;  %v495_v63 = vld [vmem:[%s11798_s0 + $0xed0] sm:$0xff]  ;;  %v520_v52 = vld [vmem:[%s11798_s0 + $0xf98] sm:$0xff]  ;;  %v162_v15 = vld [vmem:[%s11798_s0 + $0x468] sm:$0xff] }
 0x27d   :  { %v6173_v43 = vpop.f32.mrb[196].mxu1  ;;  %v6237_v19 = vpop.f32.mrb[196].mxu0  ;;  %v1023_v51 = vpack.c.bf16 %v495_v63, %v471_v11 }
 0x27e   :  { %v6174_v17 = vpop.f32.mrb[197].mxu1  ;;  %v6238_v24 = vpop.f32.mrb[197].mxu0 }
 0x27f   :  { %v6175_v13 = vadd.f32 %v6174_v17, %v6173_v43  ;;  %v6239_v47 = vadd.f32 %v6238_v24, %v6237_v19  ;;  %v6176_v45 = vpop.f32.mrb[198].mxu1  ;;  %v6240_v1 = vpop.f32.mrb[198].mxu0 }
 0x280   :  { %v6177_v10 = vpop.f32.mrb[199].mxu1  ;;  %v6241_v28 = vpop.f32.mrb[199].mxu0 }
 0x281   :  { %v10345_v54 = vadd.f32 %v6175_v13, %v10018_v25  ;;  %v10348_v0 = vadd.f32 %v6239_v47, %v10021_v58  ;;  %v6178_v38 = vadd.f32 %v6177_v10, %v6176_v45  ;;  %v6242_v12 = vadd.f32 %v6241_v28, %v6240_v1  ;;  %v89_v58 = vld [vmem:[%s11798_s0 + $0x220] sm:$0xff] }
 0x282   :  { %4262 = vmatmul.mubr.bf16.gmra.mrb[48].mxu1 %v999_v29  ;;  %4359 = vmatmul.mubr.bf16.vlgmr.msra.gmra.mrb[48].mxu0 %v809_v7  ;;  %v833_v62 = vpack.c.bf16 %v113_v23, %v89_v58  ;;  %v161_v28 = vld [vmem:[%s11798_s0 + $0x460] sm:$0xff] }
 0x283   :  { %v10357_v59 = vadd.f32 %v6178_v38, %v10036_v37  ;;  %v10360_v25 = vadd.f32 %v6242_v12, %v10039_v39  ;;  %4269 = vmatprep.mubr.bf16.mxu1 %v1024_v14  ;;  %4366 = vmatprep.mubr.bf16.mxu0 %v834_v56  ;;  %v544_v37 = vld [vmem:[%s11798_s0 + $0x1058] sm:$0xff]  ;;  %v138_v39 = vld [vmem:[%s11798_s0 + $0x3a8] sm:$0xff]  ;;  %v519_v14 = vld [vmem:[%s11798_s0 + $0xf90] sm:$0xff] }
 0x284   :  { %v1048_v17 = vpack.c.bf16 %v544_v37, %v520_v52  ;;  %v858_v24 = vpack.c.bf16 %v162_v15, %v138_v39  ;;  %v543_v56 = vld [vmem:[%s11798_s0 + $0x1050] sm:$0xff]  ;;  %v568_v38 = vld [vmem:[%s11798_s0 + $0x1118] sm:$0xff]  ;;  %v210_v12 = vld [vmem:[%s11798_s0 + $0x5e8] sm:$0xff] }
 0x285   :  { %v6179_v9 = vpop.f32.mrb[200].mxu1  ;;  %v6243_v30 = vpop.f32.mrb[200].mxu0  ;;  %v1047_v52 = vpack.c.bf16 %v543_v56, %v519_v14 }
 0x286   :  { %v6180_v53 = vpop.f32.mrb[201].mxu1  ;;  %v6244_v5 = vpop.f32.mrb[201].mxu0 }
 0x287   :  { %v6181_v61 = vadd.f32 %v6180_v53, %v6179_v9  ;;  %v6245_v35 = vadd.f32 %v6244_v5, %v6243_v30  ;;  %v6182_v43 = vpop.f32.mrb[202].mxu1  ;;  %v6246_v19 = vpop.f32.mrb[202].mxu0 }
 0x288   :  { %v6183_v29 = vpop.f32.mrb[203].mxu1  ;;  %v6247_v7 = vpop.f32.mrb[203].mxu0 }
 0x289   :  { %v10381_v13 = vadd.f32 %v6181_v61, %v10063_v26  ;;  %v10384_v47 = vadd.f32 %v6245_v35, %v10066_v44  ;;  %v6184_v45 = vadd.f32 %v6183_v29, %v6182_v43  ;;  %v6248_v1 = vadd.f32 %v6247_v7, %v6246_v19  ;;  %v137_v44 = vld [vmem:[%s11798_s0 + $0x3a0] sm:$0xff] }
 0x28a   :  { %4270 = vmatmul.mubr.bf16.gmra.mrb[52].mxu1 %v1023_v51  ;;  %4367 = vmatmul.mubr.bf16.gmra.mrb[52].mxu0 %v833_v62  ;;  %v857_v37 = vpack.c.bf16 %v161_v28, %v137_v44  ;;  %v209_v7 = vld [vmem:[%s11798_s0 + $0x5e0] sm:$0xff] }
 0x28b   :  { %v10393_v10 = vadd.f32 %v6184_v45, %v10081_v32  ;;  %v10396_v26 = vadd.f32 %v6248_v1, %v10084_v2  ;;  %4277 = vmatprep.mubr.bf16.mxu1 %v1048_v17  ;;  %4374 = vmatprep.mubr.bf16.mxu0 %v858_v24  ;;  %v592_v32 = vld [vmem:[%s11798_s0 + $0x11d8] sm:$0xff]  ;;  %v186_v2 = vld [vmem:[%s11798_s0 + $0x528] sm:$0xff]  ;;  %v567_v17 = vld [vmem:[%s11798_s0 + $0x1110] sm:$0xff] }
 0x28c   :  { %v1072_v53 = vpack.c.bf16 %v592_v32, %v568_v38  ;;  %v882_v5 = vpack.c.bf16 %v210_v12, %v186_v2  ;;  %v591_v24 = vld [vmem:[%s11798_s0 + $0x11d0] sm:$0xff]  ;;  %v616_v45 = vld [vmem:[%s11798_s0 + $0x1298] sm:$0xff]  ;;  %v258_v1 = vld [vmem:[%s11798_s0 + $0x768] sm:$0xff] }
 0x28d   :  { %v6185_v11 = vpop.f32.mrb[204].mxu1  ;;  %v6249_v63 = vpop.f32.mrb[204].mxu0  ;;  %v1071_v38 = vpack.c.bf16 %v591_v24, %v567_v17 }
 0x28e   :  { %v6186_v58 = vpop.f32.mrb[205].mxu1  ;;  %v6250_v23 = vpop.f32.mrb[205].mxu0 }
 0x28f   :  { %v6187_v39 = vadd.f32 %v6186_v58, %v6185_v11  ;;  %v6251_v15 = vadd.f32 %v6250_v23, %v6249_v63  ;;  %v6188_v9 = vpop.f32.mrb[206].mxu1  ;;  %v6252_v30 = vpop.f32.mrb[206].mxu0 }
 0x290   :  { %v6189_v51 = vpop.f32.mrb[207].mxu1  ;;  %v6253_v62 = vpop.f32.mrb[207].mxu0 }
 0x291   :  { %v10417_v61 = vadd.f32 %v6187_v39, %v10111_v18  ;;  %v10420_v35 = vadd.f32 %v6251_v15, %v10114_v8  ;;  %v6190_v43 = vadd.f32 %v6189_v51, %v6188_v9  ;;  %v6254_v19 = vadd.f32 %v6253_v62, %v6252_v30  ;;  %v185_v8 = vld [vmem:[%s11798_s0 + $0x520] sm:$0xff] }
 0x292   :  { %4278 = vmatmul.mubr.bf16.gmra.mrb[56].mxu1 %v1047_v52  ;;  %4375 = vmatmul.mubr.bf16.gmra.mrb[56].mxu0 %v857_v37  ;;  %v881_v32 = vpack.c.bf16 %v209_v7, %v185_v8  ;;  %v257_v62 = vld [vmem:[%s11798_s0 + $0x760] sm:$0xff] }
 0x293   :  { %v10429_v29 = vadd.f32 %v6190_v43, %v10129_v57  ;;  %v10432_v18 = vadd.f32 %v6254_v19, %v10132_v41  ;;  %4285 = vmatprep.mubr.bf16.mxu1 %v1072_v53  ;;  %4382 = vmatprep.mubr.bf16.mxu0 %v882_v5  ;;  %v640_v57 = vld [vmem:[%s11798_s0 + $0x1358] sm:$0xff]  ;;  %v234_v41 = vld [vmem:[%s11798_s0 + $0x6a8] sm:$0xff]  ;;  %v615_v53 = vld [vmem:[%s11798_s0 + $0x1290] sm:$0xff] }
 0x294   :  { %v1096_v58 = vpack.c.bf16 %v640_v57, %v616_v45  ;;  %v906_v23 = vpack.c.bf16 %v258_v1, %v234_v41  ;;  %v639_v5 = vld [vmem:[%s11798_s0 + $0x1350] sm:$0xff]  ;;  %v664_v43 = vld [vmem:[%s11798_s0 + $0x1418] sm:$0xff]  ;;  %v306_v19 = vld [vmem:[%s11798_s0 + $0x8e8] sm:$0xff] }
 0x295   :  { %v6255_v14 = vpop.f32.mrb[208].mxu0  ;;  %v6319_v56 = vpop.f32.mrb[208].mxu1  ;;  %v1095_v45 = vpack.c.bf16 %v639_v5, %v615_v53 }
 0x296   :  { %v6256_v44 = vpop.f32.mrb[209].mxu0  ;;  %v6320_v28 = vpop.f32.mrb[209].mxu1 }
 0x297   :  { %v6257_v2 = vadd.f32 %v6256_v44, %v6255_v14  ;;  %v6321_v12 = vadd.f32 %v6320_v28, %v6319_v56  ;;  %v6258_v11 = vpop.f32.mrb[210].mxu0  ;;  %v6322_v63 = vpop.f32.mrb[210].mxu1 }
 0x298   :  { %v6259_v52 = vpop.f32.mrb[211].mxu0  ;;  %v6323_v37 = vpop.f32.mrb[211].mxu1 }
 0x299   :  { %v10453_v39 = vadd.f32 %v6257_v2, %v10159_v22  ;;  %v10456_v15 = vadd.f32 %v6321_v12, %v10162_v50  ;;  %v6260_v9 = vadd.f32 %v6259_v52, %v6258_v11  ;;  %v6324_v30 = vadd.f32 %v6323_v37, %v6322_v63  ;;  %v233_v50 = vld [vmem:[%s11798_s0 + $0x6a0] sm:$0xff] }
 0x29a   :  { %4286 = vmatmul.mubr.bf16.gmra.mrb[60].mxu1 %v1071_v38  ;;  %4383 = vmatmul.mubr.bf16.gmra.mrb[60].mxu0 %v881_v32  ;;  %v905_v57 = vpack.c.bf16 %v257_v62, %v233_v50  ;;  %v305_v37 = vld [vmem:[%s11798_s0 + $0x8e0] sm:$0xff] }
 0x29b   :  { %v10465_v51 = vadd.f32 %v6260_v9, %v10177_v27  ;;  %v10468_v22 = vadd.f32 %v6324_v30, %v10180_v31  ;;  %4293 = vmatprep.mubr.bf16.mxu1 %v1096_v58  ;;  %4390 = vmatprep.mubr.bf16.mxu0 %v906_v23  ;;  %v688_v27 = vld [vmem:[%s11798_s0 + $0x14d8] sm:$0xff]  ;;  %v282_v31 = vld [vmem:[%s11798_s0 + $0x828] sm:$0xff]  ;;  %v663_v58 = vld [vmem:[%s11798_s0 + $0x1410] sm:$0xff] }
 0x29c   :  { %v1120_v44 = vpack.c.bf16 %v688_v27, %v664_v43  ;;  %v930_v28 = vpack.c.bf16 %v306_v19, %v282_v31  ;;  %v687_v23 = vld [vmem:[%s11798_s0 + $0x14d0] sm:$0xff]  ;;  %v712_v9 = vld [vmem:[%s11798_s0 + $0x1598] sm:$0xff]  ;;  %v354_v30 = vld [vmem:[%s11798_s0 + $0xa68] sm:$0xff] }
 0x29d   :  { %v6261_v17 = vpop.f32.mrb[212].mxu0  ;;  %v6325_v24 = vpop.f32.mrb[212].mxu1  ;;  %v1119_v43 = vpack.c.bf16 %v687_v23, %v663_v58 }
 0x29e   :  { %v6262_v8 = vpop.f32.mrb[213].mxu0  ;;  %v6326_v7 = vpop.f32.mrb[213].mxu1 }
 0x29f   :  { %v6263_v41 = vadd.f32 %v6262_v8, %v6261_v17  ;;  %v6327_v1 = vadd.f32 %v6326_v7, %v6325_v24  ;;  %v6264_v14 = vpop.f32.mrb[214].mxu0  ;;  %v6328_v56 = vpop.f32.mrb[214].mxu1 }
 0x2a0   :  { %v6265_v38 = vpop.f32.mrb[215].mxu0  ;;  %v6329_v32 = vpop.f32.mrb[215].mxu1 }
 0x2a1   :  { %v10489_v2 = vadd.f32 %v6263_v41, %v10201_v33  ;;  %v10492_v12 = vadd.f32 %v6327_v1, %v10204_v60  ;;  %v6266_v11 = vadd.f32 %v6265_v38, %v6264_v14  ;;  %v6330_v63 = vadd.f32 %v6329_v32, %v6328_v56  ;;  %v281_v60 = vld [vmem:[%s11798_s0 + $0x820] sm:$0xff] }
 0x2a2   :  { %4294 = vmatmul.mubr.bf16.gmra.mrb[64].mxu1 %v1095_v45  ;;  %4391 = vmatmul.mubr.bf16.gmra.mrb[64].mxu0 %v905_v57  ;;  %v929_v27 = vpack.c.bf16 %v305_v37, %v281_v60  ;;  %v353_v32 = vld [vmem:[%s11798_s0 + $0xa60] sm:$0xff] }
 0x2a3   :  { %v10501_v52 = vadd.f32 %v6266_v11, %v10213_v6  ;;  %v10504_v33 = vadd.f32 %v6330_v63, %v10216_v48  ;;  %4301 = vmatprep.mubr.bf16.mxu1 %v1120_v44  ;;  %4398 = vmatprep.mubr.bf16.mxu0 %v930_v28  ;;  %v736_v6 = vld [vmem:[%s11798_s0 + $0x1658] sm:$0xff]  ;;  %v330_v48 = vld [vmem:[%s11798_s0 + $0x9a8] sm:$0xff]  ;;  %v711_v44 = vld [vmem:[%s11798_s0 + $0x1590] sm:$0xff] }
 0x2a4   :  { %v1144_v8 = vpack.c.bf16 %v736_v6, %v712_v9  ;;  %v954_v7 = vpack.c.bf16 %v354_v30, %v330_v48  ;;  %v735_v28 = vld [vmem:[%s11798_s0 + $0x1650] sm:$0xff]  ;;  %v760_v11 = vld [vmem:[%s11798_s0 + $0x1718] sm:$0xff]  ;;  %v402_v63 = vld [vmem:[%s11798_s0 + $0xbe8] sm:$0xff] }
 0x2a5   :  { %v6267_v53 = vpop.f32.mrb[216].mxu0  ;;  %v6331_v5 = vpop.f32.mrb[216].mxu1  ;;  %v1143_v9 = vpack.c.bf16 %v735_v28, %v711_v44 }
 0x2a6   :  { %v6268_v50 = vpop.f32.mrb[217].mxu0  ;;  %v6332_v62 = vpop.f32.mrb[217].mxu1 }
 0x2a7   :  { %v6269_v31 = vadd.f32 %v6268_v50, %v6267_v53  ;;  %v6333_v19 = vadd.f32 %v6332_v62, %v6331_v5  ;;  %v6270_v17 = vpop.f32.mrb[218].mxu0  ;;  %v6334_v24 = vpop.f32.mrb[218].mxu1 }
 0x2a8   :  { %v6271_v45 = vpop.f32.mrb[219].mxu0  ;;  %v6335_v57 = vpop.f32.mrb[219].mxu1 }
 0x2a9   :  { %v10525_v41 = vadd.f32 %v6269_v31, %v10237_v4  ;;  %v10528_v1 = vadd.f32 %v6333_v19, %v10240_v49  ;;  %v6272_v14 = vadd.f32 %v6271_v45, %v6270_v17  ;;  %v6336_v56 = vadd.f32 %v6335_v57, %v6334_v24  ;;  %v329_v49 = vld [vmem:[%s11798_s0 + $0x9a0] sm:$0xff] }
 0x2aa   :  { %4302 = vmatmul.mubr.bf16.gmra.mrb[68].mxu1 %v1119_v43  ;;  %4399 = vmatmul.mubr.bf16.gmra.mrb[68].mxu0 %v929_v27  ;;  %v953_v6 = vpack.c.bf16 %v353_v32, %v329_v49  ;;  %v401_v57 = vld [vmem:[%s11798_s0 + $0xbe0] sm:$0xff] }
 0x2ab   :  { %v10537_v38 = vadd.f32 %v6272_v14, %v10249_v46  ;;  %v10540_v4 = vadd.f32 %v6336_v56, %v10252_v42  ;;  %4309 = vmatprep.mubr.bf16.mxu1 %v1144_v8  ;;  %4406 = vmatprep.mubr.bf16.mxu0 %v954_v7  ;;  %v784_v46 = vld [vmem:[%s11798_s0 + $0x17d8] sm:$0xff]  ;;  %v378_v42 = vld [vmem:[%s11798_s0 + $0xb28] sm:$0xff]  ;;  %v759_v8 = vld [vmem:[%s11798_s0 + $0x1710] sm:$0xff] }
 0x2ac   :  { %v1168_v50 = vpack.c.bf16 %v784_v46, %v760_v11  ;;  %v978_v62 = vpack.c.bf16 %v402_v63, %v378_v42  ;;  %v783_v7 = vld [vmem:[%s11798_s0 + $0x17d0] sm:$0xff]  ;;  %v426_v14 = vld [vmem:[%s11798_s0 + $0xca8] sm:$0xff]  ;;  %v68_v56 = vld [vmem:[%s11798_s0 + $0x178] sm:$0xff] }
 0x2ad   :  { %v6273_v58 = vpop.f32.mrb[220].mxu0  ;;  %v6337_v23 = vpop.f32.mrb[220].mxu1  ;;  %v1167_v11 = vpack.c.bf16 %v783_v7, %v759_v8 }
 0x2ae   :  { %v6274_v60 = vpop.f32.mrb[221].mxu0  ;;  %v6338_v37 = vpop.f32.mrb[221].mxu1 }
 0x2af   :  { %v6275_v48 = vadd.f32 %v6274_v60, %v6273_v58  ;;  %v6339_v30 = vadd.f32 %v6338_v37, %v6337_v23  ;;  %v6276_v53 = vpop.f32.mrb[222].mxu0  ;;  %v6340_v5 = vpop.f32.mrb[222].mxu1 }
 0x2b0   :  { %v6277_v43 = vpop.f32.mrb[223].mxu0  ;;  %v6341_v27 = vpop.f32.mrb[223].mxu1 }
 0x2b1   :  { %v10561_v31 = vadd.f32 %v6275_v48, %v10273_v20  ;;  %v10564_v19 = vadd.f32 %v6339_v30, %v10276_v55  ;;  %v6278_v17 = vadd.f32 %v6277_v43, %v6276_v53  ;;  %v6342_v24 = vadd.f32 %v6341_v27, %v6340_v5  ;;  %v377_v55 = vld [vmem:[%s11798_s0 + $0xb20] sm:$0xff]  ;;  %v67_v27 = vld [vmem:[%s11798_s0 + $0x170] sm:$0xff] }
 0x2b2   :  { %4310 = vmatmul.mubr.bf16.gmra.mrb[72].mxu1 %v1143_v9  ;;  %4407 = vmatmul.mubr.bf16.gmra.mrb[72].mxu0 %v953_v6  ;;  %v977_v46 = vpack.c.bf16 %v401_v57, %v377_v55 }
 0x2b3   :  { %v10573_v45 = vadd.f32 %v6278_v17, %v10285_v34  ;;  %v10576_v20 = vadd.f32 %v6342_v24, %v10288_v3  ;;  %4317 = vmatprep.mubr.bf16.mxu1 %v1168_v50  ;;  %4414 = vmatprep.mubr.bf16.mxu0 %v978_v62  ;;  %v450_v34 = vld [vmem:[%s11798_s0 + $0xd68] sm:$0xff]  ;;  %v44_v3 = vld [vmem:[%s11798_s0 + $0xb8] sm:$0xff]  ;;  %v425_v50 = vld [vmem:[%s11798_s0 + $0xca0] sm:$0xff] }
 0x2b4   :  { %v1002_v60 = vpack.c.bf16 %v450_v34, %v426_v14  ;;  %v812_v37 = vpack.c.bf16 %v68_v56, %v44_v3  ;;  %v449_v62 = vld [vmem:[%s11798_s0 + $0xd60] sm:$0xff]  ;;  %v474_v17 = vld [vmem:[%s11798_s0 + $0xe28] sm:$0xff]  ;;  %v116_v24 = vld [vmem:[%s11798_s0 + $0x2f8] sm:$0xff] }
 0x2b5   :  { %v6279_v44 = vpop.f32.mrb[224].mxu0  ;;  %v6343_v28 = vpop.f32.mrb[224].mxu1  ;;  %v1001_v14 = vpack.c.bf16 %v449_v62, %v425_v50 }
 0x2b6   :  { %v6280_v49 = vpop.f32.mrb[225].mxu0  ;;  %v6344_v32 = vpop.f32.mrb[225].mxu1 }
 0x2b7   :  { %v6281_v42 = vadd.f32 %v6280_v49, %v6279_v44  ;;  %v6345_v63 = vadd.f32 %v6344_v32, %v6343_v28  ;;  %v6282_v58 = vpop.f32.mrb[226].mxu0  ;;  %v6346_v23 = vpop.f32.mrb[226].mxu1 }
 0x2b8   :  { %v6283_v9 = vpop.f32.mrb[227].mxu0  ;;  %v6347_v6 = vpop.f32.mrb[227].mxu1 }
 0x2b9   :  { %v10597_v48 = vadd.f32 %v6281_v42, %v10309_v36  ;;  %v10600_v30 = vadd.f32 %v6345_v63, %v10312_v21  ;;  %v6284_v53 = vadd.f32 %v6283_v9, %v6282_v58  ;;  %v6348_v5 = vadd.f32 %v6347_v6, %v6346_v23  ;;  %v43_v21 = vld [vmem:[%s11798_s0 + $0xb0] sm:$0xff] }
 0x2ba   :  { %4318 = vmatmul.mubr.bf16.gmra.mrb[76].mxu1 %v1167_v11  ;;  %4415 = vmatmul.mubr.bf16.gmra.mrb[76].mxu0 %v977_v46  ;;  %v811_v34 = vpack.c.bf16 %v67_v27, %v43_v21  ;;  %v115_v6 = vld [vmem:[%s11798_s0 + $0x2f0] sm:$0xff] }
 0x2bb   :  { %v10609_v43 = vadd.f32 %v6284_v53, %v10321_v16  ;;  %v10612_v36 = vadd.f32 %v6348_v5, %v10324_v40  ;;  %4422 = vmatprep.mubr.bf16.mxu0 %v1002_v60  ;;  %4519 = vmatprep.mubr.bf16.mxu1 %v812_v37  ;;  %v498_v16 = vld [vmem:[%s11798_s0 + $0xee8] sm:$0xff]  ;;  %v92_v40 = vld [vmem:[%s11798_s0 + $0x238] sm:$0xff]  ;;  %v473_v60 = vld [vmem:[%s11798_s0 + $0xe20] sm:$0xff] }
 0x2bc   :  { %v1026_v49 = vpack.c.bf16 %v498_v16, %v474_v17  ;;  %v836_v32 = vpack.c.bf16 %v116_v24, %v92_v40  ;;  %v497_v37 = vld [vmem:[%s11798_s0 + $0xee0] sm:$0xff]  ;;  %v522_v53 = vld [vmem:[%s11798_s0 + $0xfa8] sm:$0xff]  ;;  %v164_v5 = vld [vmem:[%s11798_s0 + $0x478] sm:$0xff] }
 0x2bd   :  { %v6285_v8 = vpop.f32.mrb[228].mxu0  ;;  %v6349_v7 = vpop.f32.mrb[228].mxu1  ;;  %v1025_v17 = vpack.c.bf16 %v497_v37, %v473_v60 }
 0x2be   :  { %v6286_v55 = vpop.f32.mrb[229].mxu0  ;;  %v6350_v57 = vpop.f32.mrb[229].mxu1 }
 0x2bf   :  { %v6287_v3 = vadd.f32 %v6286_v55, %v6285_v8  ;;  %v6351_v56 = vadd.f32 %v6350_v57, %v6349_v7  ;;  %v6288_v44 = vpop.f32.mrb[230].mxu0  ;;  %v6352_v28 = vpop.f32.mrb[230].mxu1 }
 0x2c0   :  { %v6289_v11 = vpop.f32.mrb[231].mxu0  ;;  %v6353_v46 = vpop.f32.mrb[231].mxu1 }
 0x2c1   :  { %v10633_v42 = vadd.f32 %v6287_v3, %v10345_v54  ;;  %v10636_v63 = vadd.f32 %v6351_v56, %v10348_v0  ;;  %v6290_v58 = vadd.f32 %v6289_v11, %v6288_v44  ;;  %v6354_v23 = vadd.f32 %v6353_v46, %v6352_v28  ;;  %v91_v0 = vld [vmem:[%s11798_s0 + $0x230] sm:$0xff] }
 0x2c2   :  { %4423 = vmatmul.mubr.bf16.gmra.mrb[80].mxu0 %v1001_v14  ;;  %4520 = vmatmul.mubr.bf16.vlgmr.msra.gmra.mrb[80].mxu1 %v811_v34  ;;  %v835_v16 = vpack.c.bf16 %v115_v6, %v91_v0  ;;  %v163_v46 = vld [vmem:[%s11798_s0 + $0x470] sm:$0xff] }
 0x2c3   :  { %v10645_v9 = vadd.f32 %v6290_v58, %v10357_v59  ;;  %v10648_v54 = vadd.f32 %v6354_v23, %v10360_v25  ;;  %4430 = vmatprep.mubr.bf16.mxu0 %v1026_v49  ;;  %4527 = vmatprep.mubr.bf16.mxu1 %v836_v32  ;;  %v546_v59 = vld [vmem:[%s11798_s0 + $0x1068] sm:$0xff]  ;;  %v140_v25 = vld [vmem:[%s11798_s0 + $0x3b8] sm:$0xff]  ;;  %v521_v49 = vld [vmem:[%s11798_s0 + $0xfa0] sm:$0xff] }
 0x2c4   :  { %v1050_v55 = vpack.c.bf16 %v546_v59, %v522_v53  ;;  %v860_v57 = vpack.c.bf16 %v164_v5, %v140_v25  ;;  %v545_v32 = vld [vmem:[%s11798_s0 + $0x1060] sm:$0xff]  ;;  %v570_v58 = vld [vmem:[%s11798_s0 + $0x1128] sm:$0xff]  ;;  %v212_v23 = vld [vmem:[%s11798_s0 + $0x5f8] sm:$0xff] }
 0x2c5   :  { %v6291_v50 = vpop.f32.mrb[232].mxu0  ;;  %v6355_v62 = vpop.f32.mrb[232].mxu1  ;;  %v1049_v53 = vpack.c.bf16 %v545_v32, %v521_v49 }
 0x2c6   :  { %v6292_v21 = vpop.f32.mrb[233].mxu0  ;;  %v6356_v27 = vpop.f32.mrb[233].mxu1 }
 0x2c7   :  { %v6293_v40 = vadd.f32 %v6292_v21, %v6291_v50  ;;  %v6357_v24 = vadd.f32 %v6356_v27, %v6355_v62  ;;  %v6294_v8 = vpop.f32.mrb[234].mxu0  ;;  %v6358_v7 = vpop.f32.mrb[234].mxu1 }
 0x2c8   :  { %v6295_v14 = vpop.f32.mrb[235].mxu0  ;;  %v6359_v34 = vpop.f32.mrb[235].mxu1 }
 0x2c9   :  { %v10669_v3 = vadd.f32 %v6293_v40, %v10381_v13  ;;  %v10672_v56 = vadd.f32 %v6357_v24, %v10384_v47  ;;  %v6296_v44 = vadd.f32 %v6295_v14, %v6294_v8  ;;  %v6360_v28 = vadd.f32 %v6359_v34, %v6358_v7  ;;  %v139_v47 = vld [vmem:[%s11798_s0 + $0x3b0] sm:$0xff] }
 0x2ca   :  { %4431 = vmatmul.mubr.bf16.gmra.mrb[84].mxu0 %v1025_v17  ;;  %4528 = vmatmul.mubr.bf16.gmra.mrb[84].mxu1 %v835_v16  ;;  %v859_v59 = vpack.c.bf16 %v163_v46, %v139_v47  ;;  %v211_v34 = vld [vmem:[%s11798_s0 + $0x5f0] sm:$0xff] }
 0x2cb   :  { %v10681_v11 = vadd.f32 %v6296_v44, %v10393_v10  ;;  %v10684_v13 = vadd.f32 %v6360_v28, %v10396_v26  ;;  %4438 = vmatprep.mubr.bf16.mxu0 %v1050_v55  ;;  %4535 = vmatprep.mubr.bf16.mxu1 %v860_v57  ;;  %v594_v10 = vld [vmem:[%s11798_s0 + $0x11e8] sm:$0xff]  ;;  %v188_v26 = vld [vmem:[%s11798_s0 + $0x538] sm:$0xff]  ;;  %v569_v55 = vld [vmem:[%s11798_s0 + $0x1120] sm:$0xff] }
 0x2cc   :  { %v1074_v21 = vpack.c.bf16 %v594_v10, %v570_v58  ;;  %v884_v27 = vpack.c.bf16 %v212_v23, %v188_v26  ;;  %v593_v57 = vld [vmem:[%s11798_s0 + $0x11e0] sm:$0xff]  ;;  %v618_v44 = vld [vmem:[%s11798_s0 + $0x12a8] sm:$0xff]  ;;  %v260_v28 = vld [vmem:[%s11798_s0 + $0x778] sm:$0xff] }
 0x2cd   :  { %v6297_v60 = vpop.f32.mrb[236].mxu0  ;;  %v6361_v37 = vpop.f32.mrb[236].mxu1  ;;  %v1073_v58 = vpack.c.bf16 %v593_v57, %v569_v55 }
 0x2ce   :  { %v6298_v0 = vpop.f32.mrb[237].mxu0  ;;  %v6362_v6 = vpop.f32.mrb[237].mxu1 }
 0x2cf   :  { %v6299_v25 = vadd.f32 %v6298_v0, %v6297_v60  ;;  %v6363_v5 = vadd.f32 %v6362_v6, %v6361_v37  ;;  %v6300_v50 = vpop.f32.mrb[238].mxu0  ;;  %v6364_v62 = vpop.f32.mrb[238].mxu1 }
 0x2d0   :  { %v6301_v17 = vpop.f32.mrb[239].mxu0  ;;  %v6365_v16 = vpop.f32.mrb[239].mxu1 }
 0x2d1   :  { %v10705_v40 = vadd.f32 %v6299_v25, %v10417_v61  ;;  %v10708_v24 = vadd.f32 %v6363_v5, %v10420_v35  ;;  %v6302_v8 = vadd.f32 %v6301_v17, %v6300_v50  ;;  %v6366_v7 = vadd.f32 %v6365_v16, %v6364_v62  ;;  %v187_v35 = vld [vmem:[%s11798_s0 + $0x530] sm:$0xff] }
 0x2d2   :  { %4439 = vmatmul.mubr.bf16.gmra.mrb[88].mxu0 %v1049_v53  ;;  %4536 = vmatmul.mubr.bf16.gmra.mrb[88].mxu1 %v859_v59  ;;  %v883_v10 = vpack.c.bf16 %v211_v34, %v187_v35  ;;  %v259_v16 = vld [vmem:[%s11798_s0 + $0x770] sm:$0xff] }
 0x2d3   :  { %v10717_v14 = vadd.f32 %v6302_v8, %v10429_v29  ;;  %v10720_v61 = vadd.f32 %v6366_v7, %v10432_v18  ;;  %4446 = vmatprep.mubr.bf16.mxu0 %v1074_v21  ;;  %4543 = vmatprep.mubr.bf16.mxu1 %v884_v27  ;;  %v642_v29 = vld [vmem:[%s11798_s0 + $0x1368] sm:$0xff]  ;;  %v236_v18 = vld [vmem:[%s11798_s0 + $0x6b8] sm:$0xff]  ;;  %v617_v21 = vld [vmem:[%s11798_s0 + $0x12a0] sm:$0xff] }
 0x2d4   :  { %v1098_v0 = vpack.c.bf16 %v642_v29, %v618_v44  ;;  %v908_v6 = vpack.c.bf16 %v260_v28, %v236_v18  ;;  %v641_v27 = vld [vmem:[%s11798_s0 + $0x1360] sm:$0xff]  ;;  %v666_v8 = vld [vmem:[%s11798_s0 + $0x1428] sm:$0xff]  ;;  %v308_v7 = vld [vmem:[%s11798_s0 + $0x8f8] sm:$0xff] }
 0x2d5   :  { %v6367_v49 = vpop.f32.mrb[240].mxu1  ;;  %v6431_v32 = vpop.f32.mrb[240].mxu0  ;;  %v1097_v44 = vpack.c.bf16 %v641_v27, %v617_v21  ;;  %v332_v21 = vld [vmem:[%s11798_s0 + $0x9b8] sm:$0xff] }
 0x2d6   :  { %v6368_v47 = vpop.f32.mrb[241].mxu1  ;;  %v6432_v46 = vpop.f32.mrb[241].mxu0  ;;  %v356_v27 = vld [vmem:[%s11798_s0 + $0xa78] sm:$0xff] }
 0x2d7   :  { %v6369_v26 = vadd.f32 %v6368_v47, %v6367_v49  ;;  %v6433_v23 = vadd.f32 %v6432_v46, %v6431_v32  ;;  %v6370_v60 = vpop.f32.mrb[242].mxu1  ;;  %v6434_v37 = vpop.f32.mrb[242].mxu0 }
 0x2d8   :  { %v6371_v53 = vpop.f32.mrb[243].mxu1  ;;  %v6435_v59 = vpop.f32.mrb[243].mxu0 }
 0x2d9   :  { %v10741_v25 = vadd.f32 %v6369_v26, %v10453_v39  ;;  %v10744_v5 = vadd.f32 %v6433_v23, %v10456_v15  ;;  %v6372_v50 = vadd.f32 %v6371_v53, %v6370_v60  ;;  %v6436_v62 = vadd.f32 %v6435_v59, %v6434_v37  ;;  %v235_v15 = vld [vmem:[%s11798_s0 + $0x6b0] sm:$0xff]  ;;  %v714_v53 = vld [vmem:[%s11798_s0 + $0x15a8] sm:$0xff] }
 0x2da   :  { %4447 = vmatmul.mubr.bf16.gmra.mrb[92].mxu0 %v1073_v58  ;;  %4544 = vmatmul.mubr.bf16.gmra.mrb[92].mxu1 %v883_v10  ;;  %v907_v29 = vpack.c.bf16 %v259_v16, %v235_v15 }
 0x2db   :  { %v10753_v17 = vadd.f32 %v6372_v50, %v10465_v51  ;;  %v10756_v39 = vadd.f32 %v6436_v62, %v10468_v22  ;;  %4454 = vmatprep.mubr.bf16.mxu0 %v1098_v0  ;;  %4551 = vmatprep.mubr.bf16.mxu1 %v908_v6  ;;  %v690_v51 = vld [vmem:[%s11798_s0 + $0x14e8] sm:$0xff]  ;;  %v284_v22 = vld [vmem:[%s11798_s0 + $0x838] sm:$0xff]  ;;  %v665_v0 = vld [vmem:[%s11798_s0 + $0x1420] sm:$0xff] }
 0x2dc   :  { %v1122_v47 = vpack.c.bf16 %v690_v51, %v666_v8  ;;  %v932_v46 = vpack.c.bf16 %v308_v7, %v284_v22  ;;  %v689_v6 = vld [vmem:[%s11798_s0 + $0x14e0] sm:$0xff]  ;;  %v738_v62 = vld [vmem:[%s11798_s0 + $0x1668] sm:$0xff] }
 0x2dd   :  { %v6373_v55 = vpop.f32.mrb[244].mxu1  ;;  %v6437_v57 = vpop.f32.mrb[244].mxu0  ;;  %v1121_v51 = vpack.c.bf16 %v689_v6, %v665_v0  ;;  %v404_v0 = vld [vmem:[%s11798_s0 + $0xbf8] sm:$0xff] }
 0x2de   :  { %v6374_v35 = vpop.f32.mrb[245].mxu1  ;;  %v6438_v34 = vpop.f32.mrb[245].mxu0 }
 0x2df   :  { %v6375_v18 = vadd.f32 %v6374_v35, %v6373_v55  ;;  %v6439_v28 = vadd.f32 %v6438_v34, %v6437_v57  ;;  %v6376_v49 = vpop.f32.mrb[246].mxu1  ;;  %v6440_v32 = vpop.f32.mrb[246].mxu0  ;;  %v1146_v34 = vpack.c.bf16 %v738_v62, %v714_v53 }
 0x2e0   :  { %v6377_v58 = vpop.f32.mrb[247].mxu1  ;;  %v6441_v10 = vpop.f32.mrb[247].mxu0 }
 0x2e1   :  { %v10777_v26 = vadd.f32 %v6375_v18, %v10489_v2  ;;  %v10780_v23 = vadd.f32 %v6439_v28, %v10492_v12  ;;  %v6378_v60 = vadd.f32 %v6377_v58, %v6376_v49  ;;  %v6442_v37 = vadd.f32 %v6441_v10, %v6440_v32  ;;  %v283_v2 = vld [vmem:[%s11798_s0 + $0x830] sm:$0xff]  ;;  %v737_v58 = vld [vmem:[%s11798_s0 + $0x1660] sm:$0xff] }
 0x2e2   :  { %4455 = vmatmul.mubr.bf16.gmra.mrb[96].mxu0 %v1097_v44  ;;  %4552 = vmatmul.mubr.bf16.gmra.mrb[96].mxu1 %v907_v29  ;;  %v307_v12 = vld [vmem:[%s11798_s0 + $0x8f0] sm:$0xff]  ;;  %v956_v44 = vpack.c.bf16 %v356_v27, %v332_v21 }
 0x2e3   :  { %v10798_v59 = vadd.f32 %v6378_v60, %v10501_v52  ;;  %v10801_v50 = vadd.f32 %v6442_v37, %v10504_v33  ;;  %4462 = vmatprep.mubr.bf16.mxu0 %v1122_v47  ;;  %4559 = vmatprep.mubr.bf16.mxu1 %v932_v46  ;;  %v7143_v52 = vld [vmem:[%s11800_s3] sm:$0xff]   ;;  %v931_v22 = vpack.c.bf16 %v307_v12, %v283_v2  ;;  %v355_v60 = vld [vmem:[%s11798_s0 + $0xa70] sm:$0xff]  ;;  %v762_v37 = vld [vmem:[%s11798_s0 + $0x1728] sm:$0xff] }
 0x2e4   :  { %6887 = vmatprep.subr.bf16.mxu0 %v7143_v52  ;;  %v713_v46 = vld [vmem:[%s11798_s0 + $0x15a0] sm:$0xff] }
 0x2e5   :  { %v6379_v33 = vpop.f32.mrb[248].mxu1  ;;  %v6443_v15 = vpop.f32.mrb[248].mxu0  ;;  %6888 = vmatpush3.bf16.msra.mxu0 %v7143_v52  ;;  %v1145_v62 = vpack.c.bf16 %v737_v58, %v713_v46 }
 0x2e6   :  { %v6380_v16 = vpop.f32.mrb[249].mxu1  ;;  %v6444_v8 = vpop.f32.mrb[249].mxu0 }
 0x2e7   :  { %v6381_v7 = vadd.f32 %v6380_v16, %v6379_v33  ;;  %v6445_v55 = vadd.f32 %v6444_v8, %v6443_v15  ;;  %v6382_v57 = vpop.f32.mrb[250].mxu1  ;;  %v6446_v35 = vpop.f32.mrb[250].mxu0 }
 0x2e8   :  { %v6383_v29 = vpop.f32.mrb[251].mxu1  ;;  %v6447_v18 = vpop.f32.mrb[251].mxu0 }
 0x2e9   :  { %v10816_v28 = vadd.f32 %v6381_v7, %v10525_v41  ;;  %v10819_v49 = vadd.f32 %v6445_v55, %v10528_v1  ;;  %v6384_v32 = vadd.f32 %v6383_v29, %v6382_v57  ;;  %v6448_v47 = vadd.f32 %v6447_v18, %v6446_v35  ;;  %v331_v1 = vld [vmem:[%s11798_s0 + $0x9b0] sm:$0xff] }
 0x2ea   :  { %4463 = vmatmul.mubr.bf16.gmra.mrb[100].mxu0 %v1121_v51  ;;  %4560 = vmatmul.mubr.bf16.gmra.mrb[100].mxu1 %v931_v22  ;;  %v955_v21 = vpack.c.bf16 %v355_v60, %v331_v1  ;;  %v403_v18 = vld [vmem:[%s11798_s0 + $0xbf0] sm:$0xff] }
 0x2eb   :  { %v10828_v10 = vadd.f32 %v6384_v32, %v10537_v38  ;;  %v10831_v41 = vadd.f32 %v6448_v47, %v10540_v4  ;;  %4470 = vmatprep.mubr.bf16.mxu0 %v1146_v34  ;;  %4567 = vmatprep.mubr.bf16.mxu1 %v956_v44  ;;  %v786_v38 = vld [vmem:[%s11798_s0 + $0x17e8] sm:$0xff]  ;;  %v380_v4 = vld [vmem:[%s11798_s0 + $0xb38] sm:$0xff]  ;;  %v761_v34 = vld [vmem:[%s11798_s0 + $0x1720] sm:$0xff] }
 0x2ec   :  { %v1170_v16 = vpack.c.bf16 %v786_v38, %v762_v37  ;;  %v980_v8 = vpack.c.bf16 %v404_v0, %v380_v4  ;;  %v785_v44 = vld [vmem:[%s11798_s0 + $0x17e0] sm:$0xff]  ;;  %v7144_v32 = vld [vmem:[%s11800_s3 + $0x8] sm:$0xff]  }
 0x2ed   :  { %v6385_v6 = vpop.f32.mrb[252].mxu1  ;;  %v6449_v2 = vpop.f32.mrb[252].mxu0  ;;  %6889 = vmatprep.subr.bf16.mxu0 %v7144_v32  ;;  %v1169_v60 = vpack.c.bf16 %v785_v44, %v761_v34 }
 0x2ee   :  { %v6386_v12 = vpop.f32.mrb[253].mxu1  ;;  %v6450_v53 = vpop.f32.mrb[253].mxu0  ;;  %6890 = vmatpush3.bf16.msra.mxu0 %v7144_v32 }
 0x2ef   :  { %v6387_v27 = vadd.f32 %v6386_v12, %v6385_v6  ;;  %v6451_v52 = vadd.f32 %v6450_v53, %v6449_v2  ;;  %v6388_v33 = vpop.f32.mrb[254].mxu1  ;;  %v6452_v15 = vpop.f32.mrb[254].mxu0 }
 0x2f0   :  { %v6389_v51 = vpop.f32.mrb[255].mxu1  ;;  %v6453_v22 = vpop.f32.mrb[255].mxu0 }
 0x2f1   :  { %v10852_v7 = vadd.f32 %v6387_v27, %v10561_v31  ;;  %v10855_v55 = vadd.f32 %v6451_v52, %v10564_v19  ;;  %v6390_v57 = vadd.f32 %v6389_v51, %v6388_v33  ;;  %v6454_v35 = vadd.f32 %v6453_v22, %v6452_v15  ;;  %v379_v19 = vld [vmem:[%s11798_s0 + $0xb30] sm:$0xff] }
 0x2f2   :  { %4471 = vmatmul.mubr.bf16.gmra.mrb[104].mxu0 %v1145_v62  ;;  %4568 = vmatmul.mubr.bf16.gmra.mrb[104].mxu1 %v955_v21  ;;  %v979_v37 = vpack.c.bf16 %v403_v18, %v379_v19 }
 0x2f3   :  { %v10864_v29 = vadd.f32 %v6390_v57, %v10573_v45  ;;  %v10867_v31 = vadd.f32 %v6454_v35, %v10576_v20  ;;  %4478 = vmatprep.mubr.bf16.mxu0 %v1170_v16  ;;  %4575 = vmatprep.mubr.bf16.mxu1 %v980_v8  ;;  %v428_v45 = vld [vmem:[%s11798_s0 + $0xcb8] sm:$0xff]  ;;  %v427_v16 = vld [vmem:[%s11798_s0 + $0xcb0] sm:$0xff] }
 0x2f4   :  { %v452_v20 = vld [vmem:[%s11798_s0 + $0xd78] sm:$0xff] }
 0x2f5   :  { %v6391_v47 = vpop.f32.mrb[0].mxu1  ;;  %v6455_v46 = vpop.f32.mrb[0].mxu0  ;;  %v1004_v2 = vpack.c.bf16 %v452_v20, %v428_v45 }
 0x2f6   :  { %v6392_v58 = vpop.f32.mrb[1].mxu1  ;;  %v6456_v1 = vpop.f32.mrb[1].mxu0 }
 0x2f7   :  { %v6393_v38 = vadd.f32 %v6392_v58, %v6391_v47  ;;  %v6457_v4 = vadd.f32 %v6456_v1, %v6455_v46  ;;  %v6394_v0 = vpop.f32.mrb[2].mxu1  ;;  %v6458_v6 = vpop.f32.mrb[2].mxu0 }
 0x2f8   :  { %v6395_v12 = vpop.f32.mrb[3].mxu1  ;;  %v6459_v53 = vpop.f32.mrb[3].mxu0 }
 0x2f9   :  { %v10885_v62 = vadd.f32 %v6393_v38, %v10597_v48  ;;  %v10888_v21 = vadd.f32 %v6457_v4, %v10600_v30  ;;  %v6396_v27 = vadd.f32 %v6395_v12, %v6394_v0  ;;  %v6460_v52 = vadd.f32 %v6459_v53, %v6458_v6  ;;  %v451_v48 = vld [vmem:[%s11798_s0 + $0xd70] sm:$0xff]  ;;  %v476_v30 = vld [vmem:[%s11798_s0 + $0xe38] sm:$0xff] }
 0x2fa   :  { %4479 = vmatmul.mubr.bf16.gmra.mrb[108].mxu0 %v1169_v60  ;;  %4576 = vmatmul.mubr.bf16.gmra.mrb[108].mxu1 %v979_v37  ;;  %v1003_v57 = vpack.c.bf16 %v451_v48, %v427_v16  ;;  %v475_v37 = vld [vmem:[%s11798_s0 + $0xe30] sm:$0xff] }
 0x2fb   :  { %v10891_v33 = vadd.f32 %v6396_v27, %v10609_v43  ;;  %v10894_v15 = vadd.f32 %v6460_v52, %v10612_v36  ;;  %4583 = vmatprep.mubr.bf16.mxu1 %v1004_v2  ;;  %v500_v43 = vld [vmem:[%s11798_s0 + $0xef8] sm:$0xff] }
 0x2fc   :  { %v1028_v18 = vpack.c.bf16 %v500_v43, %v476_v30 }
 0x2fd   :  { %v6397_v8 = vpop.f32.mrb[4].mxu1  ;;  %v6461_v36 = vpop.f32.mrb[4].mxu0 }
 0x2fe   :  { %v6398_v51 = vpop.f32.mrb[5].mxu1  ;;  %v6462_v22 = vpop.f32.mrb[5].mxu0 }
 0x2ff   :  { %v6399_v35 = vadd.f32 %v6398_v51, %v6397_v8  ;;  %v6463_v34 = vadd.f32 %v6462_v22, %v6461_v36  ;;  %v6400_v44 = vpop.f32.mrb[6].mxu1  ;;  %v6464_v19 = vpop.f32.mrb[6].mxu0 }
 0x300   :  { %v6401_v32 = vpop.f32.mrb[7].mxu1  ;;  %v6465_v45 = vpop.f32.mrb[7].mxu0 }
 0x301   :  { %v10909_v20 = vadd.f32 %v6399_v35, %v10633_v42  ;;  %v10912_v47 = vadd.f32 %v6463_v34, %v10636_v63  ;;  %v6402_v46 = vadd.f32 %v6401_v32, %v6400_v44  ;;  %v6466_v58 = vadd.f32 %v6465_v45, %v6464_v19  ;;  %v499_v42 = vld [vmem:[%s11798_s0 + $0xef0] sm:$0xff] }
 0x302   :  { %4584 = vmatmul.mubr.bf16.gmra.mrb[112].mxu1 %v1003_v57  ;;  %v7145_v63 = vld [vmem:[%s11800_s3 + $0x10] sm:$0xff]   ;;  %v1027_v2 = vpack.c.bf16 %v499_v42, %v475_v37 }
 0x303   :  { %v10915_v1 = vadd.f32 %v6402_v46, %v10645_v9  ;;  %v10918_v60 = vadd.f32 %v6466_v58, %v10648_v54  ;;  %4591 = vmatprep.mubr.bf16.mxu1 %v1028_v18  ;;  %v524_v9 = vld [vmem:[%s11798_s0 + $0xfb8] sm:$0xff]  ;;  %6891 = vmatprep.subr.bf16.mxu0 %v7145_v63  ;;  %v523_v35 = vld [vmem:[%s11798_s0 + $0xfb0] sm:$0xff] }
 0x304   :  { %v548_v54 = vld [vmem:[%s11798_s0 + $0x1078] sm:$0xff]  ;;  %6892 = vmatpush3.bf16.msra.mxu0 %v7145_v63 }
 0x305   :  { %v6403_v38 = vpop.f32.mrb[8].mxu1  ;;  %v6467_v4 = vpop.f32.mrb[8].mxu0  ;;  %v1052_v16 = vpack.c.bf16 %v548_v54, %v524_v9 }
 0x306   :  { %v6404_v0 = vpop.f32.mrb[9].mxu1  ;;  %v6468_v6 = vpop.f32.mrb[9].mxu0 }
 0x307   :  { %v6405_v12 = vadd.f32 %v6404_v0, %v6403_v38  ;;  %v6469_v53 = vadd.f32 %v6468_v6, %v6467_v4  ;;  %v6406_v27 = vpop.f32.mrb[10].mxu1  ;;  %v6470_v52 = vpop.f32.mrb[10].mxu0 }
 0x308   :  { %v6407_v48 = vpop.f32.mrb[11].mxu1  ;;  %v6471_v30 = vpop.f32.mrb[11].mxu0 }
 0x309   :  { %v10936_v43 = vadd.f32 %v6405_v12, %v10669_v3  ;;  %v10939_v8 = vadd.f32 %v6469_v53, %v10672_v56  ;;  %v6408_v36 = vadd.f32 %v6407_v48, %v6406_v27  ;;  %v6472_v51 = vadd.f32 %v6471_v30, %v6470_v52  ;;  %v547_v3 = vld [vmem:[%s11798_s0 + $0x1070] sm:$0xff]  ;;  %v572_v56 = vld [vmem:[%s11798_s0 + $0x1138] sm:$0xff] }
 0x30a   :  { %4592 = vmatmul.mubr.bf16.gmra.mrb[116].mxu1 %v1027_v2  ;;  %v1051_v18 = vpack.c.bf16 %v547_v3, %v523_v35  ;;  %v571_v2 = vld [vmem:[%s11798_s0 + $0x1130] sm:$0xff]  ;;  %v7147_v3 = vld [vmem:[%s11800_s3 + $0x20] sm:$0xff]  }
 0x30b   :  { %v10942_v22 = vadd.f32 %v6408_v36, %v10681_v11  ;;  %v10945_v57 = vadd.f32 %v6472_v51, %v10684_v13  ;;  %4599 = vmatprep.mubr.bf16.mxu1 %v1052_v16  ;;  %v596_v11 = vld [vmem:[%s11798_s0 + $0x11f8] sm:$0xff] }
 0x30c   :  { %v1076_v37 = vpack.c.bf16 %v596_v11, %v572_v56 }
 0x30d   :  { %v6409_v34 = vpop.f32.mrb[12].mxu1  ;;  %v6473_v13 = vpop.f32.mrb[12].mxu0 }
 0x30e   :  { %v6410_v44 = vpop.f32.mrb[13].mxu1  ;;  %v6474_v19 = vpop.f32.mrb[13].mxu0 }
 0x30f   :  { %v6411_v32 = vadd.f32 %v6410_v44, %v6409_v34  ;;  %v6475_v45 = vadd.f32 %v6474_v19, %v6473_v13  ;;  %v6412_v46 = vpop.f32.mrb[14].mxu1  ;;  %v6476_v58 = vpop.f32.mrb[14].mxu0 }
 0x310   :  { %v6413_v42 = vpop.f32.mrb[15].mxu1  ;;  %v6477_v63 = vpop.f32.mrb[15].mxu0 }
 0x311   :  { %v10960_v9 = vadd.f32 %v6411_v32, %v10705_v40  ;;  %v10963_v54 = vadd.f32 %v6475_v45, %v10708_v24  ;;  %v6414_v38 = vadd.f32 %v6413_v42, %v6412_v46  ;;  %v6478_v4 = vadd.f32 %v6477_v63, %v6476_v58  ;;  %v595_v40 = vld [vmem:[%s11798_s0 + $0x11f0] sm:$0xff]  ;;  %v7146_v24 = vld [vmem:[%s11800_s3 + $0x18] sm:$0xff]   ;;  %v7148_v45 = vld [vmem:[%s11800_s3 + $0x28] sm:$0xff]  }
 0x312   :  { %4600 = vmatmul.mubr.bf16.gmra.mrb[120].mxu1 %v1051_v18  ;;  %6893 = vmatprep.subr.bf16.mxu0 %v7146_v24  ;;  %v1075_v16 = vpack.c.bf16 %v595_v40, %v571_v2 }
 0x313   :  { %v10966_v0 = vadd.f32 %v6414_v38, %v10717_v14  ;;  %v10969_v6 = vadd.f32 %v6478_v4, %v10720_v61  ;;  %4607 = vmatprep.mubr.bf16.mxu1 %v1076_v37  ;;  %v620_v14 = vld [vmem:[%s11798_s0 + $0x12b8] sm:$0xff]  ;;  %6894 = vmatpush3.bf16.msra.mxu0 %v7146_v24 }
 0x314   :  { %v644_v61 = vld [vmem:[%s11798_s0 + $0x1378] sm:$0xff]  ;;  %6895 = vmatprep.subr.bf16.mxu0 %v7147_v3 }
 0x315   :  { %v6479_v12 = vpop.f32.mrb[16].mxu0  ;;  %v6543_v53 = vpop.f32.mrb[16].mxu1  ;;  %v1100_v35 = vpack.c.bf16 %v644_v61, %v620_v14  ;;  %v7149_v14 = vld [vmem:[%s11800_s3 + $0x30] sm:$0xff]  }
 0x316   :  { %v6480_v27 = vpop.f32.mrb[17].mxu0  ;;  %v6544_v52 = vpop.f32.mrb[17].mxu1 }
 0x317   :  { %v6481_v48 = vadd.f32 %v6480_v27, %v6479_v12  ;;  %v6545_v30 = vadd.f32 %v6544_v52, %v6543_v53  ;;  %v6482_v36 = vpop.f32.mrb[18].mxu0  ;;  %v6546_v51 = vpop.f32.mrb[18].mxu1  ;;  %6896 = vmatpush3.bf16.msra.mxu0 %v7147_v3 }
 0x318   :  { %v6483_v56 = vpop.f32.mrb[19].mxu0  ;;  %v6547_v11 = vpop.f32.mrb[19].mxu1  ;;  %6897 = vmatprep.subr.bf16.mxu0 %v7148_v45 }
 0x319   :  { %v10990_v34 = vadd.f32 %v6481_v48, %v10741_v25  ;;  %v10993_v13 = vadd.f32 %v6545_v30, %v10744_v5  ;;  %v6484_v44 = vadd.f32 %v6483_v56, %v6482_v36  ;;  %v6548_v19 = vadd.f32 %v6547_v11, %v6546_v51  ;;  %v619_v25 = vld [vmem:[%s11798_s0 + $0x12b0] sm:$0xff]  ;;  %v7150_v36 = vld [vmem:[%s11800_s3 + $0x38] sm:$0xff]  }
 0x31a   :  { %4608 = vmatmul.mubr.bf16.gmra.mrb[124].mxu1 %v1075_v16  ;;  %v643_v5 = vld [vmem:[%s11798_s0 + $0x1370] sm:$0xff] }
 0x31b   :  { %v10996_v18 = vadd.f32 %v6484_v44, %v10753_v17  ;;  %v10999_v32 = vadd.f32 %v6548_v19, %v10756_v39  ;;  %4615 = vmatprep.mubr.bf16.mxu1 %v1100_v35  ;;  %v668_v17 = vld [vmem:[%s11798_s0 + $0x1438] sm:$0xff]  ;;  %v1099_v63 = vpack.c.bf16 %v643_v5, %v619_v25  ;;  %6898 = vmatpush3.bf16.msra.mxu0 %v7148_v45 }
 0x31c   :  { %v692_v39 = vld [vmem:[%s11798_s0 + $0x14f8] sm:$0xff]  ;;  %6899 = vmatprep.subr.bf16.mxu0 %v7149_v14 }
 0x31d   :  { %v6485_v46 = vpop.f32.mrb[20].mxu0  ;;  %v6549_v58 = vpop.f32.mrb[20].mxu1  ;;  %v1124_v24 = vpack.c.bf16 %v692_v39, %v668_v17 }
 0x31e   :  { %v6486_v37 = vpop.f32.mrb[21].mxu0  ;;  %v6550_v42 = vpop.f32.mrb[21].mxu1 }
 0x31f   :  { %v6487_v38 = vadd.f32 %v6486_v37, %v6485_v46  ;;  %v6551_v4 = vadd.f32 %v6550_v42, %v6549_v58  ;;  %v6488_v2 = vpop.f32.mrb[22].mxu0  ;;  %v6552_v40 = vpop.f32.mrb[22].mxu1  ;;  %6900 = vmatpush3.bf16.msra.mxu0 %v7149_v14 }
 0x320   :  { %v6489_v61 = vpop.f32.mrb[23].mxu0  ;;  %v6553_v12 = vpop.f32.mrb[23].mxu1  ;;  %6901 = vmatprep.subr.bf16.mxu0 %v7150_v36 }
 0x321   :  { %v11020_v53 = vadd.f32 %v6487_v38, %v10777_v26  ;;  %v11023_v27 = vadd.f32 %v6551_v4, %v10780_v23  ;;  %v6490_v52 = vadd.f32 %v6489_v61, %v6488_v2  ;;  %v6554_v16 = vadd.f32 %v6553_v12, %v6552_v40  ;;  %v667_v26 = vld [vmem:[%s11798_s0 + $0x1430] sm:$0xff] }
 0x322   :  { %4616 = vmatmul.mubr.bf16.gmra.mrb[128].mxu1 %v1099_v63  ;;  %v691_v23 = vld [vmem:[%s11798_s0 + $0x14f0] sm:$0xff] }
 0x323   :  { %v11026_v48 = vadd.f32 %v6490_v52, %v10798_v59  ;;  %v11029_v30 = vadd.f32 %v6554_v16, %v10801_v50  ;;  %4623 = vmatprep.mubr.bf16.mxu1 %v1124_v24  ;;  %v716_v59 = vld [vmem:[%s11798_s0 + $0x15b8] sm:$0xff]  ;;  %v1123_v11 = vpack.c.bf16 %v691_v23, %v667_v26  ;;  %6902 = vmatpush3.bf16.msra.mxu0 %v7150_v36  ;;  %v715_v4 = vld [vmem:[%s11798_s0 + $0x15b0] sm:$0xff] }
 0x324   :  { %v740_v50 = vld [vmem:[%s11798_s0 + $0x1678] sm:$0xff] }
 0x325   :  { %v6491_v51 = vpop.f32.mrb[24].mxu0  ;;  %v6555_v35 = vpop.f32.mrb[24].mxu1  ;;  %v1148_v45 = vpack.c.bf16 %v740_v50, %v716_v59 }
 0x326   :  { %v6492_v3 = vpop.f32.mrb[25].mxu0  ;;  %v6556_v56 = vpop.f32.mrb[25].mxu1 }
 0x327   :  { %v6493_v44 = vadd.f32 %v6492_v3, %v6491_v51  ;;  %v6557_v19 = vadd.f32 %v6556_v56, %v6555_v35  ;;  %v6494_v25 = vpop.f32.mrb[26].mxu0  ;;  %v6558_v5 = vpop.f32.mrb[26].mxu1 }
 0x328   :  { %v6495_v17 = vpop.f32.mrb[27].mxu0  ;;  %v6559_v39 = vpop.f32.mrb[27].mxu1 }
 0x329   :  { %v11047_v46 = vadd.f32 %v6493_v44, %v10816_v28  ;;  %v11050_v58 = vadd.f32 %v6557_v19, %v10819_v49  ;;  %v6496_v37 = vadd.f32 %v6495_v17, %v6494_v25  ;;  %v6560_v42 = vadd.f32 %v6559_v39, %v6558_v5  ;;  %v739_v28 = vld [vmem:[%s11798_s0 + $0x1670] sm:$0xff]  ;;  %v764_v49 = vld [vmem:[%s11798_s0 + $0x1738] sm:$0xff] }
 0x32a   :  { %4624 = vmatmul.mubr.bf16.gmra.mrb[132].mxu1 %v1123_v11  ;;  %v1147_v14 = vpack.c.bf16 %v739_v28, %v715_v4  ;;  %v763_v11 = vld [vmem:[%s11798_s0 + $0x1730] sm:$0xff] }
 0x32b   :  { %v11053_v63 = vadd.f32 %v6496_v37, %v10828_v10  ;;  %v11056_v38 = vadd.f32 %v6560_v42, %v10831_v41  ;;  %4631 = vmatprep.mubr.bf16.mxu1 %v1148_v45  ;;  %v788_v10 = vld [vmem:[%s11798_s0 + $0x17f8] sm:$0xff] }
 0x32c   :  { %v1172_v26 = vpack.c.bf16 %v788_v10, %v764_v49 }
 0x32d   :  { %v6497_v2 = vpop.f32.mrb[28].mxu0  ;;  %v6561_v41 = vpop.f32.mrb[28].mxu1 }
 0x32e   :  { %v6498_v40 = vpop.f32.mrb[29].mxu0  ;;  %v6562_v24 = vpop.f32.mrb[29].mxu1 }
 0x32f   :  { %v6499_v61 = vadd.f32 %v6498_v40, %v6497_v2  ;;  %v6563_v12 = vadd.f32 %v6562_v24, %v6561_v41  ;;  %v6500_v52 = vpop.f32.mrb[30].mxu0  ;;  %v6564_v16 = vpop.f32.mrb[30].mxu1 }
 0x330   :  { %v6501_v23 = vpop.f32.mrb[31].mxu0  ;;  %v6565_v36 = vpop.f32.mrb[31].mxu1 }
 0x331   :  { %v11071_v59 = vadd.f32 %v6499_v61, %v10852_v7  ;;  %v11074_v50 = vadd.f32 %v6563_v12, %v10855_v55  ;;  %v6502_v51 = vadd.f32 %v6501_v23, %v6500_v52  ;;  %v6566_v35 = vadd.f32 %v6565_v36, %v6564_v16  ;;  %v787_v7 = vld [vmem:[%s11798_s0 + $0x17f0] sm:$0xff] }
 0x332   :  { %4632 = vmatmul.mubr.bf16.gmra.mrb[136].mxu1 %v1147_v14  ;;  %v1171_v5 = vpack.c.bf16 %v787_v7, %v763_v11 }
 0x333   :  { %v11077_v3 = vadd.f32 %v6502_v51, %v10864_v29  ;;  %v11080_v56 = vadd.f32 %v6566_v35, %v10867_v31  ;;  %4639 = vmatprep.mubr.bf16.mxu1 %v1172_v26 }
 0x335   :  { %v6503_v55 = vpop.f32.mrb[32].mxu0  ;;  %v6567_v44 = vpop.f32.mrb[32].mxu1 }
 0x336   :  { %v6504_v19 = vpop.f32.mrb[33].mxu0  ;;  %v6568_v25 = vpop.f32.mrb[33].mxu1 }
 0x337   :  { %v6505_v45 = vadd.f32 %v6504_v19, %v6503_v55  ;;  %v6569_v29 = vadd.f32 %v6568_v25, %v6567_v44  ;;  %v6506_v17 = vpop.f32.mrb[34].mxu0  ;;  %v6570_v39 = vpop.f32.mrb[34].mxu1 }
 0x338   :  { %v6507_v31 = vpop.f32.mrb[35].mxu0  ;;  %v6571_v37 = vpop.f32.mrb[35].mxu1 }
 0x339   :  { %v11089_v42 = vadd.f32 %v6505_v45, %v10885_v62  ;;  %v11092_v4 = vadd.f32 %v6569_v29, %v10888_v21  ;;  %v6508_v28 = vadd.f32 %v6507_v31, %v6506_v17  ;;  %v6572_v49 = vadd.f32 %v6571_v37, %v6570_v39 }
 0x33a   :  { %4640 = vmatmul.mubr.bf16.gmra.mrb[140].mxu1 %v1171_v5 }
 0x33b   :  { %v11095_v10 = vadd.f32 %v6508_v28, %v10891_v33  ;;  %v11098_v2 = vadd.f32 %v6572_v49, %v10894_v15 }
 0x33d   :  { %v6509_v41 = vpop.f32.mrb[36].mxu0  ;;  %v6573_v40 = vpop.f32.mrb[36].mxu1 }
 0x33e   :  { %v6510_v24 = vpop.f32.mrb[37].mxu0  ;;  %v6574_v14 = vpop.f32.mrb[37].mxu1 }
 0x33f   :  { %v6511_v61 = vadd.f32 %v6510_v24, %v6509_v41  ;;  %v6575_v12 = vadd.f32 %v6574_v14, %v6573_v40  ;;  %v6512_v62 = vpop.f32.mrb[38].mxu0  ;;  %v6576_v52 = vpop.f32.mrb[38].mxu1 }
 0x340   :  { %v6513_v16 = vpop.f32.mrb[39].mxu0  ;;  %v6577_v21 = vpop.f32.mrb[39].mxu1 }
 0x341   :  { %v11101_v26 = vadd.f32 %v6511_v61, %v10909_v20  ;;  %v11104_v23 = vadd.f32 %v6575_v12, %v10912_v47  ;;  %v6514_v33 = vadd.f32 %v6513_v16, %v6512_v62  ;;  %v6578_v36 = vadd.f32 %v6577_v21, %v6576_v52 }
 0x343   :  { %v11107_v15 = vadd.f32 %v6514_v33, %v10915_v1  ;;  %v11110_v51 = vadd.f32 %v6578_v36, %v10918_v60 }
 0x345   :  { %v6515_v35 = vpop.f32.mrb[40].mxu0  ;;  %v6579_v11 = vpop.f32.mrb[40].mxu1 }
 0x346   :  { %v6516_v7 = vpop.f32.mrb[41].mxu0  ;;  %v6580_v55 = vpop.f32.mrb[41].mxu1 }
 0x347   :  { %v6517_v44 = vadd.f32 %v6516_v7, %v6515_v35  ;;  %v6581_v19 = vadd.f32 %v6580_v55, %v6579_v11  ;;  %v6518_v25 = vpop.f32.mrb[42].mxu0  ;;  %v6582_v20 = vpop.f32.mrb[42].mxu1 }
 0x348   :  { %v6519_v5 = vpop.f32.mrb[43].mxu0  ;;  %v6583_v45 = vpop.f32.mrb[43].mxu1 }
 0x349   :  { %v11113_v47 = vadd.f32 %v6517_v44, %v10936_v43  ;;  %v11116_v29 = vadd.f32 %v6581_v19, %v10939_v8  ;;  %v6520_v1 = vadd.f32 %v6519_v5, %v6518_v25  ;;  %v6584_v17 = vadd.f32 %v6583_v45, %v6582_v20 }
 0x34b   :  { %v11119_v60 = vadd.f32 %v6520_v1, %v10942_v22  ;;  %v11122_v39 = vadd.f32 %v6584_v17, %v10945_v57 }
 0x34d   :  { %v6521_v31 = vpop.f32.mrb[44].mxu0  ;;  %v6585_v37 = vpop.f32.mrb[44].mxu1 }
 0x34e   :  { %v6522_v28 = vpop.f32.mrb[45].mxu0  ;;  %v6586_v49 = vpop.f32.mrb[45].mxu1 }
 0x34f   :  { %v6523_v41 = vadd.f32 %v6522_v28, %v6521_v31  ;;  %v6587_v40 = vadd.f32 %v6586_v49, %v6585_v37  ;;  %v6524_v24 = vpop.f32.mrb[46].mxu0  ;;  %v6588_v43 = vpop.f32.mrb[46].mxu1 }
 0x350   :  { %v6525_v14 = vpop.f32.mrb[47].mxu0  ;;  %v6589_v61 = vpop.f32.mrb[47].mxu1 }
 0x351   :  { %v11125_v8 = vadd.f32 %v6523_v41, %v10960_v9  ;;  %v11128_v12 = vadd.f32 %v6587_v40, %v10963_v54  ;;  %v6526_v22 = vadd.f32 %v6525_v14, %v6524_v24  ;;  %v6590_v62 = vadd.f32 %v6589_v61, %v6588_v43 }
 0x353   :  { %v11131_v57 = vadd.f32 %v6526_v22, %v10966_v0  ;;  %v11134_v52 = vadd.f32 %v6590_v62, %v10969_v6 }
 0x355   :  { %v6591_v16 = vpop.f32.mrb[48].mxu1  ;;  %v6655_v21 = vpop.f32.mrb[48].mxu0 }
 0x356   :  { %v6592_v33 = vpop.f32.mrb[49].mxu1  ;;  %v6656_v36 = vpop.f32.mrb[49].mxu0 }
 0x357   :  { %v6593_v35 = vadd.f32 %v6592_v33, %v6591_v16  ;;  %v6657_v11 = vadd.f32 %v6656_v36, %v6655_v21  ;;  %v6594_v7 = vpop.f32.mrb[50].mxu1  ;;  %v6658_v9 = vpop.f32.mrb[50].mxu0 }
 0x358   :  { %v6595_v55 = vpop.f32.mrb[51].mxu1  ;;  %v6659_v44 = vpop.f32.mrb[51].mxu0 }
 0x359   :  { %v11137_v54 = vadd.f32 %v6593_v35, %v10990_v34  ;;  %v11140_v19 = vadd.f32 %v6657_v11, %v10993_v13  ;;  %v6596_v0 = vadd.f32 %v6595_v55, %v6594_v7  ;;  %v6660_v25 = vadd.f32 %v6659_v44, %v6658_v9 }
 0x35b   :  { %v11143_v6 = vadd.f32 %v6596_v0, %v10996_v18  ;;  %v11146_v20 = vadd.f32 %v6660_v25, %v10999_v32 }
 0x35d   :  { %v6597_v5 = vpop.f32.mrb[52].mxu1  ;;  %v6661_v45 = vpop.f32.mrb[52].mxu0 }
 0x35e   :  { %v6598_v1 = vpop.f32.mrb[53].mxu1  ;;  %v6662_v17 = vpop.f32.mrb[53].mxu0 }
 0x35f   :  { %v6599_v31 = vadd.f32 %v6598_v1, %v6597_v5  ;;  %v6663_v37 = vadd.f32 %v6662_v17, %v6661_v45  ;;  %v6600_v28 = vpop.f32.mrb[54].mxu1  ;;  %v6664_v34 = vpop.f32.mrb[54].mxu0 }
 0x360   :  { %v6601_v49 = vpop.f32.mrb[55].mxu1  ;;  %v6665_v41 = vpop.f32.mrb[55].mxu0 }
 0x361   :  { %v11149_v13 = vadd.f32 %v6599_v31, %v11020_v53  ;;  %v11152_v40 = vadd.f32 %v6663_v37, %v11023_v27  ;;  %v6602_v18 = vadd.f32 %v6601_v49, %v6600_v28  ;;  %v6666_v24 = vadd.f32 %v6665_v41, %v6664_v34 }
 0x363   :  { %v11155_v32 = vadd.f32 %v6602_v18, %v11026_v48  ;;  %v11158_v43 = vadd.f32 %v6666_v24, %v11029_v30 }
 0x365   :  { %v6603_v14 = vpop.f32.mrb[56].mxu1  ;;  %v6667_v61 = vpop.f32.mrb[56].mxu0 }
 0x366   :  { %v6604_v22 = vpop.f32.mrb[57].mxu1  ;;  %v6668_v62 = vpop.f32.mrb[57].mxu0 }
 0x367   :  { %v6605_v16 = vadd.f32 %v6604_v22, %v6603_v14  ;;  %v6669_v21 = vadd.f32 %v6668_v62, %v6667_v61  ;;  %v6606_v33 = vpop.f32.mrb[58].mxu1  ;;  %v6670_v53 = vpop.f32.mrb[58].mxu0 }
 0x368   :  { %v6607_v36 = vpop.f32.mrb[59].mxu1  ;;  %v6671_v35 = vpop.f32.mrb[59].mxu0 }
 0x369   :  { %v11161_v27 = vadd.f32 %v6605_v16, %v11047_v46  ;;  %v11164_v11 = vadd.f32 %v6669_v21, %v11050_v58  ;;  %v6608_v48 = vadd.f32 %v6607_v36, %v6606_v33  ;;  %v6672_v7 = vadd.f32 %v6671_v35, %v6670_v53 }
 0x36b   :  { %v11167_v30 = vadd.f32 %v6608_v48, %v11053_v63  ;;  %v11170_v9 = vadd.f32 %v6672_v7, %v11056_v38 }
 0x36d   :  { %v6609_v55 = vpop.f32.mrb[60].mxu1  ;;  %v6673_v44 = vpop.f32.mrb[60].mxu0 }
 0x36e   :  { %v6610_v0 = vpop.f32.mrb[61].mxu1  ;;  %v6674_v25 = vpop.f32.mrb[61].mxu0 }
 0x36f   :  { %v6611_v5 = vadd.f32 %v6610_v0, %v6609_v55  ;;  %v6675_v45 = vadd.f32 %v6674_v25, %v6673_v44  ;;  %v6612_v1 = vpop.f32.mrb[62].mxu1  ;;  %v6676_v46 = vpop.f32.mrb[62].mxu0 }
 0x370   :  { %v6613_v17 = vpop.f32.mrb[63].mxu1  ;;  %v6677_v31 = vpop.f32.mrb[63].mxu0 }
 0x371   :  { %v11173_v58 = vadd.f32 %v6611_v5, %v11071_v59  ;;  %v11176_v37 = vadd.f32 %v6675_v45, %v11074_v50  ;;  %v6614_v63 = vadd.f32 %v6613_v17, %v6612_v1  ;;  %v6678_v28 = vadd.f32 %v6677_v31, %v6676_v46 }
 0x373   :  { %v11179_v38 = vadd.f32 %v6614_v63, %v11077_v3  ;;  %v11182_v34 = vadd.f32 %v6678_v28, %v11080_v56 }
 0x375   :  { %v6615_v49 = vpop.f32.mrb[64].mxu1  ;;  %v6679_v41 = vpop.f32.mrb[64].mxu0 }
 0x376   :  { %v6616_v18 = vpop.f32.mrb[65].mxu1  ;;  %v6680_v24 = vpop.f32.mrb[65].mxu0 }
 0x377   :  { %v6617_v14 = vadd.f32 %v6616_v18, %v6615_v49  ;;  %v6681_v61 = vadd.f32 %v6680_v24, %v6679_v41  ;;  %v6618_v22 = vpop.f32.mrb[66].mxu1  ;;  %v6682_v59 = vpop.f32.mrb[66].mxu0 }
 0x378   :  { %v6619_v62 = vpop.f32.mrb[67].mxu1  ;;  %v6683_v16 = vpop.f32.mrb[67].mxu0 }
 0x379   :  { %v11185_v50 = vadd.f32 %v6617_v14, %v11089_v42  ;;  %v11188_v21 = vadd.f32 %v6681_v61, %v11092_v4  ;;  %v6620_v3 = vadd.f32 %v6619_v62, %v6618_v22  ;;  %v6684_v33 = vadd.f32 %v6683_v16, %v6682_v59 }
 0x37b   :  { %v11191_v56 = vadd.f32 %v6620_v3, %v11095_v10  ;;  %v11194_v53 = vadd.f32 %v6684_v33, %v11098_v2 }
 0x37d   :  { %v6621_v36 = vpop.f32.mrb[68].mxu1  ;;  %v6685_v35 = vpop.f32.mrb[68].mxu0 }
 0x37e   :  { %v6622_v48 = vpop.f32.mrb[69].mxu1  ;;  %v6686_v7 = vpop.f32.mrb[69].mxu0 }
 0x37f   :  { %v6623_v55 = vadd.f32 %v6622_v48, %v6621_v36  ;;  %v6687_v44 = vadd.f32 %v6686_v7, %v6685_v35  ;;  %v6624_v0 = vpop.f32.mrb[70].mxu1  ;;  %v6688_v42 = vpop.f32.mrb[70].mxu0 }
 0x380   :  { %v6625_v25 = vpop.f32.mrb[71].mxu1  ;;  %v6689_v5 = vpop.f32.mrb[71].mxu0 }
 0x381   :  { %v11197_v4 = vadd.f32 %v6623_v55, %v11101_v26  ;;  %v11200_v45 = vadd.f32 %v6687_v44, %v11104_v23  ;;  %v6626_v10 = vadd.f32 %v6625_v25, %v6624_v0  ;;  %v6690_v1 = vadd.f32 %v6689_v5, %v6688_v42 }
 0x383   :  { %v11203_v2 = vadd.f32 %v6626_v10, %v11107_v15  ;;  %v11206_v46 = vadd.f32 %v6690_v1, %v11110_v51 }
 0x385   :  { %v6627_v17 = vpop.f32.mrb[72].mxu1  ;;  %v6691_v31 = vpop.f32.mrb[72].mxu0 }
 0x386   :  { %v6628_v63 = vpop.f32.mrb[73].mxu1  ;;  %v6692_v28 = vpop.f32.mrb[73].mxu0 }
 0x387   :  { %v6629_v49 = vadd.f32 %v6628_v63, %v6627_v17  ;;  %v6693_v41 = vadd.f32 %v6692_v28, %v6691_v31  ;;  %v6630_v18 = vpop.f32.mrb[74].mxu1  ;;  %v6694_v26 = vpop.f32.mrb[74].mxu0 }
 0x388   :  { %v6631_v24 = vpop.f32.mrb[75].mxu1  ;;  %v6695_v14 = vpop.f32.mrb[75].mxu0 }
 0x389   :  { %v11209_v23 = vadd.f32 %v6629_v49, %v11113_v47  ;;  %v11212_v61 = vadd.f32 %v6693_v41, %v11116_v29  ;;  %v6632_v15 = vadd.f32 %v6631_v24, %v6630_v18  ;;  %v6696_v22 = vadd.f32 %v6695_v14, %v6694_v26 }
 0x38b   :  { %v11215_v51 = vadd.f32 %v6632_v15, %v11119_v60  ;;  %v11218_v59 = vadd.f32 %v6696_v22, %v11122_v39 }
 0x38d   :  { %v6633_v62 = vpop.f32.mrb[76].mxu1  ;;  %v6697_v16 = vpop.f32.mrb[76].mxu0 }
 0x38e   :  { %v6634_v3 = vpop.f32.mrb[77].mxu1  ;;  %v6698_v33 = vpop.f32.mrb[77].mxu0 }
 0x38f   :  { %v6635_v36 = vadd.f32 %v6634_v3, %v6633_v62  ;;  %v6699_v35 = vadd.f32 %v6698_v33, %v6697_v16  ;;  %v6636_v48 = vpop.f32.mrb[78].mxu1  ;;  %v6700_v47 = vpop.f32.mrb[78].mxu0 }
 0x390   :  { %v6637_v7 = vpop.f32.mrb[79].mxu1  ;;  %v6701_v55 = vpop.f32.mrb[79].mxu0 }
 0x391   :  { %v11221_v29 = vadd.f32 %v6635_v36, %v11125_v8  ;;  %v11224_v44 = vadd.f32 %v6699_v35, %v11128_v12  ;;  %v6638_v60 = vadd.f32 %v6637_v7, %v6636_v48  ;;  %v6702_v0 = vadd.f32 %v6701_v55, %v6700_v47 }
 0x393   :  { %v11227_v39 = vadd.f32 %v6638_v60, %v11131_v57  ;;  %v11230_v42 = vadd.f32 %v6702_v0, %v11134_v52 }
 0x395   :  { %v6703_v25 = vpop.f32.mrb[80].mxu0  ;;  %v6767_v5 = vpop.f32.mrb[80].mxu1 }
 0x396   :  { %v6704_v10 = vpop.f32.mrb[81].mxu0  ;;  %v6768_v1 = vpop.f32.mrb[81].mxu1 }
 0x397   :  { %v6705_v17 = vadd.f32 %v6704_v10, %v6703_v25  ;;  %v6769_v31 = vadd.f32 %v6768_v1, %v6767_v5  ;;  %v6706_v63 = vpop.f32.mrb[82].mxu0  ;;  %v6770_v8 = vpop.f32.mrb[82].mxu1 }
 0x398   :  { %v6707_v28 = vpop.f32.mrb[83].mxu0  ;;  %v6771_v49 = vpop.f32.mrb[83].mxu1 }
 0x399   :  { %v11233_v12 = vadd.f32 %v6705_v17, %v11137_v54  ;;  %v4522_v41 = vadd.f32 %v6769_v31, %v11140_v19  ;;  %v6708_v57 = vadd.f32 %v6707_v28, %v6706_v63  ;;  %v6772_v18 = vadd.f32 %v6771_v49, %v6770_v8 }
 0x39b   :  { %v11237_v52 = vadd.f32 %v6708_v57, %v11143_v6  ;;  %v4525_v26 = vadd.f32 %v6772_v18, %v11146_v20  ;;  %v4648_v24 = vmax.f32 %v4522_v41, 0.0 }
 0x39d   :  { %v4649_v14 = vmax.f32 %v4525_v26, 0.0  ;;  %v6709_v15 = vpop.f32.mrb[84].mxu0  ;;  %v6773_v22 = vpop.f32.mrb[84].mxu1 }
 0x39e   :  { %v6710_v62 = vpop.f32.mrb[85].mxu0  ;;  %v6774_v16 = vpop.f32.mrb[85].mxu1 }
 0x39f   :  { %v6711_v3 = vadd.f32 %v6710_v62, %v6709_v15  ;;  %v6775_v33 = vadd.f32 %v6774_v16, %v6773_v22  ;;  %v6712_v36 = vpop.f32.mrb[86].mxu0  ;;  %v6776_v54 = vpop.f32.mrb[86].mxu1  ;;  %v4680_v35 = vpack.c.bf16 %v4649_v14, %v4648_v24 }
 0x3a0   :  { %v6713_v48 = vpop.f32.mrb[87].mxu0  ;;  %v6777_v19 = vpop.f32.mrb[87].mxu1 }
 0x3a1   :  { %v11241_v47 = vadd.f32 %v6711_v3, %v11149_v13  ;;  %v4530_v6 = vadd.f32 %v6775_v33, %v11152_v40  ;;  %v6714_v7 = vadd.f32 %v6713_v48, %v6712_v36  ;;  %v6778_v20 = vadd.f32 %v6777_v19, %v6776_v54  ;;  %6903 = vmatprep.mubr.bf16.mxu0 %v4680_v35 }
 0x3a3   :  { %v11245_v55 = vadd.f32 %v6714_v7, %v11155_v32  ;;  %v4533_v60 = vadd.f32 %v6778_v20, %v11158_v43  ;;  %v4650_v0 = vmax.f32 %v4530_v6, 0.0 }
 0x3a5   :  { %v4651_v25 = vmax.f32 %v4533_v60, 0.0  ;;  %v6715_v5 = vpop.f32.mrb[88].mxu0  ;;  %v6779_v10 = vpop.f32.mrb[88].mxu1 }
 0x3a6   :  { %v6716_v1 = vpop.f32.mrb[89].mxu0  ;;  %v6780_v17 = vpop.f32.mrb[89].mxu1 }
 0x3a7   :  { %v4681_v31 = vpack.c.bf16 %v4651_v25, %v4650_v0  ;;  %v6717_v63 = vadd.f32 %v6716_v1, %v6715_v5  ;;  %v6781_v13 = vadd.f32 %v6780_v17, %v6779_v10  ;;  %v6718_v8 = vpop.f32.mrb[90].mxu0  ;;  %v6782_v28 = vpop.f32.mrb[90].mxu1 }
 0x3a8   :  { %v6719_v40 = vpop.f32.mrb[91].mxu0  ;;  %v6783_v49 = vpop.f32.mrb[91].mxu1 }
 0x3a9   :  { %v11249_v41 = vadd.f32 %v6717_v63, %v11161_v27  ;;  %v4538_v32 = vadd.f32 %v6781_v13, %v11164_v11  ;;  %v6720_v57 = vadd.f32 %v6719_v40, %v6718_v8  ;;  %v6784_v43 = vadd.f32 %v6783_v49, %v6782_v28  ;;  %6904 = vmatmul.mubr.bf16.vlgmr.msra.gmra.mrb[112].mxu0 %v4681_v31 }
 0x3ab   :  { %v11253_v18 = vadd.f32 %v6720_v57, %v11167_v30  ;;  %v4541_v26 = vadd.f32 %v6784_v43, %v11170_v9  ;;  %v4652_v24 = vmax.f32 %v4538_v32, 0.0 }
 0x3ad   :  { %v4653_v14 = vmax.f32 %v4541_v26, 0.0  ;;  %v6721_v15 = vpop.f32.mrb[92].mxu0  ;;  %v6785_v22 = vpop.f32.mrb[92].mxu1 }
 0x3ae   :  { %v6722_v62 = vpop.f32.mrb[93].mxu0  ;;  %v6786_v16 = vpop.f32.mrb[93].mxu1 }
 0x3af   :  { %v6723_v3 = vadd.f32 %v6722_v62, %v6721_v15  ;;  %v6787_v33 = vadd.f32 %v6786_v16, %v6785_v22  ;;  %v6724_v27 = vpop.f32.mrb[94].mxu0  ;;  %v6788_v36 = vpop.f32.mrb[94].mxu1  ;;  %v4682_v54 = vpack.c.bf16 %v4653_v14, %v4652_v24 }
 0x3b0   :  { %v6725_v11 = vpop.f32.mrb[95].mxu0  ;;  %v6789_v35 = vpop.f32.mrb[95].mxu1 }
 0x3b1   :  { %v11257_v48 = vadd.f32 %v6723_v3, %v11173_v58  ;;  %v4546_v30 = vadd.f32 %v6787_v33, %v11176_v37  ;;  %v6726_v19 = vadd.f32 %v6725_v11, %v6724_v27  ;;  %v6790_v9 = vadd.f32 %v6789_v35, %v6788_v36  ;;  %6907 = vmatprep.mubr.bf16.mxu0 %v4682_v54 }
 0x3b3   :  { %v11261_v6 = vadd.f32 %v6726_v19, %v11179_v38  ;;  %v4549_v7 = vadd.f32 %v6790_v9, %v11182_v34  ;;  %v4654_v20 = vmax.f32 %v4546_v30, 0.0 }
 0x3b5   :  { %v4655_v60 = vmax.f32 %v4549_v7, 0.0  ;;  %v6727_v0 = vpop.f32.mrb[96].mxu0  ;;  %v6791_v25 = vpop.f32.mrb[96].mxu1 }
 0x3b6   :  { %v6728_v5 = vpop.f32.mrb[97].mxu0  ;;  %v6792_v10 = vpop.f32.mrb[97].mxu1 }
 0x3b7   :  { %v4683_v1 = vpack.c.bf16 %v4655_v60, %v4654_v20  ;;  %v6729_v17 = vadd.f32 %v6728_v5, %v6727_v0  ;;  %v6793_v58 = vadd.f32 %v6792_v10, %v6791_v25  ;;  %v6730_v31 = vpop.f32.mrb[98].mxu0  ;;  %v6794_v63 = vpop.f32.mrb[98].mxu1 }
 0x3b8   :  { %v6731_v37 = vpop.f32.mrb[99].mxu0  ;;  %v6795_v13 = vpop.f32.mrb[99].mxu1 }
 0x3b9   :  { %v11265_v8 = vadd.f32 %v6729_v17, %v11185_v50  ;;  %v4554_v38 = vadd.f32 %v6793_v58, %v11188_v21  ;;  %v6732_v28 = vadd.f32 %v6731_v37, %v6730_v31  ;;  %v6796_v34 = vadd.f32 %v6795_v13, %v6794_v63  ;;  %6908 = vmatmul.mubr.bf16.gmra.mrb[116].mxu0 %v4683_v1 }
 0x3bb   :  { %v11269_v40 = vadd.f32 %v6732_v28, %v11191_v56  ;;  %v4557_v49 = vadd.f32 %v6796_v34, %v11194_v53  ;;  %v4656_v32 = vmax.f32 %v4554_v38, 0.0 }
 0x3bd   :  { %v4657_v57 = vmax.f32 %v4557_v49, 0.0  ;;  %v6733_v43 = vpop.f32.mrb[100].mxu0  ;;  %v6797_v26 = vpop.f32.mrb[100].mxu1 }
 0x3be   :  { %v6734_v24 = vpop.f32.mrb[101].mxu0  ;;  %v6798_v14 = vpop.f32.mrb[101].mxu1 }
 0x3bf   :  { %v6735_v15 = vadd.f32 %v6734_v24, %v6733_v43  ;;  %v6799_v22 = vadd.f32 %v6798_v14, %v6797_v26  ;;  %v6736_v50 = vpop.f32.mrb[102].mxu0  ;;  %v6800_v62 = vpop.f32.mrb[102].mxu1  ;;  %v4684_v16 = vpack.c.bf16 %v4657_v57, %v4656_v32 }
 0x3c0   :  { %v6737_v21 = vpop.f32.mrb[103].mxu0  ;;  %v6801_v3 = vpop.f32.mrb[103].mxu1 }
 0x3c1   :  { %v11273_v33 = vadd.f32 %v6735_v15, %v11197_v4  ;;  %v4562_v56 = vadd.f32 %v6799_v22, %v11200_v45  ;;  %v6738_v27 = vadd.f32 %v6737_v21, %v6736_v50  ;;  %v6802_v53 = vadd.f32 %v6801_v3, %v6800_v62  ;;  %6911 = vmatprep.mubr.bf16.mxu0 %v4684_v16 }
 0x3c3   :  { %v11277_v36 = vadd.f32 %v6738_v27, %v11203_v2  ;;  %v4565_v54 = vadd.f32 %v6802_v53, %v11206_v46  ;;  %v4658_v11 = vmax.f32 %v4562_v56, 0.0 }
 0x3c5   :  { %v4659_v35 = vmax.f32 %v4565_v54, 0.0  ;;  %v6739_v30 = vpop.f32.mrb[104].mxu0  ;;  %v6803_v19 = vpop.f32.mrb[104].mxu1 }
 0x3c6   :  { %v6740_v9 = vpop.f32.mrb[105].mxu0  ;;  %v6804_v7 = vpop.f32.mrb[105].mxu1 }
 0x3c7   :  { %v4685_v20 = vpack.c.bf16 %v4659_v35, %v4658_v11  ;;  %v6741_v60 = vadd.f32 %v6740_v9, %v6739_v30  ;;  %v6805_v4 = vadd.f32 %v6804_v7, %v6803_v19  ;;  %v6742_v0 = vpop.f32.mrb[106].mxu0  ;;  %v6806_v25 = vpop.f32.mrb[106].mxu1 }
 0x3c8   :  { %v6743_v45 = vpop.f32.mrb[107].mxu0  ;;  %v6807_v5 = vpop.f32.mrb[107].mxu1 }
 0x3c9   :  { %v11281_v10 = vadd.f32 %v6741_v60, %v11209_v23  ;;  %v4570_v2 = vadd.f32 %v6805_v4, %v11212_v61  ;;  %v6744_v1 = vadd.f32 %v6743_v45, %v6742_v0  ;;  %v6808_v46 = vadd.f32 %v6807_v5, %v6806_v25  ;;  %6912 = vmatmul.mubr.bf16.gmra.mrb[120].mxu0 %v4685_v20 }
 0x3cb   :  { %v11285_v17 = vadd.f32 %v6744_v1, %v11215_v51  ;;  %v4573_v58 = vadd.f32 %v6808_v46, %v11218_v59  ;;  %v4660_v31 = vmax.f32 %v4570_v2, 0.0 }
 0x3cd   :  { %v4661_v63 = vmax.f32 %v4573_v58, 0.0  ;;  %v6745_v37 = vpop.f32.mrb[108].mxu0  ;;  %v6809_v13 = vpop.f32.mrb[108].mxu1 }
 0x3ce   :  { %v6746_v38 = vpop.f32.mrb[109].mxu0  ;;  %v6810_v28 = vpop.f32.mrb[109].mxu1 }
 0x3cf   :  { %v6747_v34 = vadd.f32 %v6746_v38, %v6745_v37  ;;  %v6811_v49 = vadd.f32 %v6810_v28, %v6809_v13  ;;  %v6748_v23 = vpop.f32.mrb[110].mxu0  ;;  %v6812_v32 = vpop.f32.mrb[110].mxu1  ;;  %v4686_v57 = vpack.c.bf16 %v4661_v63, %v4660_v31 }
 0x3d0   :  { %v6749_v61 = vpop.f32.mrb[111].mxu0  ;;  %v6813_v43 = vpop.f32.mrb[111].mxu1 }
 0x3d1   :  { %v11289_v26 = vadd.f32 %v6747_v34, %v11221_v29  ;;  %v4578_v51 = vadd.f32 %v6811_v49, %v11224_v44  ;;  %v6750_v24 = vadd.f32 %v6749_v61, %v6748_v23  ;;  %v6814_v59 = vadd.f32 %v6813_v43, %v6812_v32  ;;  %6915 = vmatprep.mubr.bf16.mxu0 %v4686_v57 }
 0x3d3   :  { %v11293_v14 = vadd.f32 %v6750_v24, %v11227_v39  ;;  %v4581_v15 = vadd.f32 %v6814_v59, %v11230_v42  ;;  %v4662_v22 = vmax.f32 %v4578_v51, 0.0 }
 0x3d5   :  { %v4663_v50 = vmax.f32 %v4581_v15, 0.0  ;;  %v6815_v62 = vpop.f32.mrb[112].mxu1 }
 0x3d6   :  { %v6816_v16 = vpop.f32.mrb[113].mxu1 }
 0x3d7   :  { %v4687_v21 = vpack.c.bf16 %v4663_v50, %v4662_v22  ;;  %v6817_v3 = vadd.f32 %v6816_v16, %v6815_v62  ;;  %v6818_v56 = vpop.f32.mrb[114].mxu1 }
 0x3d8   :  { %v6819_v27 = vpop.f32.mrb[115].mxu1 }
 0x3d9   :  { %v4586_v29 = vadd.f32 %v6817_v3, %v11233_v12  ;;  %v6820_v53 = vadd.f32 %v6819_v27, %v6818_v56  ;;  %6916 = vmatmul.mubr.bf16.gmra.mrb[124].mxu0 %v4687_v21 }
 0x3db   :  { %v4589_v44 = vadd.f32 %v6820_v53, %v11237_v52  ;;  %v4664_v54 = vmax.f32 %v4586_v29, 0.0 }
 0x3dd   :  { %v4665_v11 = vmax.f32 %v4589_v44, 0.0  ;;  %v6821_v39 = vpop.f32.mrb[116].mxu1 }
 0x3de   :  { %v6822_v35 = vpop.f32.mrb[117].mxu1 }
 0x3df   :  { %v6823_v30 = vadd.f32 %v6822_v35, %v6821_v39  ;;  %v6824_v42 = vpop.f32.mrb[118].mxu1  ;;  %v4688_v19 = vpack.c.bf16 %v4665_v11, %v4664_v54 }
 0x3e0   :  { %v6825_v9 = vpop.f32.mrb[119].mxu1 }
 0x3e1   :  { %v4594_v7 = vadd.f32 %v6823_v30, %v11241_v47  ;;  %v6826_v20 = vadd.f32 %v6825_v9, %v6824_v42  ;;  %6919 = vmatprep.mubr.bf16.mxu0 %v4688_v19 }
 0x3e3   :  { %v4597_v60 = vadd.f32 %v6826_v20, %v11245_v55  ;;  %v4666_v4 = vmax.f32 %v4594_v7, 0.0 }
 0x3e5   :  { %v4667_v12 = vmax.f32 %v4597_v60, 0.0  ;;  %v6827_v0 = vpop.f32.mrb[120].mxu1 }
 0x3e6   :  { %v6828_v25 = vpop.f32.mrb[121].mxu1 }
 0x3e7   :  { %v4689_v45 = vpack.c.bf16 %v4667_v12, %v4666_v4  ;;  %v6829_v52 = vadd.f32 %v6828_v25, %v6827_v0  ;;  %v6830_v5 = vpop.f32.mrb[122].mxu1 }
 0x3e8   :  { %v6831_v2 = vpop.f32.mrb[123].mxu1 }
 0x3e9   :  { %v4602_v1 = vadd.f32 %v6829_v52, %v11249_v41  ;;  %v6832_v46 = vadd.f32 %v6831_v2, %v6830_v5  ;;  %6920 = vmatmul.mubr.bf16.gmra.mrb[128].mxu0 %v4689_v45 }
 0x3eb   :  { %v4605_v58 = vadd.f32 %v6832_v46, %v11253_v18  ;;  %v4668_v31 = vmax.f32 %v4602_v1, 0.0 }
 0x3ed   :  { %v4669_v47 = vmax.f32 %v4605_v58, 0.0  ;;  %v6833_v63 = vpop.f32.mrb[124].mxu1 }
 0x3ee   :  { %v6834_v37 = vpop.f32.mrb[125].mxu1 }
 0x3ef   :  { %v6835_v13 = vadd.f32 %v6834_v37, %v6833_v63  ;;  %v6836_v55 = vpop.f32.mrb[126].mxu1  ;;  %v4690_v38 = vpack.c.bf16 %v4669_v47, %v4668_v31 }
 0x3f0   :  { %v6837_v28 = vpop.f32.mrb[127].mxu1 }
 0x3f1   :  { %v4610_v34 = vadd.f32 %v6835_v13, %v11257_v48  ;;  %v6838_v49 = vadd.f32 %v6837_v28, %v6836_v55  ;;  %6923 = vmatprep.mubr.bf16.mxu0 %v4690_v38 }
 0x3f3   :  { %v4613_v23 = vadd.f32 %v6838_v49, %v11261_v6  ;;  %v4670_v32 = vmax.f32 %v4610_v34, 0.0 }
 0x3f5   :  { %v4671_v41 = vmax.f32 %v4613_v23, 0.0  ;;  %v6839_v57 = vpop.f32.mrb[128].mxu1 }
 0x3f6   :  { %v6840_v61 = vpop.f32.mrb[129].mxu1 }
 0x3f7   :  { %v4691_v43 = vpack.c.bf16 %v4671_v41, %v4670_v32  ;;  %v6841_v18 = vadd.f32 %v6840_v61, %v6839_v57  ;;  %v6842_v51 = vpop.f32.mrb[130].mxu1 }
 0x3f8   :  { %v6843_v24 = vpop.f32.mrb[131].mxu1 }
 0x3f9   :  { %v4618_v59 = vadd.f32 %v6841_v18, %v11265_v8  ;;  %v6844_v15 = vadd.f32 %v6843_v24, %v6842_v51  ;;  %6924 = vmatmul.mubr.bf16.gmra.mrb[132].mxu0 %v4691_v43 }
 0x3fb   :  { %v4621_v22 = vadd.f32 %v6844_v15, %v11269_v40  ;;  %v4672_v50 = vmax.f32 %v4618_v59, 0.0 }
 0x3fd   :  { %v4673_v48 = vmax.f32 %v4621_v22, 0.0  ;;  %v6845_v62 = vpop.f32.mrb[132].mxu1 }
 0x3fe   :  { %v6846_v16 = vpop.f32.mrb[133].mxu1 }
 0x3ff   :  { %v6847_v21 = vadd.f32 %v6846_v16, %v6845_v62  ;;  %v6848_v6 = vpop.f32.mrb[134].mxu1  ;;  %v4692_v3 = vpack.c.bf16 %v4673_v48, %v4672_v50 }
 0x400   :  { %v6849_v56 = vpop.f32.mrb[135].mxu1 }
 0x401   :  { %v4626_v27 = vadd.f32 %v6847_v21, %v11273_v33  ;;  %v6850_v29 = vadd.f32 %v6849_v56, %v6848_v6  ;;  %6927 = vmatprep.mubr.bf16.mxu0 %v4692_v3 }
 0x403   :  { %v4629_v53 = vadd.f32 %v6850_v29, %v11277_v36  ;;  %v4674_v44 = vmax.f32 %v4626_v27, 0.0 }
 0x405   :  { %v4675_v8 = vmax.f32 %v4629_v53, 0.0  ;;  %v6851_v54 = vpop.f32.mrb[136].mxu1 }
 0x406   :  { %v6852_v11 = vpop.f32.mrb[137].mxu1 }
 0x407   :  { %v4693_v39 = vpack.c.bf16 %v4675_v8, %v4674_v44  ;;  %v6853_v40 = vadd.f32 %v6852_v11, %v6851_v54  ;;  %v6854_v35 = vpop.f32.mrb[138].mxu1 }
 0x408   :  { %v6855_v30 = vpop.f32.mrb[139].mxu1 }
 0x409   :  { %v4634_v42 = vadd.f32 %v6853_v40, %v11281_v10  ;;  %v6856_v19 = vadd.f32 %v6855_v30, %v6854_v35  ;;  %6928 = vmatmul.mubr.bf16.gmra.mrb[136].mxu0 %v4693_v39 }
 0x40b   :  { %v4637_v9 = vadd.f32 %v6856_v19, %v11285_v17  ;;  %v4676_v7 = vmax.f32 %v4634_v42, 0.0  ;;  %v11315_v17 = vld [vmem:[%s11801_s4] ss:$0 sm:$0xff] }
 0x40d   :  { %v4677_v33 = vmax.f32 %v4637_v9, 0.0  ;;  %v6857_v20 = vpop.f32.mrb[140].mxu1 }
 0x40e   :  { %v6858_v60 = vpop.f32.mrb[141].mxu1 }
 0x40f   :  { %v6859_v4 = vadd.f32 %v6858_v60, %v6857_v20  ;;  %v6860_v36 = vpop.f32.mrb[142].mxu1  ;;  %v4694_v12 = vpack.c.bf16 %v4677_v33, %v4676_v7 }
 0x410   :  { %v6861_v0 = vpop.f32.mrb[143].mxu1 }
 0x411   :  { %v4642_v25 = vadd.f32 %v6859_v4, %v11289_v26  ;;  %v6862_v45 = vadd.f32 %v6861_v0, %v6860_v36  ;;  %6931 = vmatprep.mubr.bf16.mxu0 %v4694_v12 }
 0x413   :  { %v4645_v52 = vadd.f32 %v6862_v45, %v11293_v14  ;;  %v4678_v5 = vmax.f32 %v4642_v25, 0.0 }
 0x415   :  { %v4679_v10 = vmax.f32 %v4645_v52, 0.0 }
 0x417   :  { %v4695_v2 = vpack.c.bf16 %v4679_v10, %v4678_v5 }
 0x419   :  { %6932 = vmatmul.mubr.bf16.gmra.mrb[140].mxu0 %v4695_v2 }
 0x47c   :  { %v6905_v1 = vpop.f32.mrb[112].mxu0 }
 0x47d   :  { %v11318_v46 = vadd.f32 %v6905_v1, %v11315_v17  ;;  %v4801_v58 = vpop.f32.mrb[113].mxu0 }
 0x47e   :  { %v11321_v26 = vadd.f32 %v11315_v17, %v4801_v58  ;;  %v6906_v31 = vpop.f32.mrb[114].mxu0 }
 0x47f   :  { %v11324_v14 = vadd.f32 %v6906_v31, %v11315_v17  ;;  %v4804_v47 = vpop.f32.mrb[115].mxu0  ;;  %v4935_v63 = vsel %vm4928_vm0, %v11318_v46, -inf }
 0x480   :  { %v11329_v37 = vadd.f32 %v11315_v17, %v4804_v47  ;;  %4936 = vmax.xlane.f32.xlu1 %v4935_v63  ;;  %v4929_v13 = vsel %vm4928_vm0, %v11321_v26, -inf }
 0x481   :  { %4930 = vmax.xlane.f32.xlu0 %v4929_v13  ;;  %v4938_v55 = vsel %vm4928_vm0, %v11324_v14, -inf }
 0x482   :  { %v4932_v38 = vsel %vm4928_vm0, %v11329_v37, -inf }
 0x484   :  { %4939 = vmax.xlane.f32.xlu1 %v4938_v55 }
 0x485   :  { %4933 = vmax.xlane.f32.xlu0 %v4932_v38 }
 0x48c   :  { %v6909_v28 = vpop.f32.mrb[116].mxu0 }
 0x48d   :  { %v11338_v34 = vadd.f32 %v6909_v28, %v11315_v17  ;;  %v4817_v49 = vpop.f32.mrb[117].mxu0 }
 0x48e   :  { %v6910_v23 = vpop.f32.mrb[118].mxu0  ;;  %v11341_v32 = vadd.f32 %v11315_v17, %v4817_v49 }
 0x48f   :  { %v11344_v41 = vadd.f32 %v6910_v23, %v11315_v17  ;;  %v4820_v57 = vpop.f32.mrb[119].mxu0  ;;  %v4947_v61 = vsel %vm4928_vm0, %v11338_v34, -inf }
 0x490   :  { %4948 = vmax.xlane.f32.xlu0 %v4947_v61  ;;  %v11349_v43 = vadd.f32 %v11315_v17, %v4820_v57  ;;  %v4941_v51 = vsel %vm4928_vm0, %v11341_v32, -inf }
 0x491   :  { %v4950_v18 = vsel %vm4928_vm0, %v11344_v41, -inf }
 0x492   :  { %4951 = vmax.xlane.f32.xlu1 %v4950_v18  ;;  %v4944_v24 = vsel %vm4928_vm0, %v11349_v43, -inf }
 0x494   :  { %4942 = vmax.xlane.f32.xlu0 %v4941_v51 }
 0x496   :  { %4945 = vmax.xlane.f32.xlu1 %v4944_v24 }
 0x49c   :  { %v6913_v59 = vpop.f32.mrb[120].mxu0 }
 0x49d   :  { %v11358_v15 = vadd.f32 %v6913_v59, %v11315_v17  ;;  %v4833_v22 = vpop.f32.mrb[121].mxu0 }
 0x49e   :  { %v6914_v50 = vpop.f32.mrb[122].mxu0  ;;  %v11361_v48 = vadd.f32 %v11315_v17, %v4833_v22 }
 0x49f   :  { %v11364_v62 = vadd.f32 %v6914_v50, %v11315_v17  ;;  %v4836_v16 = vpop.f32.mrb[123].mxu0  ;;  %v4959_v21 = vsel %vm4928_vm0, %v11358_v15, -inf }
 0x4a0   :  { %4960 = vmax.xlane.f32.xlu0 %v4959_v21  ;;  %v11369_v6 = vadd.f32 %v11315_v17, %v4836_v16  ;;  %v4953_v56 = vsel %vm4928_vm0, %v11361_v48, -inf }
 0x4a1   :  { %v4962_v3 = vsel %vm4928_vm0, %v11364_v62, -inf }
 0x4a2   :  { %4963 = vmax.xlane.f32.xlu1 %v4962_v3  ;;  %v4956_v27 = vsel %vm4928_vm0, %v11369_v6, -inf }
 0x4a4   :  { %4954 = vmax.xlane.f32.xlu0 %v4953_v56 }
 0x4a6   :  { %4957 = vmax.xlane.f32.xlu1 %v4956_v27 }
 0x4ac   :  { %v6917_v29 = vpop.f32.mrb[124].mxu0 }
 0x4ad   :  { %v11378_v53 = vadd.f32 %v6917_v29, %v11315_v17  ;;  %v4849_v44 = vpop.f32.mrb[125].mxu0 }
 0x4ae   :  { %v6918_v8 = vpop.f32.mrb[126].mxu0  ;;  %v11381_v54 = vadd.f32 %v11315_v17, %v4849_v44 }
 0x4af   :  { %v11384_v11 = vadd.f32 %v6918_v8, %v11315_v17  ;;  %v4852_v39 = vpop.f32.mrb[127].mxu0  ;;  %v4971_v40 = vsel %vm4928_vm0, %v11378_v53, -inf }
 0x4b0   :  { %4972 = vmax.xlane.f32.xlu0 %v4971_v40  ;;  %v11389_v35 = vadd.f32 %v11315_v17, %v4852_v39  ;;  %v4965_v42 = vsel %vm4928_vm0, %v11381_v54, -inf }
 0x4b1   :  { %v4974_v30 = vsel %vm4928_vm0, %v11384_v11, -inf }
 0x4b2   :  { %4975 = vmax.xlane.f32.xlu1 %v4974_v30  ;;  %v4968_v19 = vsel %vm4928_vm0, %v11389_v35, -inf }
 0x4b4   :  { %4966 = vmax.xlane.f32.xlu0 %v4965_v42 }
 0x4b6   :  { %4969 = vmax.xlane.f32.xlu1 %v4968_v19 }
 0x4bc   :  { %v6921_v9 = vpop.f32.mrb[128].mxu0 }
 0x4bd   :  { %v11398_v7 = vadd.f32 %v6921_v9, %v11315_v17  ;;  %v4865_v33 = vpop.f32.mrb[129].mxu0 }
 0x4be   :  { %v6922_v20 = vpop.f32.mrb[130].mxu0  ;;  %v11401_v60 = vadd.f32 %v11315_v17, %v4865_v33 }
 0x4bf   :  { %v11404_v4 = vadd.f32 %v6922_v20, %v11315_v17  ;;  %v4868_v36 = vpop.f32.mrb[131].mxu0  ;;  %v4983_v12 = vsel %vm4928_vm0, %v11398_v7, -inf }
 0x4c0   :  { %4984 = vmax.xlane.f32.xlu0 %v4983_v12  ;;  %v11409_v0 = vadd.f32 %v11315_v17, %v4868_v36  ;;  %v4977_v45 = vsel %vm4928_vm0, %v11401_v60, -inf }
 0x4c1   :  { %v4986_v25 = vsel %vm4928_vm0, %v11404_v4, -inf }
 0x4c2   :  { %4987 = vmax.xlane.f32.xlu1 %v4986_v25  ;;  %v4980_v52 = vsel %vm4928_vm0, %v11409_v0, -inf }
 0x4c4   :  { %4978 = vmax.xlane.f32.xlu0 %v4977_v45 }
 0x4c6   :  { %4981 = vmax.xlane.f32.xlu1 %v4980_v52 }
 0x4cc   :  { %v6925_v5 = vpop.f32.mrb[132].mxu0 }
 0x4cd   :  { %v11418_v10 = vadd.f32 %v6925_v5, %v11315_v17  ;;  %v4881_v2 = vpop.f32.mrb[133].mxu0 }
 0x4ce   :  { %v6926_v1 = vpop.f32.mrb[134].mxu0  ;;  %v11421_v58 = vadd.f32 %v11315_v17, %v4881_v2 }
 0x4cf   :  { %v11424_v31 = vadd.f32 %v6926_v1, %v11315_v17  ;;  %v4884_v47 = vpop.f32.mrb[135].mxu0  ;;  %v4995_v63 = vsel %vm4928_vm0, %v11418_v10, -inf }
 0x4d0   :  { %4996 = vmax.xlane.f32.xlu0 %v4995_v63  ;;  %v11429_v13 = vadd.f32 %v11315_v17, %v4884_v47  ;;  %v4989_v38 = vsel %vm4928_vm0, %v11421_v58, -inf }
 0x4d1   :  { %v4998_v55 = vsel %vm4928_vm0, %v11424_v31, -inf }
 0x4d2   :  { %4999 = vmax.xlane.f32.xlu1 %v4998_v55  ;;  %v4992_v28 = vsel %vm4928_vm0, %v11429_v13, -inf }
 0x4d4   :  { %4990 = vmax.xlane.f32.xlu0 %v4989_v38 }
 0x4d6   :  { %4993 = vmax.xlane.f32.xlu1 %v4992_v28 }
 0x4dc   :  { %v6929_v49 = vpop.f32.mrb[136].mxu0 }
 0x4dd   :  { %v11438_v23 = vadd.f32 %v6929_v49, %v11315_v17  ;;  %v4897_v57 = vpop.f32.mrb[137].mxu0 }
 0x4de   :  { %v6930_v61 = vpop.f32.mrb[138].mxu0  ;;  %v11441_v18 = vadd.f32 %v11315_v17, %v4897_v57 }
 0x4df   :  { %v11444_v51 = vadd.f32 %v6930_v61, %v11315_v17  ;;  %v4900_v24 = vpop.f32.mrb[139].mxu0  ;;  %v5007_v59 = vsel %vm4928_vm0, %v11438_v23, -inf }
 0x4e0   :  { %5008 = vmax.xlane.f32.xlu0 %v5007_v59  ;;  %v11449_v22 = vadd.f32 %v11315_v17, %v4900_v24  ;;  %v5001_v16 = vsel %vm4928_vm0, %v11441_v18, -inf }
 0x4e1   :  { %v5010_v50 = vsel %vm4928_vm0, %v11444_v51, -inf }
 0x4e2   :  { %5011 = vmax.xlane.f32.xlu1 %v5010_v50  ;;  %v5004_v21 = vsel %vm4928_vm0, %v11449_v22, -inf }
 0x4e4   :  { %5002 = vmax.xlane.f32.xlu0 %v5001_v16 }
 0x4e6   :  { %5005 = vmax.xlane.f32.xlu1 %v5004_v21 }
 0x4ec   :  { %v6933_v3 = vpop.f32.mrb[140].mxu0 }
 0x4ed   :  { %v4913_v56 = vpop.f32.mrb[141].mxu0  ;;  %v11461_v8 = vadd.f32 %v6933_v3, %v11315_v17 }
 0x4ee   :  { %v11458_v27 = vadd.f32 %v11315_v17, %v4913_v56  ;;  %v6934_v29 = vpop.f32.mrb[142].mxu0 }
 0x4ef   :  { %v4916_v44 = vpop.f32.mrb[143].mxu0  ;;  %v11469_v30 = vadd.f32 %v6934_v29, %v11315_v17  ;;  %v5019_v19 = vsel %vm4928_vm0, %v11461_v8, -inf }
 0x4f0   :  { %v11464_v39 = vadd.f32 %v11315_v17, %v4916_v44  ;;  %v5013_v40 = vsel %vm4928_vm0, %v11458_v27, -inf }
 0x4f1   :  { %5014 = vmax.xlane.f32.xlu0 %v5013_v40  ;;  %v5022_v9 = vsel %vm4928_vm0, %v11469_v30, -inf }
 0x4f2   :  { %v5016_v42 = vsel %vm4928_vm0, %v11464_v39, -inf }
 0x4f3   :  { %5017 = vmax.xlane.f32.xlu1 %v5016_v42 }
 0x4f5   :  { %5020 = vmax.xlane.f32.xlu0 %v5019_v19 }
 0x4f7   :  { %5023 = vmax.xlane.f32.xlu1 %v5022_v9 }
 0x50d   :  { %v4937_v33 = vpop.xlane.xlu1 %4936 }
 0x50e   :  { %v5027_v20 = vsub.f32 %v11318_v46, %v4937_v33  ;;  %v4931_v36 = vpop.xlane.xlu0 %4930 }
 0x50f   :  { %v5025_v12 = vsub.f32 %v11321_v26, %v4931_v36 }
 0x510   :  { %v5061_v17 = vmul.f32 1.442695, %v5027_v20 }
 0x511   :  { %v5057_v25 = vmul.f32 1.442695, %v5025_v12  ;;  %v4940_v45 = vpop.xlane.xlu1 %4939 }
 0x512   :  { %7151 = vpow2.f32 %v5061_v17  ;;  %v5028_v52 = vsub.f32 %v11324_v14, %v4940_v45  ;;  %v4934_v5 = vpop.xlane.xlu0 %4933 }
 0x513   :  { %v5026_v2 = vsub.f32 %v11329_v37, %v4934_v5  ;;  %7153 = vpow2.f32 %v5057_v25 }
 0x514   :  { %v5063_v1 = vmul.f32 1.442695, %v5028_v52 }
 0x515   :  { %v5059_v47 = vmul.f32 1.442695, %v5026_v2 }
 0x516   :  { %7155 = vpow2.f32 %v5063_v1 }
 0x517   :  { %7157 = vpow2.f32 %v5059_v47 }
 0x51c   :  { %v11481_v63 = vpop.eup %7151 }
 0x51d   :  { %v4949_v46 = vpop.xlane.xlu0 %4948  ;;  %v5127_v26 = vsel %vm4928_vm0, %v11481_v63, 0.0  ;;  %v11485_v55 = vpop.eup %7153 }
 0x51e   :  { %v5031_v38 = vsub.f32 %v11338_v34, %v4949_v46  ;;  %5128 = vadd.xlane.f32.xlu0 %v5127_v26  ;;  %v5121_v24 = vsel %vm4928_vm0, %v11485_v55, 0.0 }
 0x51f   :  { %v4952_v14 = vpop.xlane.xlu1 %4951 }
 0x520   :  { %v11488_v28 = vpop.eup %7155  ;;  %v5069_v37 = vmul.f32 1.442695, %v5031_v38  ;;  %v5032_v49 = vsub.f32 %v11344_v41, %v4952_v14 }
 0x521   :  { %v4943_v57 = vpop.xlane.xlu0 %4942  ;;  %v5130_v61 = vsel %vm4928_vm0, %v11488_v28, 0.0  ;;  %v11495_v59 = vpop.eup %7157 }
 0x522   :  { %7159 = vpow2.f32 %v5069_v37  ;;  %v5071_v50 = vmul.f32 1.442695, %v5032_v49  ;;  %v5029_v34 = vsub.f32 %v11341_v32, %v4943_v57  ;;  %5131 = vadd.xlane.f32.xlu1 %v5130_v61  ;;  %5122 = vadd.xlane.f32.xlu0 %v5121_v24  ;;  %v5124_v3 = vsel %vm4928_vm0, %v11495_v59, 0.0 }
 0x523   :  { %v4946_v16 = vpop.xlane.xlu1 %4945 }
 0x524   :  { %7161 = vpow2.f32 %v5071_v50  ;;  %v5065_v21 = vmul.f32 1.442695, %v5029_v34  ;;  %v5030_v41 = vsub.f32 %v11349_v43, %v4946_v16 }
 0x526   :  { %7163 = vpow2.f32 %v5065_v21  ;;  %v5067_v56 = vmul.f32 1.442695, %v5030_v41  ;;  %5125 = vadd.xlane.f32.xlu1 %v5124_v3 }
 0x528   :  { %7165 = vpow2.f32 %v5067_v56 }
 0x52c   :  { %v11501_v29 = vpop.eup %7159 }
 0x52d   :  { %v4961_v44 = vpop.xlane.xlu0 %4960  ;;  %v5139_v32 = vsel %vm4928_vm0, %v11501_v29, 0.0 }
 0x52e   :  { %v11505_v40 = vpop.eup %7161  ;;  %v5035_v42 = vsub.f32 %v11358_v15, %v4961_v44  ;;  %5140 = vadd.xlane.f32.xlu0 %v5139_v32 }
 0x52f   :  { %v4964_v19 = vpop.xlane.xlu1 %4963  ;;  %v5142_v43 = vsel %vm4928_vm0, %v11505_v40, 0.0 }
 0x530   :  { %v11510_v9 = vpop.eup %7163  ;;  %v5077_v33 = vmul.f32 1.442695, %v5035_v42  ;;  %v5036_v20 = vsub.f32 %v11364_v62, %v4964_v19  ;;  %5143 = vadd.xlane.f32.xlu1 %v5142_v43 }
 0x531   :  { %v4955_v36 = vpop.xlane.xlu0 %4954  ;;  %v5133_v12 = vsel %vm4928_vm0, %v11510_v9, 0.0 }
 0x532   :  { %v11515_v17 = vpop.eup %7165  ;;  %7167 = vpow2.f32 %v5077_v33  ;;  %v5079_v25 = vmul.f32 1.442695, %v5036_v20  ;;  %v5033_v15 = vsub.f32 %v11361_v48, %v4955_v36  ;;  %5134 = vadd.xlane.f32.xlu0 %v5133_v12 }
 0x533   :  { %v4958_v45 = vpop.xlane.xlu1 %4957  ;;  %v5136_v52 = vsel %vm4928_vm0, %v11515_v17, 0.0 }
 0x534   :  { %7169 = vpow2.f32 %v5079_v25  ;;  %v5073_v5 = vmul.f32 1.442695, %v5033_v15  ;;  %v5034_v62 = vsub.f32 %v11369_v6, %v4958_v45  ;;  %5137 = vadd.xlane.f32.xlu1 %v5136_v52 }
 0x536   :  { %7171 = vpow2.f32 %v5073_v5  ;;  %v5075_v2 = vmul.f32 1.442695, %v5034_v62 }
 0x538   :  { %7173 = vpow2.f32 %v5075_v2 }
 0x53c   :  { %v11521_v1 = vpop.eup %7167 }
 0x53d   :  { %v4973_v47 = vpop.xlane.xlu0 %4972  ;;  %v5151_v46 = vsel %vm4928_vm0, %v11521_v1, 0.0 }
 0x53e   :  { %v11525_v48 = vpop.eup %7169  ;;  %v5039_v26 = vsub.f32 %v11378_v53, %v4973_v47  ;;  %5152 = vadd.xlane.f32.xlu0 %v5151_v46 }
 0x53f   :  { %v4976_v38 = vpop.xlane.xlu1 %4975  ;;  %v5154_v14 = vsel %vm4928_vm0, %v11525_v48, 0.0 }
 0x540   :  { %v11530_v6 = vpop.eup %7171  ;;  %v5085_v37 = vmul.f32 1.442695, %v5039_v26  ;;  %v5040_v49 = vsub.f32 %v11384_v11, %v4976_v38  ;;  %5155 = vadd.xlane.f32.xlu1 %v5154_v14 }
 0x541   :  { %v4967_v57 = vpop.xlane.xlu0 %4966  ;;  %v5145_v61 = vsel %vm4928_vm0, %v11530_v6, 0.0 }
 0x542   :  { %v11535_v24 = vpop.eup %7173  ;;  %7175 = vpow2.f32 %v5085_v37  ;;  %v5087_v50 = vmul.f32 1.442695, %v5040_v49  ;;  %v5037_v53 = vsub.f32 %v11381_v54, %v4967_v57  ;;  %5146 = vadd.xlane.f32.xlu0 %v5145_v61 }
 0x543   :  { %v4970_v34 = vpop.xlane.xlu1 %4969  ;;  %v5148_v16 = vsel %vm4928_vm0, %v11535_v24, 0.0 }
 0x544   :  { %7177 = vpow2.f32 %v5087_v50  ;;  %v5081_v21 = vmul.f32 1.442695, %v5037_v53  ;;  %v5038_v11 = vsub.f32 %v11389_v35, %v4970_v34  ;;  %5149 = vadd.xlane.f32.xlu1 %v5148_v16 }
 0x546   :  { %7179 = vpow2.f32 %v5081_v21  ;;  %v5083_v41 = vmul.f32 1.442695, %v5038_v11 }
 0x548   :  { %7181 = vpow2.f32 %v5083_v41 }
 0x54c   :  { %v11541_v3 = vpop.eup %7175 }
 0x54d   :  { %v4985_v56 = vpop.xlane.xlu0 %4984  ;;  %v5163_v44 = vsel %vm4928_vm0, %v11541_v3, 0.0 }
 0x54e   :  { %v11545_v54 = vpop.eup %7177  ;;  %v5043_v32 = vsub.f32 %v11398_v7, %v4985_v56  ;;  %5164 = vadd.xlane.f32.xlu0 %v5163_v44 }
 0x54f   :  { %v4988_v42 = vpop.xlane.xlu1 %4987  ;;  %v5166_v19 = vsel %vm4928_vm0, %v11545_v54, 0.0 }
 0x550   :  { %v11550_v35 = vpop.eup %7179  ;;  %v5093_v43 = vmul.f32 1.442695, %v5043_v32  ;;  %v5044_v33 = vsub.f32 %v11404_v4, %v4988_v42  ;;  %5167 = vadd.xlane.f32.xlu1 %v5166_v19 }
 0x551   :  { %v4979_v20 = vpop.xlane.xlu0 %4978  ;;  %v5157_v36 = vsel %vm4928_vm0, %v11550_v35, 0.0 }
 0x552   :  { %v11555_v12 = vpop.eup %7181  ;;  %7183 = vpow2.f32 %v5093_v43  ;;  %v5095_v25 = vmul.f32 1.442695, %v5044_v33  ;;  %v5041_v7 = vsub.f32 %v11401_v60, %v4979_v20  ;;  %5158 = vadd.xlane.f32.xlu0 %v5157_v36 }
 0x553   :  { %v4982_v15 = vpop.xlane.xlu1 %4981  ;;  %v5160_v45 = vsel %vm4928_vm0, %v11555_v12, 0.0 }
 0x554   :  { %7185 = vpow2.f32 %v5095_v25  ;;  %v5089_v52 = vmul.f32 1.442695, %v5041_v7  ;;  %v5042_v4 = vsub.f32 %v11409_v0, %v4982_v15  ;;  %5161 = vadd.xlane.f32.xlu1 %v5160_v45 }
 0x556   :  { %7187 = vpow2.f32 %v5089_v52  ;;  %v5091_v5 = vmul.f32 1.442695, %v5042_v4 }
 0x558   :  { %7189 = vpow2.f32 %v5091_v5 }
 0x55c   :  { %v11561_v62 = vpop.eup %7183 }
 0x55d   :  { %v4997_v2 = vpop.xlane.xlu0 %4996  ;;  %v5175_v47 = vsel %vm4928_vm0, %v11561_v62, 0.0 }
 0x55e   :  { %v11565_v60 = vpop.eup %7185  ;;  %v5047_v46 = vsub.f32 %v11418_v10, %v4997_v2  ;;  %5176 = vadd.xlane.f32.xlu0 %v5175_v47 }
 0x55f   :  { %v5000_v26 = vpop.xlane.xlu1 %4999  ;;  %v5178_v38 = vsel %vm4928_vm0, %v11565_v60, 0.0 }
 0x560   :  { %v11570_v0 = vpop.eup %7187  ;;  %v5101_v14 = vmul.f32 1.442695, %v5047_v46  ;;  %v5048_v37 = vsub.f32 %v11424_v31, %v5000_v26  ;;  %5179 = vadd.xlane.f32.xlu1 %v5178_v38 }
 0x561   :  { %v4991_v49 = vpop.xlane.xlu0 %4990  ;;  %v5169_v57 = vsel %vm4928_vm0, %v11570_v0, 0.0 }
 0x562   :  { %v11575_v61 = vpop.eup %7189  ;;  %7191 = vpow2.f32 %v5101_v14  ;;  %v5103_v50 = vmul.f32 1.442695, %v5048_v37  ;;  %v5045_v10 = vsub.f32 %v11421_v58, %v4991_v49  ;;  %5170 = vadd.xlane.f32.xlu0 %v5169_v57 }
 0x563   :  { %v4994_v53 = vpop.xlane.xlu1 %4993  ;;  %v5172_v34 = vsel %vm4928_vm0, %v11575_v61, 0.0 }
 0x564   :  { %7193 = vpow2.f32 %v5103_v50  ;;  %v5097_v16 = vmul.f32 1.442695, %v5045_v10  ;;  %v5046_v31 = vsub.f32 %v11429_v13, %v4994_v53  ;;  %5173 = vadd.xlane.f32.xlu1 %v5172_v34 }
 0x566   :  { %7195 = vpow2.f32 %v5097_v16  ;;  %v5099_v21 = vmul.f32 1.442695, %v5046_v31 }
 0x568   :  { %7197 = vpow2.f32 %v5099_v21 }
 0x56c   :  { %v11581_v11 = vpop.eup %7191 }
 0x56d   :  { %v5009_v41 = vpop.xlane.xlu0 %5008  ;;  %v5187_v56 = vsel %vm4928_vm0, %v11581_v11, 0.0 }
 0x56e   :  { %v11585_v58 = vpop.eup %7193  ;;  %v5051_v44 = vsub.f32 %v11438_v23, %v5009_v41  ;;  %5188 = vadd.xlane.f32.xlu0 %v5187_v56 }
 0x56f   :  { %v5012_v32 = vpop.xlane.xlu1 %5011  ;;  %v5190_v42 = vsel %vm4928_vm0, %v11585_v58, 0.0 }
 0x570   :  { %v11590_v13 = vpop.eup %7195  ;;  %v5109_v19 = vmul.f32 1.442695, %v5051_v44  ;;  %v5052_v43 = vsub.f32 %v11444_v51, %v5012_v32  ;;  %5191 = vadd.xlane.f32.xlu1 %v5190_v42 }
 0x571   :  { %v5003_v33 = vpop.xlane.xlu0 %5002  ;;  %v5181_v20 = vsel %vm4928_vm0, %v11590_v13, 0.0 }
 0x572   :  { %v11595_v36 = vpop.eup %7197  ;;  %7199 = vpow2.f32 %v5109_v19  ;;  %v5111_v25 = vmul.f32 1.442695, %v5052_v43  ;;  %v5049_v23 = vsub.f32 %v11441_v18, %v5003_v33  ;;  %5182 = vadd.xlane.f32.xlu0 %v5181_v20 }
 0x573   :  { %v5006_v7 = vpop.xlane.xlu1 %5005  ;;  %v5184_v15 = vsel %vm4928_vm0, %v11595_v36, 0.0 }
 0x574   :  { %7201 = vpow2.f32 %v5111_v25  ;;  %v5105_v45 = vmul.f32 1.442695, %v5049_v23  ;;  %v5050_v51 = vsub.f32 %v11449_v22, %v5006_v7  ;;  %5185 = vadd.xlane.f32.xlu1 %v5184_v15 }
 0x576   :  { %7203 = vpow2.f32 %v5105_v45  ;;  %v5107_v52 = vmul.f32 1.442695, %v5050_v51 }
 0x578   :  { %7205 = vpow2.f32 %v5107_v52 }
 0x57c   :  { %v11601_v4 = vpop.eup %7199 }
 0x57d   :  { %v5199_v5 = vsel %vm4928_vm0, %v11601_v4, 0.0 }
 0x57e   :  { %v11605_v2 = vpop.eup %7201  ;;  %5200 = vadd.xlane.f32.xlu0 %v5199_v5  ;;  %v5015_v18 = vpop.xlane.xlu0 %5014 }
 0x57f   :  { %v5053_v47 = vsub.f32 %v11458_v27, %v5015_v18  ;;  %v5202_v46 = vsel %vm4928_vm0, %v11605_v2, 0.0 }
 0x580   :  { %v11610_v26 = vpop.eup %7203  ;;  %v5018_v22 = vpop.xlane.xlu1 %5017  ;;  %5203 = vadd.xlane.f32.xlu1 %v5202_v46 }
 0x581   :  { %v5113_v38 = vmul.f32 1.442695, %v5053_v47  ;;  %v5054_v14 = vsub.f32 %v11464_v39, %v5018_v22  ;;  %v5193_v37 = vsel %vm4928_vm0, %v11610_v26, 0.0 }
 0x582   :  { %v11615_v49 = vpop.eup %7205  ;;  %5194 = vadd.xlane.f32.xlu0 %v5193_v37  ;;  %v5021_v57 = vpop.xlane.xlu0 %5020 }
 0x583   :  { %7207 = vpow2.f32 %v5113_v38  ;;  %v5115_v50 = vmul.f32 1.442695, %v5054_v14  ;;  %v5055_v27 = vsub.f32 %v11461_v8, %v5021_v57  ;;  %v5196_v10 = vsel %vm4928_vm0, %v11615_v49, 0.0 }
 0x584   :  { %v5024_v53 = vpop.xlane.xlu1 %5023  ;;  %5197 = vadd.xlane.f32.xlu1 %v5196_v10 }
 0x585   :  { %7209 = vpow2.f32 %v5115_v50  ;;  %v5117_v34 = vmul.f32 1.442695, %v5055_v27  ;;  %v5056_v39 = vsub.f32 %v11469_v30, %v5024_v53 }
 0x587   :  { %7211 = vpow2.f32 %v5117_v34  ;;  %v5119_v16 = vmul.f32 1.442695, %v5056_v39 }
 0x589   :  { %7213 = vpow2.f32 %v5119_v16 }
 0x58d   :  { %v11621_v31 = vpop.eup %7207 }
 0x58e   :  { %v5205_v21 = vsel %vm4928_vm0, %v11621_v31, 0.0 }
 0x58f   :  { %v11625_v41 = vpop.eup %7209  ;;  %5206 = vadd.xlane.f32.xlu0 %v5205_v21 }
 0x590   :  { %v5208_v8 = vsel %vm4928_vm0, %v11625_v41, 0.0 }
 0x591   :  { %v11629_v56 = vpop.eup %7211  ;;  %5209 = vadd.xlane.f32.xlu1 %v5208_v8 }
 0x592   :  { %v5211_v30 = vsel %vm4928_vm0, %v11629_v56, 0.0 }
 0x593   :  { %v11633_v44 = vpop.eup %7213  ;;  %5212 = vadd.xlane.f32.xlu0 %v5211_v30 }
 0x594   :  { %v5214_v32 = vsel %vm4928_vm0, %v11633_v44, 0.0 }
 0x595   :  { %5215 = vadd.xlane.f32.xlu1 %v5214_v32 }
 0x5ab   :  { %v5129_v42 = vpop.xlane.xlu0 %5128 }
 0x5ac   :  { %7215 = vrcp.f32 %v5129_v42 }
 0x5af   :  { %v5132_v19 = vpop.xlane.xlu1 %5131  ;;  %v5123_v43 = vpop.xlane.xlu0 %5122 }
 0x5b0   :  { %7217 = vrcp.f32 %v5132_v19 }
 0x5b1   :  { %7219 = vrcp.f32 %v5123_v43 }
 0x5b3   :  { %v5126_v33 = vpop.xlane.xlu1 %5125 }
 0x5b4   :  { %7221 = vrcp.f32 %v5126_v33 }
 0x5b6   :  { %v7216_v20 = vpop.eup %7215 }
 0x5b7   :  { %v5251_v25 = vmul.f32 %v7216_v20, %v11481_v63 }
 0x5b9   :  { %5283 = vst.msk [vmem:[%s11802_s5 + $0x10] sm:$0xff] %vm4928_vm0, %v5251_v25 }
 0x5ba   :  { %v7218_v23 = vpop.eup %7217 }
 0x5bb   :  { %v7220_v7 = vpop.eup %7219  ;;  %v5252_v15 = vmul.f32 %v7218_v23, %v11488_v28  ;;  %v5141_v45 = vpop.xlane.xlu0 %5140 }
 0x5bc   :  { %v5249_v51 = vmul.f32 %v7220_v7, %v11485_v55  ;;  %7223 = vrcp.f32 %v5141_v45 }
 0x5bd   :  { %5284 = vst.msk [vmem:[%s11802_s5 + $0x18] sm:$0xff] %vm4928_vm0, %v5252_v15  ;;  %v5144_v52 = vpop.xlane.xlu1 %5143 }
 0x5be   :  { %v7222_v63 = vpop.eup %7221  ;;  %5281 = vst.msk [vmem:[%s11802_s5] sm:$0xff] %vm4928_vm0, %v5249_v51  ;;  %7225 = vrcp.f32 %v5144_v52 }
 0x5bf   :  { %v5250_v5 = vmul.f32 %v7222_v63, %v11495_v59  ;;  %v5135_v28 = vpop.xlane.xlu0 %5134 }
 0x5c0   :  { %7227 = vrcp.f32 %v5135_v28 }
 0x5c1   :  { %5282 = vst.msk [vmem:[%s11802_s5 + $0x8] sm:$0xff] %vm4928_vm0, %v5250_v5  ;;  %v5138_v55 = vpop.xlane.xlu1 %5137 }
 0x5c2   :  { %7229 = vrcp.f32 %v5138_v55 }
 0x5c6   :  { %v7224_v18 = vpop.eup %7223 }
 0x5c7   :  { %v5255_v47 = vmul.f32 %v7224_v18, %v11501_v29 }
 0x5c8   :  { %v7226_v46 = vpop.eup %7225 }
 0x5c9   :  { %5287 = vst.msk [vmem:[%s11802_s5 + $0x30] sm:$0xff] %vm4928_vm0, %v5255_v47  ;;  %v5256_v59 = vmul.f32 %v7226_v46, %v11505_v40 }
 0x5ca   :  { %v7228_v22 = vpop.eup %7227 }
 0x5cb   :  { %5288 = vst.msk [vmem:[%s11802_s5 + $0x38] sm:$0xff] %vm4928_vm0, %v5256_v59  ;;  %v5253_v38 = vmul.f32 %v7228_v22, %v11510_v9  ;;  %v5153_v14 = vpop.xlane.xlu0 %5152 }
 0x5cc   :  { %v7230_v37 = vpop.eup %7229  ;;  %7231 = vrcp.f32 %v5153_v14 }
 0x5cd   :  { %5285 = vst.msk [vmem:[%s11802_s5 + $0x20] sm:$0xff] %vm4928_vm0, %v5253_v38  ;;  %v5254_v29 = vmul.f32 %v7230_v37, %v11515_v17  ;;  %v5156_v57 = vpop.xlane.xlu1 %5155 }
 0x5ce   :  { %7233 = vrcp.f32 %v5156_v57 }
 0x5cf   :  { %5286 = vst.msk [vmem:[%s11802_s5 + $0x28] sm:$0xff] %vm4928_vm0, %v5254_v29  ;;  %v5147_v40 = vpop.xlane.xlu0 %5146 }
 0x5d0   :  { %7235 = vrcp.f32 %v5147_v40 }
 0x5d1   :  { %v5150_v9 = vpop.xlane.xlu1 %5149 }
 0x5d2   :  { %7237 = vrcp.f32 %v5150_v9 }
 0x5d6   :  { %v7232_v50 = vpop.eup %7231 }
 0x5d7   :  { %v5259_v27 = vmul.f32 %v7232_v50, %v11521_v1 }
 0x5d8   :  { %v7234_v10 = vpop.eup %7233 }
 0x5d9   :  { %5291 = vst.msk [vmem:[%s11802_s5 + $0x50] sm:$0xff] %vm4928_vm0, %v5259_v27  ;;  %v5260_v17 = vmul.f32 %v7234_v10, %v11525_v48 }
 0x5da   :  { %v7236_v53 = vpop.eup %7235 }
 0x5db   :  { %5292 = vst.msk [vmem:[%s11802_s5 + $0x58] sm:$0xff] %vm4928_vm0, %v5260_v17  ;;  %v5257_v34 = vmul.f32 %v7236_v53, %v11530_v6  ;;  %v5165_v39 = vpop.xlane.xlu0 %5164 }
 0x5dc   :  { %v7238_v16 = vpop.eup %7237  ;;  %7239 = vrcp.f32 %v5165_v39 }
 0x5dd   :  { %5289 = vst.msk [vmem:[%s11802_s5 + $0x40] sm:$0xff] %vm4928_vm0, %v5257_v34  ;;  %v5258_v1 = vmul.f32 %v7238_v16, %v11535_v24  ;;  %v5168_v21 = vpop.xlane.xlu1 %5167 }
 0x5de   :  { %7241 = vrcp.f32 %v5168_v21 }
 0x5df   :  { %5290 = vst.msk [vmem:[%s11802_s5 + $0x48] sm:$0xff] %vm4928_vm0, %v5258_v1  ;;  %v5159_v48 = vpop.xlane.xlu0 %5158 }
 0x5e0   :  { %7243 = vrcp.f32 %v5159_v48 }
 0x5e1   :  { %v5162_v6 = vpop.xlane.xlu1 %5161 }
 0x5e2   :  { %7245 = vrcp.f32 %v5162_v6 }
 0x5e6   :  { %v7240_v8 = vpop.eup %7239 }
 0x5e7   :  { %v5263_v30 = vmul.f32 %v7240_v8, %v11541_v3 }
 0x5e8   :  { %v7242_v32 = vpop.eup %7241 }
 0x5e9   :  { %5295 = vst.msk [vmem:[%s11802_s5 + $0x70] sm:$0xff] %vm4928_vm0, %v5263_v30  ;;  %v5264_v24 = vmul.f32 %v7242_v32, %v11545_v54 }
 0x5ea   :  { %v7244_v42 = vpop.eup %7243 }
 0x5eb   :  { %5296 = vst.msk [vmem:[%s11802_s5 + $0x78] sm:$0xff] %vm4928_vm0, %v5264_v24  ;;  %v5261_v19 = vmul.f32 %v7244_v42, %v11550_v35  ;;  %v5177_v43 = vpop.xlane.xlu0 %5176 }
 0x5ec   :  { %v7246_v33 = vpop.eup %7245  ;;  %7247 = vrcp.f32 %v5177_v43 }
 0x5ed   :  { %5293 = vst.msk [vmem:[%s11802_s5 + $0x60] sm:$0xff] %vm4928_vm0, %v5261_v19  ;;  %v5262_v3 = vmul.f32 %v7246_v33, %v11555_v12  ;;  %v5180_v20 = vpop.xlane.xlu1 %5179 }
 0x5ee   :  { %7249 = vrcp.f32 %v5180_v20 }
 0x5ef   :  { %5294 = vst.msk [vmem:[%s11802_s5 + $0x68] sm:$0xff] %vm4928_vm0, %v5262_v3  ;;  %v5171_v54 = vpop.xlane.xlu0 %5170 }
 0x5f0   :  { %7251 = vrcp.f32 %v5171_v54 }
 0x5f1   :  { %v5174_v35 = vpop.xlane.xlu1 %5173 }
 0x5f2   :  { %7253 = vrcp.f32 %v5174_v35 }
 0x5f6   :  { %v7248_v25 = vpop.eup %7247 }
 0x5f7   :  { %v5267_v23 = vmul.f32 %v7248_v25, %v11561_v62 }
 0x5f8   :  { %v7250_v7 = vpop.eup %7249 }
 0x5f9   :  { %5299 = vst.msk [vmem:[%s11802_s5 + $0x90] sm:$0xff] %vm4928_vm0, %v5267_v23  ;;  %v5268_v12 = vmul.f32 %v7250_v7, %v11565_v60 }
 0x5fa   :  { %v7252_v15 = vpop.eup %7251 }
 0x5fb   :  { %5300 = vst.msk [vmem:[%s11802_s5 + $0x98] sm:$0xff] %vm4928_vm0, %v5268_v12  ;;  %v5265_v45 = vmul.f32 %v7252_v15, %v11570_v0  ;;  %v5189_v51 = vpop.xlane.xlu0 %5188 }
 0x5fc   :  { %v7254_v52 = vpop.eup %7253  ;;  %7255 = vrcp.f32 %v5189_v51 }
 0x5fd   :  { %5297 = vst.msk [vmem:[%s11802_s5 + $0x80] sm:$0xff] %vm4928_vm0, %v5265_v45  ;;  %v5266_v62 = vmul.f32 %v7254_v52, %v11575_v61  ;;  %v5192_v63 = vpop.xlane.xlu1 %5191 }
 0x5fe   :  { %7257 = vrcp.f32 %v5192_v63 }
 0x5ff   :  { %5298 = vst.msk [vmem:[%s11802_s5 + $0x88] sm:$0xff] %vm4928_vm0, %v5266_v62  ;;  %v5183_v60 = vpop.xlane.xlu0 %5182 }
 0x600   :  { %7259 = vrcp.f32 %v5183_v60 }
 0x601   :  { %v5186_v0 = vpop.xlane.xlu1 %5185 }
 0x602   :  { %7261 = vrcp.f32 %v5186_v0 }
 0x606   :  { %v7256_v5 = vpop.eup %7255 }
 0x607   :  { %v5271_v28 = vmul.f32 %v7256_v5, %v11581_v11 }
 0x608   :  { %v7258_v55 = vpop.eup %7257 }
 0x609   :  { %5303 = vst.msk [vmem:[%s11802_s5 + $0xb0] sm:$0xff] %vm4928_vm0, %v5271_v28  ;;  %v5272_v61 = vmul.f32 %v7258_v55, %v11585_v58 }
 0x60a   :  { %v7260_v18 = vpop.eup %7259 }
 0x60b   :  { %5304 = vst.msk [vmem:[%s11802_s5 + $0xb8] sm:$0xff] %vm4928_vm0, %v5272_v61  ;;  %v5269_v47 = vmul.f32 %v7260_v18, %v11590_v13  ;;  %v5201_v46 = vpop.xlane.xlu0 %5200 }
 0x60c   :  { %v7262_v59 = vpop.eup %7261  ;;  %7263 = vrcp.f32 %v5201_v46 }
 0x60d   :  { %5301 = vst.msk [vmem:[%s11802_s5 + $0xa0] sm:$0xff] %vm4928_vm0, %v5269_v47  ;;  %v5270_v11 = vmul.f32 %v7262_v59, %v11595_v36  ;;  %v5204_v22 = vpop.xlane.xlu1 %5203 }
 0x60e   :  { %7265 = vrcp.f32 %v5204_v22 }
 0x60f   :  { %5302 = vst.msk [vmem:[%s11802_s5 + $0xa8] sm:$0xff] %vm4928_vm0, %v5270_v11  ;;  %v5195_v58 = vpop.xlane.xlu0 %5194 }
 0x610   :  { %7267 = vrcp.f32 %v5195_v58 }
 0x611   :  { %v5198_v13 = vpop.xlane.xlu1 %5197 }
 0x612   :  { %7269 = vrcp.f32 %v5198_v13 }
 0x616   :  { %v7264_v38 = vpop.eup %7263 }
 0x617   :  { %v5275_v14 = vmul.f32 %v7264_v38, %v11601_v4 }
 0x618   :  { %v7266_v37 = vpop.eup %7265 }
 0x619   :  { %5307 = vst.msk [vmem:[%s11802_s5 + $0xd0] sm:$0xff] %vm4928_vm0, %v5275_v14  ;;  %v5276_v36 = vmul.f32 %v7266_v37, %v11605_v2 }
 0x61a   :  { %v7268_v29 = vpop.eup %7267 }
 0x61b   :  { %5308 = vst.msk [vmem:[%s11802_s5 + $0xd8] sm:$0xff] %vm4928_vm0, %v5276_v36  ;;  %v5273_v57 = vmul.f32 %v7268_v29, %v11610_v26 }
 0x61c   :  { %v7270_v40 = vpop.eup %7269  ;;  %v5207_v9 = vpop.xlane.xlu0 %5206 }
 0x61d   :  { %5305 = vst.msk [vmem:[%s11802_s5 + $0xc0] sm:$0xff] %vm4928_vm0, %v5273_v57  ;;  %v5274_v4 = vmul.f32 %v7270_v40, %v11615_v49  ;;  %7271 = vrcp.f32 %v5207_v9 }
 0x61e   :  { %v5210_v50 = vpop.xlane.xlu1 %5209 }
 0x61f   :  { %5306 = vst.msk [vmem:[%s11802_s5 + $0xc8] sm:$0xff] %vm4928_vm0, %v5274_v4  ;;  %7273 = vrcp.f32 %v5210_v50 }
 0x620   :  { %v5213_v2 = vpop.xlane.xlu0 %5212 }
 0x621   :  { %7275 = vrcp.f32 %v5213_v2 }
 0x622   :  { %v5216_v26 = vpop.xlane.xlu1 %5215 }
 0x623   :  { %7277 = vrcp.f32 %v5216_v26 }
 0x627   :  { %v7272_v27 = vpop.eup %7271 }
 0x628   :  { %v5277_v10 = vmul.f32 %v7272_v27, %v11621_v31 }
 0x629   :  { %v7274_v17 = vpop.eup %7273 }
 0x62a   :  { %5309 = vst.msk [vmem:[%s11802_s5 + $0xe0] sm:$0xff] %vm4928_vm0, %v5277_v10  ;;  %v5278_v49 = vmul.f32 %v7274_v17, %v11625_v41 }
 0x62b   :  { %v7276_v53 = vpop.eup %7275 }
 0x62c   :  { %5310 = vst.msk [vmem:[%s11802_s5 + $0xe8] sm:$0xff] %vm4928_vm0, %v5278_v49  ;;  %v5279_v34 = vmul.f32 %v7276_v53, %v11629_v56 }
 0x62d   :  { %v7278_v39 = vpop.eup %7277 }
 0x62e   :  { %5311 = vst.msk [vmem:[%s11802_s5 + $0xf0] sm:$0xff] %vm4928_vm0, %v5279_v34  ;;  %v5280_v31 = vmul.f32 %v7278_v39, %v11633_v44 }
 0x630   :  { %5312 = vst.msk [vmem:[%s11802_s5 + $0xf8] sm:$0xff] %vm4928_vm0, %v5280_v31 }

</bundles_post_ra>
